<compile_context>
chip_gen: v5e
topology: v5e:2x2
jax: 0.10.0
libtpu: 0.0.40
codegen_flags: <defaults>
</compile_context>

<pallas_src>
import functools

import jax
import jax.numpy as jnp
from jax import lax
from jax.experimental import pallas as pl
from jax.experimental.pallas import tpu as pltpu

_NEG = -1e30  # large finite negative: exp() underflows to exactly 0, no NaN risk


def _cca_kernel(x_ref, wq_ref, bq_ref, wvk_ref, bvk_ref, gamma_ref, o_ref,
                k_row, v_row, kt_col, vt_col, *, h_valid):
    # x_ref   : (1, Hp, W, C) bf16  -- full (H-padded) image, constant over t
    # wq_ref  : (C, Cq)   bf16      -- query projection
    # bq_ref  : (1, Cq)   f32
    # wvk_ref : (C, C+Cq) bf16      -- fused [Wv | Wk] (V first: lane-aligned)
    # bvk_ref : (1, C+Cq) f32
    # gamma   : (1,) f32 in SMEM
    # o_ref   : (1, TH, W, C) f32   -- one tile of query rows
    # k_row   : (Hp, W, Cq) bf16    -- full-image K, row-major
    # v_row   : (Hp, W, C)  bf16    -- full-image V, row-major
    # kt_col  : (W, Hp, Cq) bf16    -- full-image K, column-major
    # vt_col  : (W, Hp, C)  bf16    -- full-image V, column-major
    t = pl.program_id(1)
    _, Hp, W, C = x_ref.shape
    TH = o_ref.shape[1]
    Cq = kt_col.shape[-1]
    n_tiles = Hp // TH

    # ---- once per image: project K / V for all rows into VMEM scratch ----
    @pl.when(t == 0)
    def _build_kv():
        def project(x_chunk):
            vk = (jnp.dot(x_chunk.reshape(TH * W, C), wvk_ref[...],
                          preferred_element_type=jnp.float32)
                  + bvk_ref[...]).reshape(TH, W, C + Cq)
            # cast to bf16 BEFORE storing / transposing
            return vk[..., :C].astype(jnp.bfloat16), vk[..., C:].astype(jnp.bfloat16)

        if n_tiles == 1:
            v_bf, k_bf = project(x_ref[0])
            v_row[...] = v_bf
            k_row[...] = k_bf
        else:
            def body(ci, carry):
                r0 = pl.multiple_of(ci * TH, TH)
                v_bf, k_bf = project(x_ref[0, pl.ds(r0, TH), :, :])
                v_row[pl.ds(r0, TH)] = v_bf
                k_row[pl.ds(r0, TH)] = k_bf
                return carry
            lax.fori_loop(0, n_tiles, body, 0)

        # column-major copies for the vertical (along-H) branch (bf16 relayout)
        kt_col[...] = pltpu.einshape("hwd->whd", k_row[...])
        vt_col[...] = pltpu.einshape("hwc->whc", v_row[...])

    # ---- per row tile: Q projection only (K / V come from scratch) ----
    if n_tiles == 1:
        row0 = 0
        x_tile = x_ref[0]                                  # (TH, W, C) bf16
        k_bf = k_row[...]                                  # (TH, W, Cq)
        v_bf = v_row[...]                                  # (TH, W, C)
    else:
        row0 = pl.multiple_of(t * TH, TH)
        x_tile = x_ref[0, pl.ds(row0, TH), :, :]
        k_bf = k_row[pl.ds(row0, TH)]
        v_bf = v_row[pl.ds(row0, TH)]

    q32 = (jnp.dot(x_tile.reshape(TH * W, C), wq_ref[...],
                   preferred_element_type=jnp.float32)
           + bq_ref[...]).reshape(TH, W, Cq)
    q_bf = q32.astype(jnp.bfloat16)                        # (TH, W, Cq)
    qt_bf = pltpu.einshape("hwd->whd", q_bf)               # (W, TH, Cq)

    # ---- criss-cross energies (bf16 operands, f32 accumulation) ----
    # vertical:   e_h[w, h, h'] = sum_d Q[h, w, d] K[h', w, d]
    e_h = jnp.einsum("whd,wgd->whg", qt_bf, kt_col[...],
                     preferred_element_type=jnp.float32)   # (W, TH, Hp)
    # horizontal: e_w[h, w, w'] = sum_d Q[h, w, d] K[h, w', d]
    e_w = jnp.einsum("hwd,hvd->hwv", q_bf, k_bf,
                     preferred_element_type=jnp.float32)   # (TH, W, W)

    # mask the diagonal of the vertical branch (+ any padded key rows)
    rows = row0 + lax.broadcasted_iota(jnp.int32, (TH, Hp), 0)
    cols = lax.broadcasted_iota(jnp.int32, (TH, Hp), 1)
    mask = rows == cols
    if h_valid < Hp:
        mask = jnp.logical_or(mask, cols >= h_valid)
    e_h = jnp.where(mask[None, :, :], _NEG, e_h)

    # ---- joint softmax over the concatenated (H + W) key axis (f32 stats) ----
    m_h = jnp.max(e_h, axis=-1)                            # (W, TH)
    m_w = jnp.max(e_w, axis=-1)                            # (TH, W)
    m = jnp.maximum(m_w, m_h.T)                            # (TH, W)
    p_w = jnp.exp(e_w - m[:, :, None])                     # (TH, W, W)
    p_h = jnp.exp(e_h - m.T[:, :, None])                   # (W, TH, Hp)
    denom = jnp.sum(p_w, axis=-1) + jnp.sum(p_h, axis=-1).T    # (TH, W)
    inv = pl.reciprocal(denom, approx=True)                # EUP slot, ~free

    # ---- aggregate values (bf16 operands, f32 accumulation) ----
    out_w = jnp.einsum("hwv,hvc->hwc", p_w.astype(jnp.bfloat16), v_bf,
                       preferred_element_type=jnp.float32)         # (TH, W, C)
    out_ht = jnp.einsum("whg,wgc->whc", p_h.astype(jnp.bfloat16), vt_col[...],
                        preferred_element_type=jnp.float32)        # (W, TH, C)
    # transpose back in bf16 (halves the epilogue relayout traffic)
    out_h = pltpu.einshape("whc->hwc", out_ht.astype(jnp.bfloat16))

    gamma = gamma_ref[0]
    o_ref[0] = (gamma * ((out_h.astype(jnp.float32) + out_w) * inv[:, :, None])
                + x_tile.astype(jnp.float32)).astype(o_ref.dtype)


def _pick_tile_h(H, target=32):
    """Row-tile size: big enough to fill the MXU M dimension."""
    if H <= target:
        return H
    # Prefer a divisor of H that is a multiple of 16 (bf16 sublane packing) and
    # close to `target`; otherwise pad H up to a multiple of `target`.
    for th in range(target, 15, -1):
        if th % 16 == 0 and H % th == 0:
            return th
    return target


def _vmem_cap_bytes():
    try:
        return int(0.85 * pltpu.get_tpu_info().vmem_capacity_bytes)
    except Exception:
        return 64 * 1024 * 1024      # conservative fallback (v7x-sized)


def _vmem_limit_bytes(Hp, W, C, Cq, TH):
    f32, bf16 = 4, 2
    n = 2 * Hp * W * C * bf16                     # bf16 x block, double-buffered
    n += 2 * TH * W * C * f32                     # out tile, double-buffered
    n += 2 * Hp * W * (Cq + C) * bf16             # K/V scratch (row- + col-major)
    n += 2 * (C * (2 * Cq + C) * bf16 + (2 * Cq + C) * f32)   # weights / biases
    # dominant live temporaries
    n += 2 * W * TH * Hp * f32                    # e_h, p_h
    n += 2 * TH * W * W * f32                     # e_w, p_w
    n += TH * W * (C + Cq) * f32                  # KV-chunk / Q projection
    n += 2 * TH * W * C * f32                     # out_w, out_ht
    n += Hp * W * C * bf16                        # one-shot V transpose temp
    n = int(1.4 * n)                              # relayout / spill headroom
    cap = _vmem_cap_bytes()
    return min(max(n, 32 * 1024 * 1024), cap)


@functools.partial(jax.jit, static_argnames=("tile_h",))
def criss_cross_attention(x_nchw, params, *, tile_h=None):
    """x_nchw: (B, C, H, W) float32 — same layout convention as PyTorch."""
    B, C, H, W = x_nchw.shape
    Cq = params["wq"].shape[1]
    TH = tile_h if tile_h is not None else _pick_tile_h(H)
    Hp = -(-H // TH) * TH
    n_ht = Hp // TH

    # TODO(synk): keep activations NHWC end-to-end inside a full network and
    # drop these wrapper-level layout transposes.
    x = jnp.transpose(x_nchw, (0, 2, 3, 1)).astype(jnp.bfloat16)   # NCHW -> NHWC
    if Hp != H:
        x = jnp.pad(x, ((0, 0), (0, Hp - H), (0, 0), (0, 0)))

    # Projection weights as bf16 MXU operands; biases stay f32.
    w_q = params["wq"].astype(jnp.bfloat16)
    b_q = params["bq"].astype(jnp.float32)
    # V first so the wide V segment of the fused output starts at lane 0.
    w_vk = jnp.concatenate([params["wv"], params["wk"]], axis=1).astype(jnp.bfloat16)
    b_vk = jnp.concatenate([params["bv"], params["bk"]], axis=1).astype(jnp.float32)

    kernel = functools.partial(_cca_kernel, h_valid=H)

    out = pl.pallas_call(
        kernel,
        out_shape=jax.ShapeDtypeStruct((B, Hp, W, C), jnp.float32),
        grid=(B, n_ht),
        in_specs=[
            pl.BlockSpec((1, Hp, W, C), lambda b, t: (b, 0, 0, 0)),   # full image
            pl.BlockSpec((C, Cq), lambda b, t: (0, 0)),
            pl.BlockSpec((1, Cq), lambda b, t: (0, 0)),
            pl.BlockSpec((C, C + Cq), lambda b, t: (0, 0)),
            pl.BlockSpec((1, C + Cq), lambda b, t: (0, 0)),
            pl.BlockSpec(memory_space=pltpu.MemorySpace.SMEM),        # gamma
        ],
        out_specs=pl.BlockSpec((1, TH, W, C), lambda b, t: (b, t, 0, 0)),
        scratch_shapes=[
            pltpu.VMEM((Hp, W, Cq), jnp.bfloat16),   # K row-major
            pltpu.VMEM((Hp, W, C), jnp.bfloat16),    # V row-major
            pltpu.VMEM((W, Hp, Cq), jnp.bfloat16),   # K column-major
            pltpu.VMEM((W, Hp, C), jnp.bfloat16),    # V column-major
        ],
        compiler_params=pltpu.CompilerParams(
            dimension_semantics=("parallel", "arbitrary"),
            vmem_limit_bytes=_vmem_limit_bytes(Hp, W, C, Cq, TH)),
    )(x, w_q, b_q, w_vk, b_vk, params["gamma"])

    out = out[:, :H]
    return jnp.transpose(out, (0, 3, 1, 2))                # NHWC -> NCHW


def cca_reference(x_nchw, p):
    """Pure-JAX mirror of the PyTorch forward (for validation)."""
    x = jnp.transpose(x_nchw, (0, 2, 3, 1)).astype(jnp.float32)  # (B,H,W,C)
    B, H, W, C = x.shape
    q = jnp.einsum("bhwc,cd->bhwd", x, p["wq"]) + p["bq"][0]
    k = jnp.einsum("bhwc,cd->bhwd", x, p["wk"]) + p["bk"][0]
    v = jnp.einsum("bhwc,ce->bhwe", x, p["wv"]) + p["bv"][0]

    e_h = jnp.einsum("bhwd,bgwd->bhwg", q, k)            # (B,H,W,H)
    diag = jnp.eye(H, dtype=bool)[None, :, None, :]
    e_h = jnp.where(diag, -jnp.inf, e_h)
    e_w = jnp.einsum("bhwd,bhvd->bhwv", q, k)            # (B,H,W,W)

    att = jax.nn.softmax(jnp.concatenate([e_h, e_w], axis=-1), axis=-1)
    att_h, att_w = att[..., :H], att[..., H:]

    out_h = jnp.einsum("bhwg,bgwc->bhwc", att_h, v)
    out_w = jnp.einsum("bhwv,bhvc->bhwc", att_w, v)
    out = p["gamma"][0] * (out_h + out_w) + x
    return jnp.transpose(out, (0, 3, 1, 2))


def make_params(key, in_dim):
    """Deterministic synthetic parameters (conv1x1 weights stored as (Cin, Cout))."""
    cq = in_dim // 8
    ks = jax.random.split(key, 6)
    s = 0.1
    return {
        "wq": s * jax.random.normal(ks[0], (in_dim, cq), jnp.float32),
        "bq": s * jax.random.normal(ks[1], (1, cq), jnp.float32),
        "wk": s * jax.random.normal(ks[2], (in_dim, cq), jnp.float32),
        "bk": s * jax.random.normal(ks[3], (1, cq), jnp.float32),
        "wv": s * jax.random.normal(ks[4], (in_dim, in_dim), jnp.float32),
        "bv": s * jax.random.normal(ks[5], (1, in_dim), jnp.float32),
        # PyTorch inits gamma to 0 (output == x); use 0.5 so the attention
        # path is actually exercised in this synthetic test.
        "gamma": jnp.array([0.5], jnp.float32),
    }


if __name__ == "__main__":
    key = jax.random.PRNGKey(0)

    # config 1: small image, single row tile
    B, C, H, W = 2, 32, 16, 16
    kx, kp, key = jax.random.split(key, 3)
    x = jax.random.normal(kx, (B, C, H, W), jnp.float32)
    params = make_params(kp, C)
    out = jax.block_until_ready(criss_cross_attention(x, params))
    ref = cca_reference(x, params)
    assert out.shape == (B, C, H, W)
    err1 = float(jnp.max(jnp.abs(out - ref)))
    assert jnp.allclose(out, ref, atol=2e-2, rtol=2e-2), f"max err {err1}"

    # config 2: multiple row tiles + non-divisible H (padding + key masking)
    B2, C2, H2, W2 = 1, 32, 40, 16
    kx2, kp2, key = jax.random.split(key, 3)
    x2 = jax.random.normal(kx2, (B2, C2, H2, W2), jnp.float32)
    params2 = make_params(kp2, C2)
    out2 = jax.block_until_ready(criss_cross_attention(x2, params2))
    ref2 = cca_reference(x2, params2)
    assert out2.shape == (B2, C2, H2, W2)
    err2 = float(jnp.max(jnp.abs(out2 - ref2)))
    assert jnp.allclose(out2, ref2, atol=2e-2, rtol=2e-2), f"max err {err2}"

    print("KERNEL_OK")
</pallas_src>

<mosaic_0001>
module attributes {stable_mosaic.version = 11 : i64} {
  func.func @_cca_kernel(%arg0: i32, %arg1: i32, %arg2: memref<1x16x16x32xbf16, #tpu.memory_space<vmem>>, %arg3: memref<32x4xbf16, #tpu.memory_space<vmem>>, %arg4: memref<1x4xf32, #tpu.memory_space<vmem>>, %arg5: memref<32x36xbf16, #tpu.memory_space<vmem>>, %arg6: memref<1x36xf32, #tpu.memory_space<vmem>>, %arg7: memref<1xf32, #tpu.memory_space<smem>>, %arg8: memref<1x16x16x32xf32, #tpu.memory_space<vmem>>, %arg9: memref<16x16x4xbf16, #tpu.memory_space<vmem>>, %arg10: memref<16x16x32xbf16, #tpu.memory_space<vmem>>, %arg11: memref<16x16x4xbf16, #tpu.memory_space<vmem>>, %arg12: memref<16x16x32xbf16, #tpu.memory_space<vmem>>) attributes {dimension_semantics = [#tpu.dimension_semantics<parallel>, #tpu.dimension_semantics<arbitrary>], iteration_bounds = array<i64: 2, 1>, scalar_prefetch = 0 : i64, scratch_operands = 4 : i64, tpu.core_type = #tpu.core_type<tc>, window_params = [{transform_indices = @transform_0, window_bounds = array<i64: 1, 16, 16, 32>}, {pipeline_mode = #tpu.pipeline_mode<synchronous>, transform_indices = @transform_1, window_bounds = array<i64: 32, 4>}, {pipeline_mode = #tpu.pipeline_mode<synchronous>, transform_indices = @transform_2, window_bounds = array<i64: 1, 4>}, {pipeline_mode = #tpu.pipeline_mode<synchronous>, transform_indices = @transform_3, window_bounds = array<i64: 32, 36>}, {pipeline_mode = #tpu.pipeline_mode<synchronous>, transform_indices = @transform_4, window_bounds = array<i64: 1, 36>}, {transform_indices = @transform_5, window_bounds = array<i64: 1>}, {transform_indices = @transform_6, window_bounds = array<i64: 1, 16, 16, 32>}]} {
    %c0_i32 = arith.constant 0 : i32
    %0 = arith.cmpi eq, %arg1, %c0_i32 : i32
    %1 = arith.extui %0 : i1 to i32
    %c0_i32_0 = arith.constant 0 : i32
    %2 = arith.cmpi ne, %1, %c0_i32_0 : i32
    scf.if %2 {
      %c0_35 = arith.constant 0 : index
      %c0_36 = arith.constant 0 : index
      %c0_37 = arith.constant 0 : index
      %c0_38 = arith.constant 0 : index
      %67 = vector.load %arg2[%c0_35, %c0_36, %c0_37, %c0_38] : memref<1x16x16x32xbf16, #tpu.memory_space<vmem>>, vector<1x16x16x32xbf16>
      %68 = vector.shape_cast %67 : vector<1x16x16x32xbf16> to vector<16x16x32xbf16>
      %69 = vector.shape_cast %68 : vector<16x16x32xbf16> to vector<256x32xbf16>
      %c0_39 = arith.constant 0 : index
      %c0_40 = arith.constant 0 : index
      %70 = vector.load %arg5[%c0_39, %c0_40] : memref<32x36xbf16, #tpu.memory_space<vmem>>, vector<32x36xbf16>
      %cst_41 = arith.constant dense<0.000000e+00> : vector<256x36xf32>
      %71 = tpu.matmul %69, %70, %cst_41 {dimension_numbers = #tpu.dot_dimension_numbers<[1], [0], [0], [1], [0, 0, 1, 1], [], []>} : vector<256x32xbf16>, vector<32x36xbf16>, vector<256x36xf32> -> vector<256x36xf32>
      %c0_42 = arith.constant 0 : index
      %c0_43 = arith.constant 0 : index
      %72 = vector.load %arg6[%c0_42, %c0_43] : memref<1x36xf32, #tpu.memory_space<vmem>>, vector<1x36xf32>
      %73 = vector.broadcast %72 : vector<1x36xf32> to vector<256x36xf32>
      %74 = arith.addf %71, %73 : vector<256x36xf32>
      %75 = vector.shape_cast %74 : vector<256x36xf32> to vector<16x16x36xf32>
      %76 = vector.extract_strided_slice %75 {offsets = [0, 0, 0], sizes = [16, 16, 32], strides = [1, 1, 1]} : vector<16x16x36xf32> to vector<16x16x32xf32>
      %77 = arith.truncf %76 : vector<16x16x32xf32> to vector<16x16x32xbf16>
      %78 = vector.extract_strided_slice %75 {offsets = [0, 0, 32], sizes = [16, 16, 4], strides = [1, 1, 1]} : vector<16x16x36xf32> to vector<16x16x4xf32>
      %79 = arith.truncf %78 : vector<16x16x4xf32> to vector<16x16x4xbf16>
      %c0_44 = arith.constant 0 : index
      %c0_45 = arith.constant 0 : index
      %c0_46 = arith.constant 0 : index
      %80 = vector.load %arg10[%c0_44, %c0_45, %c0_46] : memref<16x16x32xbf16, #tpu.memory_space<vmem>>, vector<16x16x32xbf16>
      tpu.vector_store %arg10[%c0_44, %c0_45, %c0_46], %77 {strides = array<i32>} : memref<16x16x32xbf16, #tpu.memory_space<vmem>>, vector<16x16x32xbf16>,
      %c0_47 = arith.constant 0 : index
      %c0_48 = arith.constant 0 : index
      %c0_49 = arith.constant 0 : index
      %81 = vector.load %arg9[%c0_47, %c0_48, %c0_49] : memref<16x16x4xbf16, #tpu.memory_space<vmem>>, vector<16x16x4xbf16>
      tpu.vector_store %arg9[%c0_47, %c0_48, %c0_49], %79 {strides = array<i32>} : memref<16x16x4xbf16, #tpu.memory_space<vmem>>, vector<16x16x4xbf16>,
      %c0_50 = arith.constant 0 : index
      %c0_51 = arith.constant 0 : index
      %c0_52 = arith.constant 0 : index
      %82 = vector.load %arg9[%c0_50, %c0_51, %c0_52] : memref<16x16x4xbf16, #tpu.memory_space<vmem>>, vector<16x16x4xbf16>
      %83 = tpu.transpose %82, [1, 0, 2] : vector<16x16x4xbf16> -> vector<16x16x4xbf16>
      %c0_53 = arith.constant 0 : index
      %c0_54 = arith.constant 0 : index
      %c0_55 = arith.constant 0 : index
      %84 = vector.load %arg11[%c0_53, %c0_54, %c0_55] : memref<16x16x4xbf16, #tpu.memory_space<vmem>>, vector<16x16x4xbf16>
      tpu.vector_store %arg11[%c0_53, %c0_54, %c0_55], %83 {strides = array<i32>} : memref<16x16x4xbf16, #tpu.memory_space<vmem>>, vector<16x16x4xbf16>,
      %c0_56 = arith.constant 0 : index
      %c0_57 = arith.constant 0 : index
      %c0_58 = arith.constant 0 : index
      %85 = vector.load %arg10[%c0_56, %c0_57, %c0_58] : memref<16x16x32xbf16, #tpu.memory_space<vmem>>, vector<16x16x32xbf16>
      %86 = tpu.transpose %85, [1, 0, 2] : vector<16x16x32xbf16> -> vector<16x16x32xbf16>
      %c0_59 = arith.constant 0 : index
      %c0_60 = arith.constant 0 : index
      %c0_61 = arith.constant 0 : index
      %87 = vector.load %arg12[%c0_59, %c0_60, %c0_61] : memref<16x16x32xbf16, #tpu.memory_space<vmem>>, vector<16x16x32xbf16>
      tpu.vector_store %arg12[%c0_59, %c0_60, %c0_61], %86 {strides = array<i32>} : memref<16x16x32xbf16, #tpu.memory_space<vmem>>, vector<16x16x32xbf16>,
    } else {
    }
    %c0 = arith.constant 0 : index
    %c0_1 = arith.constant 0 : index
    %c0_2 = arith.constant 0 : index
    %c0_3 = arith.constant 0 : index
    %3 = vector.load %arg2[%c0, %c0_1, %c0_2, %c0_3] : memref<1x16x16x32xbf16, #tpu.memory_space<vmem>>, vector<1x16x16x32xbf16>
    %4 = vector.shape_cast %3 : vector<1x16x16x32xbf16> to vector<16x16x32xbf16>
    %c0_4 = arith.constant 0 : index
    %c0_5 = arith.constant 0 : index
    %c0_6 = arith.constant 0 : index
    %5 = vector.load %arg9[%c0_4, %c0_5, %c0_6] : memref<16x16x4xbf16, #tpu.memory_space<vmem>>, vector<16x16x4xbf16>
    %c0_7 = arith.constant 0 : index
    %c0_8 = arith.constant 0 : index
    %c0_9 = arith.constant 0 : index
    %6 = vector.load %arg10[%c0_7, %c0_8, %c0_9] : memref<16x16x32xbf16, #tpu.memory_space<vmem>>, vector<16x16x32xbf16>
    %7 = vector.shape_cast %4 : vector<16x16x32xbf16> to vector<256x32xbf16>
    %c0_10 = arith.constant 0 : index
    %c0_11 = arith.constant 0 : index
    %8 = vector.load %arg3[%c0_10, %c0_11] : memref<32x4xbf16, #tpu.memory_space<vmem>>, vector<32x4xbf16>
    %cst = arith.constant dense<0.000000e+00> : vector<256x4xf32>
    %9 = tpu.matmul %7, %8, %cst {dimension_numbers = #tpu.dot_dimension_numbers<[1], [0], [0], [1], [0, 0, 1, 1], [], []>} : vector<256x32xbf16>, vector<32x4xbf16>, vector<256x4xf32> -> vector<256x4xf32>
    %c0_12 = arith.constant 0 : index
    %c0_13 = arith.constant 0 : index
    %10 = vector.load %arg4[%c0_12, %c0_13] : memref<1x4xf32, #tpu.memory_space<vmem>>, vector<1x4xf32>
    %11 = vector.broadcast %10 : vector<1x4xf32> to vector<256x4xf32>
    %12 = arith.addf %9, %11 : vector<256x4xf32>
    %13 = vector.shape_cast %12 : vector<256x4xf32> to vector<16x16x4xf32>
    %14 = arith.truncf %13 : vector<16x16x4xf32> to vector<16x16x4xbf16>
    %15 = tpu.transpose %14, [1, 0, 2] : vector<16x16x4xbf16> -> vector<16x16x4xbf16>
    %c0_14 = arith.constant 0 : index
    %c0_15 = arith.constant 0 : index
    %c0_16 = arith.constant 0 : index
    %16 = vector.load %arg11[%c0_14, %c0_15, %c0_16] : memref<16x16x4xbf16, #tpu.memory_space<vmem>>, vector<16x16x4xbf16>
    "tpu.trace_start"() <{level = 10 : i32, message = "whd,wgd->whg"}> : () -> ()
    %cst_17 = arith.constant dense<0.000000e+00> : vector<16x16x16xf32>
    %17 = tpu.matmul %15, %16, %cst_17 {dimension_numbers = #tpu.dot_dimension_numbers<[2], [2], [1], [1], [0, 0, 0, 1, 1, 1], [0], [0]>} : vector<16x16x4xbf16>, vector<16x16x4xbf16>, vector<16x16x16xf32> -> vector<16x16x16xf32>
    "tpu.trace_stop"() : () -> ()
    "tpu.trace_start"() <{level = 10 : i32, message = "hwd,hvd->hwv"}> : () -> ()
    %cst_18 = arith.constant dense<0.000000e+00> : vector<16x16x16xf32>
    %18 = tpu.matmul %14, %5, %cst_18 {dimension_numbers = #tpu.dot_dimension_numbers<[2], [2], [1], [1], [0, 0, 0, 1, 1, 1], [0], [0]>} : vector<16x16x4xbf16>, vector<16x16x4xbf16>, vector<16x16x16xf32> -> vector<16x16x16xf32>
    "tpu.trace_stop"() : () -> ()
    %19 = tpu.iota {dimensions = array<i32: 0>} : vector<16x16xi32>
    %c0_i32_19 = arith.constant 0 : i32
    %20 = vector.broadcast %c0_i32_19 : i32 to vector<16x16xi32>
    %21 = arith.addi %20, %19 : vector<16x16xi32>
    %22 = tpu.iota {dimensions = array<i32: 1>} : vector<16x16xi32>
    %23 = arith.cmpi eq, %21, %22 : vector<16x16xi32>
    %24 = vector.shape_cast %23 : vector<16x16xi1> to vector<1x16x16xi1>
    %cst_20 = arith.constant -1.000000e+30 : f32
    %25 = vector.shape_cast %24 : vector<1x16x16xi1> to vector<1x16x16xi1>
    %26 = vector.broadcast %25 : vector<1x16x16xi1> to vector<16x16x16xi1>
    %27 = vector.broadcast %cst_20 : f32 to vector<16x16x16xf32>
    %28 = arith.select %26, %27, %17 : vector<16x16x16xi1>, vector<16x16x16xf32>
    %cst_21 = arith.constant dense<0xFF800000> : vector<16x16xf32>
    %29 = vector.multi_reduction <maximumf>, %28, %cst_21 [2] : vector<16x16x16xf32> to vector<16x16xf32>
    %cst_22 = arith.constant dense<0xFF800000> : vector<16x16xf32>
    %30 = vector.multi_reduction <maximumf>, %18, %cst_22 [2] : vector<16x16x16xf32> to vector<16x16xf32>
    %31 = tpu.transpose %29, [1, 0] : vector<16x16xf32> -> vector<16x16xf32>
    %32 = arith.maximumf %30, %31 : vector<16x16xf32>
    %33 = vector.shape_cast %32 : vector<16x16xf32> to vector<16x16x1xf32>
    %34 = vector.broadcast %33 : vector<16x16x1xf32> to vector<16x16x16xf32>
    %35 = arith.subf %18, %34 : vector<16x16x16xf32>
    %36 = math.exp %35 : vector<16x16x16xf32>
    %37 = tpu.transpose %32, [1, 0] : vector<16x16xf32> -> vector<16x16xf32>
    %38 = vector.shape_cast %37 : vector<16x16xf32> to vector<16x16x1xf32>
    %39 = vector.broadcast %38 : vector<16x16x1xf32> to vector<16x16x16xf32>
    %40 = arith.subf %28, %39 : vector<16x16x16xf32>
    %41 = math.exp %40 : vector<16x16x16xf32>
    %cst_23 = arith.constant dense<0.000000e+00> : vector<16x16xf32>
    %42 = vector.multi_reduction <add>, %36, %cst_23 [2] : vector<16x16x16xf32> to vector<16x16xf32>
    %cst_24 = arith.constant dense<0.000000e+00> : vector<16x16xf32>
    %43 = vector.multi_reduction <add>, %41, %cst_24 [2] : vector<16x16x16xf32> to vector<16x16xf32>
    %44 = tpu.transpose %43, [1, 0] : vector<16x16xf32> -> vector<16x16xf32>
    %45 = arith.addf %42, %44 : vector<16x16xf32>
    %46 = tpu.reciprocal %45 {approx = true} : vector<16x16xf32> -> vector<16x16xf32>
    %47 = arith.truncf %36 : vector<16x16x16xf32> to vector<16x16x16xbf16>
    "tpu.trace_start"() <{level = 10 : i32, message = "hwv,hvc->hwc"}> : () -> ()
    %cst_25 = arith.constant dense<0.000000e+00> : vector<16x16x32xf32>
    %48 = tpu.matmul %47, %6, %cst_25 {dimension_numbers = #tpu.dot_dimension_numbers<[2], [1], [1], [2], [0, 0, 0, 1, 1, 2], [0], [0]>} : vector<16x16x16xbf16>, vector<16x16x32xbf16>, vector<16x16x32xf32> -> vector<16x16x32xf32>
    "tpu.trace_stop"() : () -> ()
    %49 = arith.truncf %41 : vector<16x16x16xf32> to vector<16x16x16xbf16>
    %c0_26 = arith.constant 0 : index
    %c0_27 = arith.constant 0 : index
    %c0_28 = arith.constant 0 : index
    %50 = vector.load %arg12[%c0_26, %c0_27, %c0_28] : memref<16x16x32xbf16, #tpu.memory_space<vmem>>, vector<16x16x32xbf16>
    "tpu.trace_start"() <{level = 10 : i32, message = "whg,wgc->whc"}> : () -> ()
    %cst_29 = arith.constant dense<0.000000e+00> : vector<16x16x32xf32>
    %51 = tpu.matmul %49, %50, %cst_29 {dimension_numbers = #tpu.dot_dimension_numbers<[2], [1], [1], [2], [0, 0, 0, 1, 1, 2], [0], [0]>} : vector<16x16x16xbf16>, vector<16x16x32xbf16>, vector<16x16x32xf32> -> vector<16x16x32xf32>
    "tpu.trace_stop"() : () -> ()
    %52 = arith.truncf %51 : vector<16x16x32xf32> to vector<16x16x32xbf16>
    %53 = tpu.transpose %52, [1, 0, 2] : vector<16x16x32xbf16> -> vector<16x16x32xbf16>
    %c0_30 = arith.constant 0 : index
    %54 = memref.load %arg7[%c0_30] : memref<1xf32, #tpu.memory_space<smem>>
    %55 = arith.extf %53 : vector<16x16x32xbf16> to vector<16x16x32xf32>
    %56 = arith.addf %55, %48 : vector<16x16x32xf32>
    %57 = vector.shape_cast %46 : vector<16x16xf32> to vector<16x16x1xf32>
    %58 = vector.broadcast %57 : vector<16x16x1xf32> to vector<16x16x32xf32>
    %59 = arith.mulf %56, %58 : vector<16x16x32xf32>
    %60 = vector.broadcast %54 : f32 to vector<16x16x32xf32>
    %61 = arith.mulf %60, %59 : vector<16x16x32xf32>
    %62 = arith.extf %4 : vector<16x16x32xbf16> to vector<16x16x32xf32>
    %63 = arith.addf %61, %62 : vector<16x16x32xf32>
    %c0_31 = arith.constant 0 : index
    %c0_32 = arith.constant 0 : index
    %c0_33 = arith.constant 0 : index
    %c0_34 = arith.constant 0 : index
    %64 = vector.load %arg8[%c0_31, %c0_32, %c0_33, %c0_34] : memref<1x16x16x32xf32, #tpu.memory_space<vmem>>, vector<1x16x16x32xf32>
    %65 = vector.shape_cast %64 : vector<1x16x16x32xf32> to vector<16x16x32xf32>
    %66 = vector.shape_cast %63 : vector<16x16x32xf32> to vector<1x16x16x32xf32>
    tpu.vector_store %arg8[%c0_31, %c0_32, %c0_33, %c0_34], %66 {strides = array<i32>} : memref<1x16x16x32xf32, #tpu.memory_space<vmem>>, vector<1x16x16x32xf32>,
    return
  }
  func.func @transform_0(%arg0: i32, %arg1: i32) -> (i32, i32, i32, i32) {
    %c0_i32 = arith.constant 0 : i32
    %c0_i32_0 = arith.constant 0 : i32
    %c0_i32_1 = arith.constant 0 : i32
    %c0_i32_2 = arith.constant 0 : i32
    return %arg0, %c0_i32, %c0_i32_0, %c0_i32_1 : i32, i32, i32, i32
  }
  func.func @transform_1(%arg0: i32, %arg1: i32) -> (i32, i32) {
    %c0_i32 = arith.constant 0 : i32
    %c0_i32_0 = arith.constant 0 : i32
    %c0_i32_1 = arith.constant 0 : i32
    return %c0_i32, %c0_i32_0 : i32, i32
  }
  func.func @transform_2(%arg0: i32, %arg1: i32) -> (i32, i32) {
    %c0_i32 = arith.constant 0 : i32
    %c0_i32_0 = arith.constant 0 : i32
    %c0_i32_1 = arith.constant 0 : i32
    return %c0_i32, %c0_i32_0 : i32, i32
  }
  func.func @transform_3(%arg0: i32, %arg1: i32) -> (i32, i32) {
    %c0_i32 = arith.constant 0 : i32
    %c0_i32_0 = arith.constant 0 : i32
    %c0_i32_1 = arith.constant 0 : i32
    return %c0_i32, %c0_i32_0 : i32, i32
  }
  func.func @transform_4(%arg0: i32, %arg1: i32) -> (i32, i32) {
    %c0_i32 = arith.constant 0 : i32
    %c0_i32_0 = arith.constant 0 : i32
    %c0_i32_1 = arith.constant 0 : i32
    return %c0_i32, %c0_i32_0 : i32, i32
  }
  func.func @transform_5(%arg0: i32, %arg1: i32) -> i32 {
    %c0_i32 = arith.constant 0 : i32
    %c0_i32_0 = arith.constant 0 : i32
    return %c0_i32 : i32
  }
  func.func @transform_6(%arg0: i32, %arg1: i32) -> (i32, i32, i32, i32) {
    %c0_i32 = arith.constant 0 : i32
    %c0_i32_0 = arith.constant 0 : i32
    %c0_i32_1 = arith.constant 0 : i32
    return %arg0, %arg1, %c0_i32, %c0_i32_0 : i32, i32, i32, i32
  }
}

</mosaic_0001>

<bundles_post_ra>
// kernel: criss_cross_attention.1
= control target key start
LH: loop header
LB: loop body
LE: loop exit
PB: predicated region body
PF: predicated region fallthrough
CT: control target
= control target key end

     0   :  { %s11090_s0 = inlined_call_operand.vmem [shape: bf16[2,16,16,32], index: 0, kind: input, shape index: {}]   ;;  %s11091_s1 = inlined_call_operand.vmem [shape: bf16[32,4], index: 1, kind: input, shape index: {}]   ;;  %s11092_s2 = inlined_call_operand.vmem [shape: f32[1,4], index: 2, kind: input, shape index: {}]   ;;  %s11093_s3 = inlined_call_operand.vmem [shape: bf16[32,36], index: 3, kind: input, shape index: {}]   ;;  %s11094_s4 = inlined_call_operand.vmem [shape: f32[1,36], index: 4, kind: input, shape index: {}]   ;;  %s11095_s5 = inlined_call_operand.<no memory space> [shape: f32[1], index: 5, kind: input, shape index: {}]   ;;  %s11096_s6 = inlined_call_operand.hbm [shape: f32[2,16,16,32], index: 6, kind: output, shape index: {}]  }
   0x1   :  { %11 = sst [smem:[#allocation6]] %s11095_s5 }
   0x2   :  { %12 = vsyncpa [#allocation8], 0 }
   0x3   :  { %14 = vsyncpa [#allocation8 + $0x1], 0  ;;  %s8057_s23 = smov 0   ;;  %s8059_s24 = smov 0  }
   0x4   :  { %s8061_s25 = smov 0   ;;  %s8063_s26 = smov 0  }
   0x5   :  { %s8065_s27 = smov 0   ;;  %s8067_s28 = smov 0  }
   0x6 LB: > { %s7031_s5 = sadd.s32 4294967295, %s8011_s28   ;;  %s7032_s29 = sadd.s32 4294967294, %s8011_s28   ;;  %s8011_s28 = sphi %s8067_s28, %s20_s28   ;;  %s8007_s27 = sphi %s8065_s27, %s11441_s27   ;;  %s8003_s26 = sphi %s8063_s26, %s11440_s26   ;;  %s7999_s25 = sphi %s8061_s25, %s11439_s25   ;;  %s7995_s24 = sphi %s8059_s24, %s11438_s24   ;;  %s7991_s23 = sphi %s8057_s23, %s11437_s23  }
   0x7   : > { %s32_s30 = sadd.s32 1, %s8007_s27  ;;  %s172_s7 = sadd.s32 1, %s7999_s25 }
   0x8   : > { %p34_p0 = scmp.ge.s32.totalorder %s32_s30, 2  ;;  %p182_p1 = scmp.ne.s32.totalorder %s7999_s25, %s7995_s24 }
   0x9   : > { %p183_p2 = scmp.eq.s32.totalorder %s7031_s5, 1  ;;  %p188_p3 = scmp.ne.s32.totalorder %s7995_s24, %s7991_s23 }
   0xa   : > { %s11443_s30 = smov (%p34_p0, %s32_s30), 0  ;;  %p189_p5 = scmp.eq.s32.totalorder %s7032_s29, 1 }
   0xb   : > { %p8097_p4 = por %p183_p2, %p182_p1  ;;  %s167_s9 = ssub.s32 %s8007_s27, %s11443_s30 }
   0xc   : > { %p7035_p6 = scmp.ge.s32.totalorder %s8011_s28, 1  ;;  %p170_p7 = scmp.eq.s32.totalorder %s167_s9, 0 }
   0xd   : > { %p8104_p8 = por %p189_p5, %p188_p3  ;;  %p230_p9 = scmp.lt.s32.totalorder %s8011_s28, 3 }
   0xe   : > { %s8110_s11 = scalar_select %p170_p7, %s7999_s25, %s172_s7  }
   0xf   : > { %p231_p10 = pnand %p7035_p6, %p230_p9 }
  0x11   : > { %234 = sbr.rel (%p231_p10) target bundleno = 2622 (0xa3e), region = 44 }
  0x16   : > { %v7558_v0 = vld [vmem:[%s11093_s3 + $0x8] sm:$0xff]  ;;  %p260_p11 = scmp.lt.s32.totalorder %s8003_s26, 1  ;;  %v7557_v2 = vld [vmem:[%s11093_s3] sm:$0xff]  ;;  %vm403_vm0 = vcmask 261120   ;;  %vm573_vm1 = vcmask 257024   ;;  %s8013_s12 = smov 96  }
  0x17   : > { %v7608_v1 = vld [vmem:[%s11091_s1 + $0x8] sm:$0xff]  ;;  %458 = vmatpush.bf16.msra.mxu0 %v7558_v0  ;;  %v7607_v3 = vld [vmem:[%s11091_s1] sm:$0xff]  ;;  %vm800_vm2 = vcmask 1047556   ;;  %vm734_vm3 = vcmask 27648   ;;  %vm2327_vm4 = vcmask 31744   ;;  %vm3291_vm6 = vcmask 130048  }
  0x18   : > { %1851 = vmatpush.bf16.msra.mxu1 %v7608_v1  ;;  %s261_s20 = scalar_select %p260_p11, %s8003_s26, 1  ;;  %v8166_v20 = vld [vmem:[%s11094_s4] ss:$0 sm:$0xff]  ;;  %vm3519_vm8 = vcmask 130112   ;;  %vm3566_vm9 = vcmask 1041409   ;;  %vm3568_vm10 = vcmask 1042434  }
  0x19   : > { %vm3570_vm11 = vcmask 1043459   ;;  %vm3572_vm12 = vcmask 1044484   ;;  %vm3574_vm13 = vcmask 1045509   ;;  %vm3576_vm14 = vcmask 1046534   ;;  %s6553_s19 = sld [smem:[#allocation6]]  ;;  %s7641_s5 = sshll.u32 %s8003_s26, 8 }
  0x1a   : > { %s7540_s21 = sshll.u32 %s261_s20, 7  ;;  %vm3578_vm15 = vcmask 1047559   ;;  %s257_s20 = sand.u32 1, %s7995_s24  }
  0x1b   : > { %s8129_s29 = scalar_lea.vmem %s11090_s0, %s7540_s21  ;;  %459 = vmatpush.bf16.msra.mxu0 %v7557_v2  ;;  %s7036_s21 = sshll.u32 %s257_s20, 8 }
  0x1c   : > { %1852 = vmatpush.bf16.msra.mxu1 %v7607_v3  ;;  %v7541_v4 = vld [vmem:[%s8129_s29] sm:$0xff]  ;;  %v7542_v6 = vld [vmem:[%s8129_s29 + $0x8] sm:$0xff]  ;;  %v7543_v8 = vld [vmem:[%s8129_s29 + $0x10] sm:$0xff]  ;;  %s10703_s22 = scalar_lea.vmem [#allocation7], %s7036_s21  ;;  %s6940_s13 = scalar_lea.sflag [#allocation8], %s257_s20 }
  0x1d   : > { %v7559_v5 = vld [vmem:[%s8129_s29] sm:$0xff]  ;;  %v7560_v7 = vld [vmem:[%s8129_s29 + $0x8] sm:$0xff]  ;;  %v7561_v9 = vld [vmem:[%s8129_s29 + $0x10] sm:$0xff]  ;;  %s6955_s26 = sshll.u32 %s10703_s22, 4  ;;  %s7953_s18 = scalar_lea.hbm %s11096_s6, 512  ;;  %s6956_s26 = int_to_ptr.vmem [resolvable:$true] %s6955_s26 }
  0x1e   : > { %7111 = vmatmul.msk.bf16.vlgmr.msra.gmra.mxu0 %vm403_vm0, %v7541_v4  ;;  %v7544_v10 = vld [vmem:[%s8129_s29 + $0x18] sm:$0xff]  ;;  %v7545_v12 = vld [vmem:[%s8129_s29 + $0x20] sm:$0xff]  ;;  %v7546_v14 = vld [vmem:[%s8129_s29 + $0x28] sm:$0xff] }
  0x1f   : > { %7199 = vmatmul.msk.bf16.vlgmr.msra.gmra.mxu1 %vm403_vm0, %v7559_v5  ;;  %v7562_v11 = vld [vmem:[%s8129_s29 + $0x18] sm:$0xff]  ;;  %v7563_v13 = vld [vmem:[%s8129_s29 + $0x20] sm:$0xff]  ;;  %v7564_v15 = vld [vmem:[%s8129_s29 + $0x28] sm:$0xff] }
  0x20   : > { %v7547_v16 = vld [vmem:[%s8129_s29 + $0x30] sm:$0xff]  ;;  %v7548_v18 = vld [vmem:[%s8129_s29 + $0x38] sm:$0xff]  ;;  %v7549_v21 = vld [vmem:[%s8129_s29 + $0x40] sm:$0xff] }
  0x21   : > { %v7565_v17 = vld [vmem:[%s8129_s29 + $0x30] sm:$0xff]  ;;  %v7566_v19 = vld [vmem:[%s8129_s29 + $0x38] sm:$0xff]  ;;  %v7567_v22 = vld [vmem:[%s8129_s29 + $0x40] sm:$0xff] }
  0x22   : > { %v7550_v31 = vld [vmem:[%s8129_s29 + $0x48] sm:$0xff]  ;;  %v7551_v42 = vld [vmem:[%s8129_s29 + $0x50] sm:$0xff]  ;;  %v7552_v53 = vld [vmem:[%s8129_s29 + $0x58] sm:$0xff] }
  0x23   : > { %v7568_v32 = vld [vmem:[%s8129_s29 + $0x48] sm:$0xff]  ;;  %v7569_v43 = vld [vmem:[%s8129_s29 + $0x50] sm:$0xff]  ;;  %v7570_v54 = vld [vmem:[%s8129_s29 + $0x58] sm:$0xff] }
  0x24   : > { %v7553_v63 = vld [vmem:[%s8129_s29 + $0x60] sm:$0xff] }
  0x25   : > { %v7571_v0 = vld [vmem:[%s8129_s29 + $0x60] sm:$0xff] }
  0x26   : > { %v8230_v4 = vld [vmem:[%s11092_s2] ss:$0 sm:$0xff] }
  0x2e   : > { %7112 = vmatmul.msk.bf16.gmra.mxu0 %vm403_vm0, %v7542_v6 }
  0x2f   : > { %7200 = vmatmul.msk.bf16.gmra.mxu1 %vm403_vm0, %v7560_v7 }
  0x3e   : > { %7113 = vmatmul.msk.bf16.gmra.mxu0 %vm403_vm0, %v7543_v8 }
  0x3f   : > { %7201 = vmatmul.msk.bf16.gmra.mxu1 %vm403_vm0, %v7561_v9 }
  0x4e   : > { %7114 = vmatmul.msk.bf16.gmra.mxu0 %vm403_vm0, %v7544_v10 }
  0x4f   : > { %7202 = vmatmul.msk.bf16.gmra.mxu1 %vm403_vm0, %v7562_v11 }
  0x5e   : > { %7115 = vmatmul.msk.bf16.gmra.mxu0 %vm403_vm0, %v7545_v12 }
  0x5f   : > { %7203 = vmatmul.msk.bf16.gmra.mxu1 %vm403_vm0, %v7563_v13 }
  0x6e   : > { %7116 = vmatmul.msk.bf16.gmra.mxu0 %vm403_vm0, %v7546_v14 }
  0x6f   : > { %7204 = vmatmul.msk.bf16.gmra.mxu1 %vm403_vm0, %v7564_v15 }
  0x7e   : > { %7117 = vmatmul.msk.bf16.gmra.mxu0 %vm403_vm0, %v7547_v16 }
  0x7f   : > { %7205 = vmatmul.msk.bf16.gmra.mxu1 %vm403_vm0, %v7565_v17  ;;  %v7554_v17 = vld [vmem:[%s8129_s29 + $0x68] sm:$0xff] }
  0x8e   : > { %7118 = vmatmul.msk.bf16.gmra.mxu0 %vm403_vm0, %v7548_v18  ;;  %v7572_v18 = vld [vmem:[%s8129_s29 + $0x68] sm:$0xff] }
  0x8f   : > { %7206 = vmatmul.msk.bf16.gmra.mxu1 %vm403_vm0, %v7566_v19 }
  0x9b   : > { %v461_v23 = vpop.f32.mrf.mxu0 }
  0x9c   : > { %v8170_v24 = vpop.f32.mrf.mxu1  ;;  %v462_v25 = vadd.f32 %v8166_v20, %v461_v23 }
  0x9e   : > { %v541_v26 = vpack.c.bf16 %v462_v25, %v462_v25  ;;  %7119 = vmatmul.msk.bf16.gmra.mxu0 %vm403_vm0, %v7549_v21 }
  0x9f   : > { %7207 = vmatmul.msk.bf16.gmra.mxu1 %vm403_vm0, %v7567_v22 }
  0xa0   : > { %574 = vst.msk [vmem:[#allocation3] sm:$0xf] %vm573_vm1, %v541_v26  ;;  %638 = vrot.lane.b32.xlu0 %v541_v26, %s8013_s12 }
  0xa3   : > { %v463_v27 = vpop.f32.mrf.mxu0 }
  0xa4   : > { %v8177_v28 = vpop.f32.mrf.mxu1  ;;  %v464_v29 = vadd.f32 %v8166_v20, %v463_v27  ;;  %v1855_v27 = vadd.f32 %v8230_v4, %v8170_v24 }
  0xa6   : > { %v542_v30 = vpack.c.bf16 %v464_v29, %v464_v29 }
  0xa8   : > { %575 = vst.msk [vmem:[#allocation3 + $0x4] sm:$0xf] %vm573_vm1, %v542_v30  ;;  %640 = vrot.lane.b32.xlu0 %v542_v30, %s8013_s12 }
  0xab   : > { %v466_v33 = vpop.f32.mrf.mxu0 }
  0xac   : > { %v8184_v34 = vpop.f32.mrf.mxu1  ;;  %v467_v35 = vadd.f32 %v8166_v20, %v466_v33 }
  0xae   : > { %v543_v36 = vpack.c.bf16 %v467_v35, %v467_v35  ;;  %7120 = vmatmul.msk.bf16.gmra.mxu0 %vm403_vm0, %v7550_v31  ;;  %v8258_v35 = vpack.c.bf16 %v1855_v27, %v1855_v27 }
  0xaf   : > { %7208 = vmatmul.msk.bf16.gmra.mxu1 %vm403_vm0, %v7568_v32  ;;  %v7591_v37 = vld [vmem:[#allocation3] sm:$0xff] }
  0xb0   : > { %576 = vst.msk [vmem:[#allocation3 + $0x8] sm:$0xf] %vm573_vm1, %v543_v36  ;;  %642 = vrot.lane.b32.xlu1 %v543_v36, %s8013_s12  ;;  %5230 = vmatpush.bf16.msrb.mxu0 %v7591_v37 }
  0xb1   : > { %11176 = vst [vmem:[#allocation11_spill] sm:$0xff] %v8258_v35 }
  0xb3   : > { %v468_v38 = vpop.f32.mrf.mxu0 }
  0xb4   : > { %v8191_v39 = vpop.f32.mrf.mxu1  ;;  %v469_v40 = vadd.f32 %v8166_v20, %v468_v38 }
  0xb6   : > { %v544_v41 = vpack.c.bf16 %v469_v40, %v469_v40 }
  0xb8   : > { %577 = vst.msk [vmem:[#allocation3 + $0xc] sm:$0xf] %vm573_vm1, %v544_v41  ;;  %644 = vrot.lane.b32.xlu1 %v544_v41, %s8013_s12  ;;  %v8014_v41 = vmov 1983009808  }
  0xbb   : > { %v471_v44 = vpop.f32.mrf.mxu0 }
  0xbc   : > { %v8198_v45 = vpop.f32.mrf.mxu1  ;;  %v472_v46 = vadd.f32 %v8166_v20, %v471_v44 }
  0xbe   : > { %v545_v47 = vpack.c.bf16 %v472_v46, %v472_v46  ;;  %7121 = vmatmul.msk.bf16.gmra.mxu0 %vm403_vm0, %v7551_v42  ;;  %v803_v42 = vunpack.c.l.s4 %v8014_v41 }
  0xbf   : > { %7209 = vmatmul.msk.bf16.gmra.mxu1 %vm403_vm0, %v7569_v43  ;;  %v7592_v48 = vld [vmem:[#allocation3 + $0x8] sm:$0xff]  ;;  %v1865_v43 = vadd.f32 %v8230_v4, %v8198_v45 }
  0xc0   : > { %578 = vst.msk [vmem:[#allocation3 + $0x10] sm:$0xf] %vm573_vm1, %v545_v47  ;;  %646 = vrot.lane.b32.xlu2 %v545_v47, %s8013_s12  ;;  %5258 = vmatpush.bf16.msrb.mxu1 %v7592_v48  ;;  %v7555_v47 = vld [vmem:[%s8129_s29 + $0x70] sm:$0xff] }
  0xc1   : > { %v7573_v48 = vld [vmem:[%s8129_s29 + $0x70] sm:$0xff] }
  0xc3   : > { %v473_v49 = vpop.f32.mrf.mxu0 }
  0xc4   : > { %v8205_v50 = vpop.f32.mrf.mxu1  ;;  %v474_v51 = vadd.f32 %v8166_v20, %v473_v49  ;;  %v8273_v49 = vunpack.c.0.s8 %v803_v42 }
  0xc6   : > { %v546_v52 = vpack.c.bf16 %v474_v51, %v474_v51  ;;  %11178 = vst [vmem:[#allocation13_spill] sm:$0xff] %v8273_v49 }
  0xc8   : > { %579 = vst.msk [vmem:[#allocation3 + $0x14] sm:$0xf] %vm573_vm1, %v546_v52  ;;  %648 = vrot.lane.b32.xlu2 %v546_v52, %s8013_s12 }
  0xcb   : > { %v476_v55 = vpop.f32.mrf.mxu0 }
  0xcc   : > { %v8212_v56 = vpop.f32.mrf.mxu1  ;;  %v477_v57 = vadd.f32 %v8166_v20, %v476_v55 }
  0xce   : > { %v547_v58 = vpack.c.bf16 %v477_v57, %v477_v57  ;;  %7122 = vmatmul.msk.bf16.gmra.mxu0 %vm403_vm0, %v7552_v53  ;;  %v8278_v57 = vpack.c.bf16 %v1865_v43, %v1865_v43 }
  0xcf   : > { %7210 = vmatmul.msk.bf16.gmra.mxu1 %vm403_vm0, %v7570_v54 }
  0xd0   : > { %580 = vst.msk [vmem:[#allocation3 + $0x18] sm:$0xf] %vm573_vm1, %v547_v58  ;;  %650 = vrot.lane.b32.xlu0 %v547_v58, %s8013_s12 }
  0xd1   : > { %11179 = vst [vmem:[#allocation14_spill] sm:$0xff] %v8278_v57 }
  0xd3   : > { %v478_v59 = vpop.f32.mrf.mxu0 }
  0xd4   : > { %v8219_v60 = vpop.f32.mrf.mxu1  ;;  %v479_v61 = vadd.f32 %v8166_v20, %v478_v59 }
  0xd6   : > { %v548_v62 = vpack.c.bf16 %v479_v61, %v479_v61 }
  0xd8   : > { %581 = vst.msk [vmem:[#allocation3 + $0x1c] sm:$0xf] %vm573_vm1, %v548_v62  ;;  %652 = vrot.lane.b32.xlu1 %v548_v62, %s8013_s12  ;;  %v1860_v62 = vadd.f32 %v8230_v4, %v8184_v34 }
  0xdb   : > { %v481_v1 = vpop.f32.mrf.mxu0 }
  0xdc   : > { %v1874_v2 = vpop.f32.mrf.mxu1  ;;  %v482_v3 = vadd.f32 %v8166_v20, %v481_v1 }
  0xdd   : > { %v1875_v6 = vadd.f32 %v8230_v4, %v1874_v2 }
  0xde   : > { %v549_v5 = vpack.c.bf16 %v482_v3, %v482_v3  ;;  %7123 = vmatmul.msk.bf16.gmra.mxu0 %vm403_vm0, %v7553_v63 }
  0xdf   : > { %7211 = vmatmul.msk.bf16.gmra.mxu1 %vm403_vm0, %v7571_v0  ;;  %v1942_v9 = vpack.c.bf16 %v1875_v6, %v1875_v6 }
  0xe0   : > { %582 = vst.msk [vmem:[#allocation3 + $0x20] sm:$0xf] %vm573_vm1, %v549_v5  ;;  %654 = vrot.lane.b32.xlu2 %v549_v5, %s8013_s12 }
  0xe1   : > { %v2890_v12 = vunpack.c.l.b16 %v1942_v9  ;;  %v1966_v36 = vrot.slane %v1942_v9, 4 }
  0xe3   : > { %v483_v7 = vpop.f32.mrf.mxu0  ;;  %v1968_v44 = vsel %vm800_vm2, %v1966_v36, %v8258_v35 }
  0xe4   : > { %v1876_v8 = vpop.f32.mrf.mxu1  ;;  %v484_v10 = vadd.f32 %v8166_v20, %v483_v7  ;;  %v1972_v55 = vperm.slane %v1968_v44, %v8273_v49  ;;  %v8291_v7 = vpack.c.bf16 %v1860_v62, %v1860_v62 }
  0xe5   : > { %v1877_v11 = vadd.f32 %v8230_v4, %v1876_v8 }
  0xe6   : > { %v550_v13 = vpack.c.bf16 %v484_v10, %v484_v10  ;;  %v1981_v63 = vrot.slane %v1972_v55, 4  ;;  %11180 = vst [vmem:[#allocation15_spill] sm:$0xff] %v8291_v7 }
  0xe7   : > { %v8239_v14 = vpack.c.bf16 %v1877_v11, %v1877_v11  ;;  %v1192_v62 = vld [vmem:[#allocation3 + $0x20] sm:$0xf] }
  0xe8   : > { %583 = vst.msk [vmem:[#allocation3 + $0x24] sm:$0xf] %vm573_vm1, %v550_v13  ;;  %656 = vrot.lane.b32.xlu0 %v550_v13, %s8013_s12  ;;  %v1870_v13 = vadd.f32 %v8230_v4, %v8212_v56 }
  0xe9   : > { %v2891_v15 = vunpack.c.l.b16 %v8239_v14 }
  0xeb   : > { %v8244_v16 = vpack.c.b16 %v2891_v15, %v2890_v12  ;;  %v486_v19 = vpop.f32.mrf.mxu0 }
  0xec   : > { %v1879_v21 = vpop.f32.mrf.mxu1  ;;  %v487_v22 = vadd.f32 %v8166_v20, %v486_v19 }
  0xed   : > { %11175 = vst [vmem:[#allocation10_spill] sm:$0xff] %v8244_v16  ;;  %v1880_v26 = vadd.f32 %v8230_v4, %v1879_v21 }
  0xee   : > { %v551_v23 = vpack.c.bf16 %v487_v22, %v487_v22  ;;  %7124 = vmatmul.msk.bf16.gmra.mxu0 %vm403_vm0, %v7554_v17 }
  0xef   : > { %7212 = vmatmul.msk.bf16.gmra.mxu1 %vm403_vm0, %v7572_v18  ;;  %v7595_v25 = vld [vmem:[#allocation3 + $0x20] sm:$0xff]  ;;  %v1944_v31 = vpack.c.bf16 %v1880_v26, %v1880_v26  ;;  %v7556_v18 = vld [vmem:[%s8129_s29 + $0x78] sm:$0xff] }
  0xf0   : > { %584 = vst.msk [vmem:[#allocation3 + $0x28] sm:$0xf] %vm573_vm1, %v551_v23  ;;  %658 = vrot.lane.b32.xlu1 %v551_v23, %s8013_s12  ;;  %5342 = vmatpush.bf16.msra.mxu0 %v7595_v25  ;;  %v7574_v23 = vld [vmem:[%s8129_s29 + $0x78] sm:$0xff] }
  0xf1   : > { %v2920_v37 = vunpack.c.l.b16 %v1944_v31  ;;  %v1995_v34 = vrot.slane %v1944_v31, 4  ;;  %v8015_v31 = vmov 1934713408  }
  0xf3   : > { %v488_v29 = vpop.f32.mrf.mxu0  ;;  %v1996_v15 = vsel %vm800_vm2, %v1995_v34, %v8291_v7 }
  0xf4   : > { %v1881_v30 = vpop.f32.mrf.mxu1  ;;  %v489_v32 = vadd.f32 %v8166_v20, %v488_v29  ;;  %v2000_v27 = vperm.slane %v1996_v15, %v8273_v49  ;;  %v8312_v29 = vpack.c.bf16 %v1870_v13, %v1870_v13 }
  0xf5   : > { %v1882_v33 = vadd.f32 %v8230_v4, %v1881_v30 }
  0xf6   : > { %v552_v38 = vpack.c.bf16 %v489_v32, %v489_v32  ;;  %11182 = vst [vmem:[#allocation17_spill] sm:$0xff] %v8312_v29  ;;  %v817_v32 = vunpack.c.l.s4 %v8015_v31  ;;  %v1186_v31 = vld [vmem:[#allocation3 + $0x8] sm:$0xf] }
  0xf7   : > { %v8260_v40 = vpack.c.bf16 %v1882_v33, %v1882_v33 }
  0xf8   : > { %585 = vst.msk [vmem:[#allocation3 + $0x2c] sm:$0xf] %vm573_vm1, %v552_v38  ;;  %660 = vrot.lane.b32.xlu2 %v552_v38, %s8013_s12  ;;  %v8321_v42 = vunpack.c.0.s8 %v817_v32 }
  0xf9   : > { %v2921_v24 = vunpack.c.l.b16 %v8260_v40 }
  0xfa   : > { %11183 = vst [vmem:[#allocation18_spill] sm:$0xff] %v8321_v42 }
  0xfb   : > { %v8269_v46 = vpack.c.b16 %v2921_v24, %v2920_v37  ;;  %v491_v51 = vpop.f32.mrf.mxu0  ;;  %v2009_v37 = vrot.slane %v2000_v27, 4 }
  0xfc   : > { %v1884_v52 = vpop.f32.mrf.mxu1  ;;  %v492_v53 = vadd.f32 %v8166_v20, %v491_v51 }
  0xfd   : > { %11177 = vst [vmem:[#allocation12_spill] sm:$0xff] %v8269_v46  ;;  %v1885_v54 = vadd.f32 %v8230_v4, %v1884_v52 }
  0xfe   : > { %v553_v45 = vpack.c.bf16 %v492_v53, %v492_v53  ;;  %7125 = vmatmul.msk.bf16.gmra.mxu0 %vm403_vm0, %v7555_v47 }
  0xff   : > { %v1946_v58 = vpack.c.bf16 %v1885_v54, %v1885_v54  ;;  %7213 = vmatmul.msk.bf16.gmra.mxu1 %vm403_vm0, %v7573_v48  ;;  %v7596_v59 = vld [vmem:[#allocation3 + $0x28] sm:$0xff] }
 0x100   : > { %586 = vst.msk [vmem:[#allocation3 + $0x30] sm:$0xf] %vm573_vm1, %v553_v45  ;;  %662 = vrot.lane.b32.xlu0 %v553_v45, %s8013_s12  ;;  %5370 = vmatpush.bf16.msra.mxu1 %v7596_v59 }
 0x101   : > { %v1973_v61 = vrot.slane %v1946_v58, 4  ;;  %v2950_v9 = vunpack.c.l.b16 %v1946_v58 }
 0x103   : > { %v1974_v0 = vsel %vm800_vm2, %v1973_v61, %v8278_v57  ;;  %v493_v2 = vpop.f32.mrf.mxu0 }
 0x104   : > { %v1978_v1 = vperm.slane %v1974_v0, %v8273_v49  ;;  %v1886_v3 = vpop.f32.mrf.mxu1  ;;  %v494_v5 = vadd.f32 %v8166_v20, %v493_v2 }
 0x105   : > { %v1887_v6 = vadd.f32 %v8230_v4, %v1886_v3 }
 0x106   : > { %v8294_v8 = vsel %vm800_vm2, %v1978_v1, %v1981_v63  ;;  %v554_v10 = vpack.c.bf16 %v494_v5, %v494_v5  ;;  %v1979_v19 = vrot.slane %v1978_v1, 4  ;;  %v1194_v63 = vld [vmem:[#allocation3 + $0x28] sm:$0xf] }
 0x107   : > { %v8296_v11 = vpack.c.bf16 %v1887_v6, %v1887_v6  ;;  %v1196_v1 = vld [vmem:[#allocation3 + $0x30] sm:$0xf] }
 0x108   : > { %587 = vst.msk [vmem:[#allocation3 + $0x34] sm:$0xf] %vm573_vm1, %v554_v10  ;;  %664 = vrot.lane.b32.xlu1 %v554_v10, %s8013_s12  ;;  %v1980_v33 = vsel %vm800_vm2, %v1979_v19, %v1972_v55  ;;  %v1244_v19 = vrot.slane %v1194_v63, 4 }
 0x109   : > { %v2951_v12 = vunpack.c.l.b16 %v8296_v11  ;;  %v8329_v53 = vperm.slane %v1980_v33, %v8321_v42 }
 0x10b   : > { %v8305_v17 = vpack.c.b16 %v2951_v12, %v2950_v9  ;;  %v496_v21 = vpop.f32.mrf.mxu0  ;;  %v1991_v0 = vrot.slane %v8329_v53, 4  ;;  %v2194_v34 = vshrl.u32 %v8329_v53, 16 }
 0x10c   : > { %v1889_v22 = vpop.f32.mrf.mxu1  ;;  %v497_v25 = vadd.f32 %v8166_v20, %v496_v21 }
 0x10d   : > { %11181 = vst [vmem:[#allocation16_spill] sm:$0xff] %v8305_v17  ;;  %v1890_v26 = vadd.f32 %v8230_v4, %v1889_v22  ;;  %v1222_v22 = vrot.slane %v1196_v1, 4 }
 0x10e   : > { %v555_v30 = vpack.c.bf16 %v497_v25, %v497_v25  ;;  %7126 = vmatmul.msk.bf16.gmra.mxu0 %vm403_vm0, %v7556_v18  ;;  %v1216_v18 = vrot.slane %v1192_v62, 4 }
 0x10f   : > { %v1948_v56 = vpack.c.bf16 %v1890_v26, %v1890_v26  ;;  %7214 = vmatmul.msk.bf16.gmra.mxu1 %vm403_vm0, %v7574_v23  ;;  %v8355_v23 = vperm.slane %v8294_v8, %v8321_v42  ;;  %v8361_v26 = vsel %vm800_vm2, 0, %v1991_v0  ;;  %v1245_v8 = vsel %vm800_vm2, %v1244_v19, %v1186_v31  ;;  %v1193_v31 = vld [vmem:[#allocation3 + $0x24] sm:$0xf] }
 0x110   : > { %588 = vst.msk [vmem:[#allocation3 + $0x38] sm:$0xf] %vm573_vm1, %v555_v30  ;;  %666 = vrot.lane.b32.xlu2 %v555_v30, %s8013_s12 }
 0x111   : > { %v2001_v36 = vrot.slane %v1948_v56, 4  ;;  %v2980_v54 = vunpack.c.l.b16 %v1948_v56  ;;  %v1184_v56 = vld [vmem:[#allocation3] sm:$0xf]  ;;  %v1993_v1 = vrot.slane %v8355_v23, 4 }
 0x112   : > { %v639_v41 = vpop.permute.xlu0 %638 }
 0x113   : > { %v2002_v38 = vsel %vm800_vm2, %v2001_v36, %v8312_v29  ;;  %735 = vst.msk [vmem:[#allocation2] sm:$0xf] %vm734_vm3, %v639_v41  ;;  %v498_v43 = vpop.f32.mrf.mxu0  ;;  %v1188_v36 = vld [vmem:[#allocation3 + $0x10] sm:$0xf]  ;;  %v1190_v41 = vld [vmem:[#allocation3 + $0x18] sm:$0xf] }
 0x114   : > { %v2006_v24 = vperm.slane %v2002_v38, %v8273_v49  ;;  %v1891_v44 = vpop.f32.mrf.mxu1  ;;  %v499_v47 = vadd.f32 %v8166_v20, %v498_v43  ;;  %v2200_v43 = vshrl.u32 %v8361_v26, 16 }
 0x115   : > { %v1892_v48 = vadd.f32 %v8230_v4, %v1891_v44 }
 0x116   : > { %v2007_v51 = vrot.slane %v2006_v24, 4  ;;  %v2010_v52 = vsel %vm800_vm2, %v2006_v24, %v2009_v37  ;;  %v556_v55 = vpack.c.bf16 %v499_v47, %v499_v47  ;;  %v1217_v37 = vsel %vm800_vm2, %v1216_v18, %v1184_v56 }
 0x117   : > { %v8331_v45 = vpack.c.bf16 %v1892_v48, %v1892_v48  ;;  %v1198_v9 = vld [vmem:[#allocation3 + $0x38] sm:$0xf]  ;;  %v8358_v25 = vperm.slane %v2010_v52, %v8321_v42  ;;  %v1223_v24 = vsel %vm800_vm2, %v1222_v22, %v1188_v36 }
 0x118   : > { %v2008_v58 = vsel %vm800_vm2, %v2007_v51, %v2000_v27  ;;  %589 = vst.msk [vmem:[#allocation3 + $0x3c] sm:$0xf] %vm573_vm1, %v556_v55  ;;  %668 = vrot.lane.b32.xlu0 %v556_v55, %s8013_s12  ;;  %v1250_v27 = vrot.slane %v1198_v9, 4 }
 0x119   : > { %v2981_v59 = vunpack.c.l.b16 %v8331_v45  ;;  %v8338_v61 = vperm.slane %v2008_v58, %v8321_v42  ;;  %v2207_v55 = vshrl.u32 %v8358_v25, 16  ;;  %v1221_v58 = vperm.slane %v1217_v37, %v8273_v49  ;;  %v1195_v37 = vld [vmem:[#allocation3 + $0x2c] sm:$0xf] }
 0x11a   : > { %v647_v3 = vpop.permute.xlu2 %646  ;;  %v641_v5 = vpop.permute.xlu0 %640  ;;  %v1251_v48 = vsel %vm800_vm2, %v1250_v27, %v1190_v41 }
 0x11b   : > { %v8341_v2 = vpack.c.b16 %v2981_v59, %v2980_v54  ;;  %739 = vst.msk [vmem:[#allocation2 + $0x10] sm:$0xf] %vm734_vm3, %v647_v3  ;;  %v501_v10 = vpop.f32.mrf.mxu0  ;;  %v2195_v13 = vshrl.u32 %v8338_v61, 16  ;;  %v2019_v15 = vrot.slane %v8338_v61, 4  ;;  %v2206_v54 = vshrl.u32 %v8355_v23, 16 }
 0x11c   : > { %v8347_v12 = vpop.f32.mrf.mxu1  ;;  %736 = vst.msk [vmem:[#allocation2 + $0x4] sm:$0xf] %vm734_vm3, %v641_v5  ;;  %v502_v21 = vadd.f32 %v8166_v20, %v501_v10  ;;  %v1249_v59 = vperm.slane %v1245_v8, %v8273_v49  ;;  %v1227_v3 = vperm.slane %v1223_v24, %v8273_v49  ;;  %v1197_v5 = vld [vmem:[#allocation3 + $0x34] sm:$0xf]  ;;  %v2021_v10 = vrot.slane %v8358_v25, 4 }
 0x11d   : > { %11184 = vst [vmem:[#allocation19_spill] sm:$0xff] %v8341_v2  ;;  %v8363_v32 = vpack.i.b16 %v2195_v13, %v2194_v34  ;;  %v8366_v33 = vsel %vm800_vm2, 0, %v2019_v15  ;;  %v8393_v9 = vpack.i.b16 %v2207_v55, %v2206_v54  ;;  %v1255_v13 = vperm.slane %v1251_v48, %v8273_v49 }
 0x11e   : > { %v557_v30 = vpack.c.bf16 %v502_v21, %v502_v21  ;;  %v2201_v44 = vshrl.u32 %v8366_v33, 16  ;;  %v8398_v15 = vsel %vm800_vm2, 0, %v1993_v1  ;;  %v8401_v19 = vsel %vm800_vm2, 0, %v2021_v10 }
 0x11f   : > { %v1258_v21 = vrot.slane %v1249_v59, 4  ;;  %v1334_v22 = vrot.slane %v1197_v5, 4  ;;  %v1199_v27 = vld [vmem:[#allocation3 + $0x3c] sm:$0xf]  ;;  %v1230_v56 = vrot.slane %v1221_v58, 4  ;;  %v1228_v36 = vrot.slane %v1227_v3, 4 }
 0x120   : > { %590 = vst.msk [vmem:[#allocation3 + $0x40] sm:$0xf] %vm573_vm1, %v557_v30  ;;  %670 = vrot.lane.b32.xlu1 %v557_v30, %s8013_s12  ;;  %v8387_v0 = vpack.i.b16 %v2201_v44, %v2200_v43  ;;  %v1256_v8 = vrot.slane %v1255_v13, 4  ;;  %v2212_v24 = vshrl.u32 %v8398_v15, 16  ;;  %v2213_v43 = vshrl.u32 %v8401_v19, 16 }
 0x121   : > { %v1259_v41 = vsel %vm800_vm2, %v1255_v13, %v1258_v21  ;;  %v1189_v44 = vld [vmem:[#allocation3 + $0x14] sm:$0xf]  ;;  %v1362_v48 = vrot.slane %v1199_v27, 4  ;;  %v1231_v54 = vsel %vm800_vm2, %v1227_v3, %v1230_v56  ;;  %v1229_v10 = vsel %vm800_vm2, %v1228_v36, %v1221_v58  ;;  %v1191_v21 = vld [vmem:[#allocation3 + $0x1c] sm:$0xf] }
 0x122   : > { %v649_v51 = vpop.permute.xlu2 %648  ;;  %v643_v52 = vpop.permute.xlu1 %642  ;;  %v1335_v55 = vsel %vm800_vm2, %v1334_v22, %v1189_v44  ;;  %v8415_v5 = vpack.i.b16 %v2213_v43, %v2212_v24  ;;  %v1267_v13 = vperm.slane %v1259_v41, %v8321_v42  ;;  %v1257_v27 = vsel %vm800_vm2, %v1256_v8, %v1249_v59  ;;  %v1185_v3 = vld [vmem:[#allocation3 + $0x4] sm:$0xf]  ;;  %v1187_v24 = vld [vmem:[#allocation3 + $0xc] sm:$0xf] }
 0x123   : > { %740 = vst.msk [vmem:[#allocation2 + $0x14] sm:$0xf] %vm734_vm3, %v649_v51  ;;  %v503_v62 = vpop.f32.mrf.mxu0  ;;  %v1239_v22 = vperm.slane %v1231_v54, %v8321_v42  ;;  %v1339_v56 = vperm.slane %v1335_v55, %v8273_v49  ;;  %v1235_v58 = vperm.slane %v1229_v10, %v8321_v42  ;;  %v1263_v59 = vperm.slane %v1257_v27, %v8321_v42 }
 0x124   : > { %v8385_v63 = vpop.f32.mrf.mxu1  ;;  %737 = vst.msk [vmem:[#allocation2 + $0x8] sm:$0xf] %vm734_vm3, %v643_v52  ;;  %v504_v34 = vadd.f32 %v8166_v20, %v503_v62  ;;  %v1328_v52 = vrot.slane %v1193_v31, 4  ;;  %v1363_v31 = vsel %vm800_vm2, %v1362_v48, %v1191_v21  ;;  %v1461_v21 = vshrl.u32 %v1267_v13, 16 }
 0x125   : > { %v1458_v8 = vpack.i.b16 %v1267_v13, %v1239_v22  ;;  %v1367_v41 = vperm.slane %v1363_v31, %v8273_v49  ;;  %v1340_v43 = vrot.slane %v1339_v56, 4  ;;  %v1242_v27 = vrot.slane %v1239_v22, 4 }
 0x126   : > { %v558_v18 = vpack.c.bf16 %v504_v34, %v504_v34  ;;  %v1356_v34 = vrot.slane %v1195_v37, 4  ;;  %v1329_v37 = vsel %vm800_vm2, %v1328_v52, %v1185_v3  ;;  %v1444_v31 = vshrl.u32 %v1235_v58, 16 }
 0x127   : > { %1576 = vst.msk [vmem:[#allocation5 + $0x20] sm:$0xf] %vm573_vm1, %v1458_v8  ;;  %v1333_v48 = vperm.slane %v1329_v37, %v8273_v49  ;;  %v1368_v3 = vrot.slane %v1367_v41, 4  ;;  %v1270_v8 = vrot.slane %v1267_v13, 4 }
 0x128   : > { %591 = vst.msk [vmem:[#allocation3 + $0x44] sm:$0xf] %vm573_vm1, %v558_v18  ;;  %672 = vrot.lane.b32.xlu2 %v558_v18, %s8013_s12  ;;  %v1357_v36 = vsel %vm800_vm2, %v1356_v34, %v1187_v24  ;;  %v1240_v34 = vrot.slane %v1235_v58, 4  ;;  %v1460_v24 = vshrl.u32 %v1239_v22, 16 }
 0x129   : > { %v1361_v52 = vperm.slane %v1357_v36, %v8273_v49  ;;  %v1341_v37 = vsel %vm800_vm2, %v1340_v43, %v1333_v48  ;;  %v1342_v36 = vrot.slane %v1333_v48, 4 }
 0x12a   : > { %v645_v51 = vpop.permute.xlu1 %644  ;;  %v1241_v38 = vsel %vm800_vm2, 0, %v1240_v34  ;;  %v1347_v43 = vperm.slane %v1341_v37, %v8321_v42 }
 0x12b   : > { %738 = vst.msk [vmem:[#allocation2 + $0xc] sm:$0xf] %vm734_vm3, %v645_v51  ;;  %v506_v62 = vpop.f32.mrf.mxu0  ;;  %v1442_v51 = vpack.i.b16 %v1263_v59, %v1235_v58  ;;  %v1370_v30 = vrot.slane %v1361_v52, 4  ;;  %v1343_v58 = vsel %vm800_vm2, %v1339_v56, %v1342_v36 }
 0x12c   : > { %v8413_v1 = vpop.f32.mrf.mxu1  ;;  %v507_v18 = vadd.f32 %v8166_v20, %v506_v62  ;;  %v1445_v62 = vshrl.u32 %v1263_v59, 16  ;;  %v1476_v36 = vshrl.u32 %v1347_v43, 16 }
 0x12d   : > { %1568 = vst.msk [vmem:[#allocation5] sm:$0xf] %vm573_vm1, %v1442_v51  ;;  %v1462_v51 = vpack.i.b16 %v1461_v21, %v1460_v24  ;;  %v1371_v13 = vsel %vm800_vm2, %v1367_v41, %v1370_v30  ;;  %v1352_v24 = vrot.slane %v1347_v43, 4 }
 0x12e   : > { %v559_v44 = vpack.c.bf16 %v507_v18, %v507_v18  ;;  %v1268_v18 = vrot.slane %v1263_v59, 4  ;;  %v1446_v47 = vpack.i.b16 %v1445_v62, %v1444_v31  ;;  %v1452_v62 = vshrl.u32 %v1241_v38, 16 }
 0x12f   : > { %1578 = vst.msk [vmem:[#allocation5 + $0x28] sm:$0xf] %vm573_vm1, %v1462_v51 }
 0x130   : > { %592 = vst.msk [vmem:[#allocation3 + $0x48] sm:$0xf] %vm573_vm1, %v559_v44  ;;  %674 = vrot.lane.b32.xlu0 %v559_v44, %s8013_s12  ;;  %v1269_v59 = vsel %vm800_vm2, 0, %v1268_v18  ;;  %v1369_v18 = vsel %vm800_vm2, %v1368_v3, %v1361_v52  ;;  %v1351_v52 = vperm.slane %v1343_v58, %v8321_v42  ;;  %v1379_v3 = vperm.slane %v1371_v13, %v8321_v42 }
 0x131   : > { %1570 = vst.msk [vmem:[#allocation5 + $0x8] sm:$0xf] %vm573_vm1, %v1446_v47  ;;  %v1450_v22 = vpack.i.b16 %v1269_v59, %v1241_v38  ;;  %v1453_v34 = vshrl.u32 %v1269_v59, 16  ;;  %v1375_v31 = vperm.slane %v1369_v18, %v8321_v42 }
 0x132   : > { %v1492_v58 = vshrl.u32 %v1351_v52, 16  ;;  %v1493_v13 = vshrl.u32 %v1379_v3, 16 }
 0x133   : > { %v508_v54 = vpop.f32.mrf.mxu0  ;;  %1572 = vst.msk [vmem:[#allocation5 + $0x10] sm:$0xf] %vm573_vm1, %v1450_v22  ;;  %v1454_v38 = vpack.i.b16 %v1453_v34, %v1452_v62  ;;  %v1474_v37 = vpack.i.b16 %v1375_v31, %v1347_v43  ;;  %v1477_v59 = vshrl.u32 %v1375_v31, 16  ;;  %v1380_v22 = vrot.slane %v1375_v31, 4 }
 0x134   : > { %v8434_v55 = vpop.f32.mrf.mxu1  ;;  %v509_v10 = vadd.f32 %v8166_v20, %v508_v54  ;;  %v1243_v54 = vsel %vm800_vm2, 0, %v1242_v27  ;;  %v1354_v62 = vrot.slane %v1351_v52, 4  ;;  %v1382_v34 = vrot.slane %v1379_v3, 4 }
 0x135   : > { %v1468_v41 = vshrl.u32 %v1243_v54, 16  ;;  %1574 = vst.msk [vmem:[#allocation5 + $0x18] sm:$0xf] %vm573_vm1, %v1454_v38  ;;  %v1478_v51 = vpack.i.b16 %v1477_v59, %v1476_v36  ;;  %v1381_v43 = vsel %vm800_vm2, 0, %v1380_v22 }
 0x136   : > { %v560_v44 = vpack.c.bf16 %v509_v10, %v509_v10  ;;  %v1271_v10 = vsel %vm800_vm2, 0, %v1270_v8  ;;  %1584 = vst.msk [vmem:[#allocation5 + $0x40] sm:$0xf] %vm573_vm1, %v1474_v37  ;;  %v1355_v31 = vsel %vm800_vm2, 0, %v1354_v62 }
 0x137   : > { %v1466_v30 = vpack.i.b16 %v1271_v10, %v1243_v54  ;;  %v1469_v47 = vshrl.u32 %v1271_v10, 16  ;;  %v1353_v54 = vsel %vm800_vm2, 0, %v1352_v24  ;;  %1586 = vst.msk [vmem:[#allocation5 + $0x48] sm:$0xf] %vm573_vm1, %v1478_v51 }
 0x138   : > { %593 = vst.msk [vmem:[#allocation3 + $0x4c] sm:$0xf] %vm573_vm1, %v560_v44  ;;  %676 = vrot.lane.b32.xlu1 %v560_v44, %s8013_s12 }
 0x139   : > { %1580 = vst.msk [vmem:[#allocation5 + $0x30] sm:$0xf] %vm573_vm1, %v1466_v30  ;;  %v1470_v44 = vpack.i.b16 %v1469_v47, %v1468_v41  ;;  %v1482_v30 = vpack.i.b16 %v1381_v43, %v1353_v54  ;;  %v1484_v41 = vshrl.u32 %v1353_v54, 16  ;;  %v1485_v47 = vshrl.u32 %v1381_v43, 16 }
 0x13a   : > { %v655_v48 = vpop.permute.xlu2 %654 }
 0x13b   : > { %743 = vst.msk [vmem:[#allocation2 + $0x20] sm:$0xf] %vm734_vm3, %v655_v48  ;;  %v511_v21 = vpop.f32.mrf.mxu0  ;;  %v1490_v48 = vpack.i.b16 %v1379_v3, %v1351_v52  ;;  %v1486_v24 = vpack.i.b16 %v1485_v47, %v1484_v41 }
 0x13c   : > { %v8452_v56 = vpop.f32.mrf.mxu1  ;;  %v512_v27 = vadd.f32 %v8166_v20, %v511_v21  ;;  %1582 = vst.msk [vmem:[#allocation5 + $0x38] sm:$0xf] %vm573_vm1, %v1470_v44  ;;  %v1383_v44 = vsel %vm800_vm2, 0, %v1382_v34 }
 0x13d   : > { %1592 = vst.msk [vmem:[#allocation5 + $0x60] sm:$0xf] %vm573_vm1, %v1490_v48  ;;  %v1498_v52 = vpack.i.b16 %v1383_v44, %v1355_v31  ;;  %v1501_v37 = vshrl.u32 %v1383_v44, 16 }
 0x13e   : > { %v561_v8 = vpack.c.bf16 %v512_v27, %v512_v27  ;;  %v1494_v27 = vpack.i.b16 %v1493_v13, %v1492_v58  ;;  %1588 = vst.msk [vmem:[#allocation5 + $0x50] sm:$0xf] %vm573_vm1, %v1482_v30 }
 0x13f   : > { %1590 = vst.msk [vmem:[#allocation5 + $0x58] sm:$0xf] %vm573_vm1, %v1486_v24 }
 0x140   : > { %594 = vst.msk [vmem:[#allocation3 + $0x50] sm:$0xf] %vm573_vm1, %v561_v8  ;;  %678 = vrot.lane.b32.xlu2 %v561_v8, %s8013_s12  ;;  %v1500_v8 = vshrl.u32 %v1355_v31, 16 }
 0x141   : > { %1594 = vst.msk [vmem:[#allocation5 + $0x68] sm:$0xf] %vm573_vm1, %v1494_v27 }
 0x142   : > { %v651_v10 = vpop.permute.xlu0 %650  ;;  %v1502_v36 = vpack.i.b16 %v1501_v37, %v1500_v8  ;;  %1596 = vst.msk [vmem:[#allocation5 + $0x70] sm:$0xf] %vm573_vm1, %v1498_v52 }
 0x143   : > { %741 = vst.msk [vmem:[#allocation2 + $0x18] sm:$0xf] %vm734_vm3, %v651_v10  ;;  %v513_v18 = vpop.f32.mrf.mxu0 }
 0x144   : > { %v8469_v21 = vpop.f32.mrf.mxu1  ;;  %v514_v38 = vadd.f32 %v8166_v20, %v513_v18  ;;  %1598 = vst.msk [vmem:[#allocation5 + $0x78] sm:$0xf] %vm573_vm1, %v1502_v36 }
 0x146   : > { %v562_v3 = vpack.c.bf16 %v514_v38, %v514_v38 }
 0x147   : > { %v1204_v57 = vld [vmem:[#allocation3 + $0x50] sm:$0xf] }
 0x148   : > { %595 = vst.msk [vmem:[#allocation3 + $0x54] sm:$0xf] %vm573_vm1, %v562_v3  ;;  %680 = vrot.lane.b32.xlu0 %v562_v3, %s8013_s12 }
 0x14a   : > { %v653_v59 = vpop.permute.xlu1 %652 }
 0x14b   : > { %742 = vst.msk [vmem:[#allocation2 + $0x1c] sm:$0xf] %vm734_vm3, %v653_v59  ;;  %v516_v51 = vpop.f32.mrf.mxu0 }
 0x14c   : > { %v8483_v54 = vpop.f32.mrf.mxu1  ;;  %v517_v22 = vadd.f32 %v8166_v20, %v516_v51 }
 0x14e   : > { %v563_v48 = vpack.c.bf16 %v517_v22, %v517_v22 }
 0x150   : > { %596 = vst.msk [vmem:[#allocation3 + $0x58] sm:$0xf] %vm573_vm1, %v563_v48  ;;  %682 = vrot.lane.b32.xlu1 %v563_v48, %s8013_s12 }
 0x152   : > { %v661_v58 = vpop.permute.xlu2 %660 }
 0x153   : > { %746 = vst.msk [vmem:[#allocation2 + $0x2c] sm:$0xf] %vm734_vm3, %v661_v58  ;;  %v518_v13 = vpop.f32.mrf.mxu0 }
 0x154   : > { %v8489_v62 = vpop.f32.mrf.mxu1  ;;  %v519_v34 = vadd.f32 %v8166_v20, %v518_v13 }
 0x156   : > { %v564_v10 = vpack.c.bf16 %v519_v34, %v519_v34 }
 0x158   : > { %597 = vst.msk [vmem:[#allocation3 + $0x5c] sm:$0xf] %vm573_vm1, %v564_v10  ;;  %684 = vrot.lane.b32.xlu2 %v564_v10, %s8013_s12 }
 0x15a   : > { %v657_v43 = vpop.permute.xlu0 %656 }
 0x15b   : > { %744 = vst.msk [vmem:[#allocation2 + $0x24] sm:$0xf] %vm734_vm3, %v657_v43  ;;  %v521_v18 = vpop.f32.mrf.mxu0  ;;  %v775_v43 = vld [vmem:[#allocation2 + $0x20] sm:$0xf] }
 0x15c   : > { %v1914_v30 = vpop.f32.mrf.mxu1  ;;  %v522_v41 = vadd.f32 %v8166_v20, %v521_v18 }
 0x15d   : > { %v1915_v27 = vadd.f32 %v8230_v4, %v1914_v30 }
 0x15e   : > { %v565_v47 = vpack.c.bf16 %v522_v41, %v522_v41 }
 0x15f   : > { %v8500_v24 = vpack.c.bf16 %v1915_v27, %v1915_v27  ;;  %v799_v27 = vrot.slane %v775_v43, 4 }
 0x160   : > { %598 = vst.msk [vmem:[#allocation3 + $0x60] sm:$0xf] %vm573_vm1, %v565_v47  ;;  %686 = vrot.lane.b32.xlu0 %v565_v47, %s8013_s12 }
 0x161   : > { %v3130_v8 = vunpack.c.l.b16 %v8500_v24 }
 0x162   : > { %v659_v38 = vpop.permute.xlu1 %658 }
 0x163   : > { %745 = vst.msk [vmem:[#allocation2 + $0x28] sm:$0xf] %vm734_vm3, %v659_v38  ;;  %v523_v31 = vpop.f32.mrf.mxu0 }
 0x164   : > { %v1916_v44 = vpop.f32.mrf.mxu1  ;;  %v524_v52 = vadd.f32 %v8166_v20, %v523_v31 }
 0x165   : > { %v1917_v3 = vadd.f32 %v8230_v4, %v1916_v44 }
 0x166   : > { %v566_v37 = vpack.c.bf16 %v524_v52, %v524_v52  ;;  %v773_v52 = vld [vmem:[#allocation2 + $0x18] sm:$0xf] }
 0x167   : > { %v1959_v36 = vpack.c.bf16 %v1917_v3, %v1917_v3 }
 0x168   : > { %599 = vst.msk [vmem:[#allocation3 + $0x64] sm:$0xf] %vm573_vm1, %v566_v37  ;;  %688 = vrot.lane.b32.xlu1 %v566_v37, %s8013_s12  ;;  %v769_v37 = vld [vmem:[#allocation2 + $0x8] sm:$0xf] }
 0x169   : > { %v3131_v59 = vunpack.c.l.b16 %v1959_v36 }
 0x16a   : > { %v667_v22 = vpop.permute.xlu2 %666  ;;  %v777_v10 = vld [vmem:[#allocation2 + $0x28] sm:$0xf] }
 0x16b   : > { %v8507_v51 = vpack.c.b16 %v3131_v59, %v3130_v8  ;;  %749 = vst.msk [vmem:[#allocation2 + $0x38] sm:$0xf] %vm734_vm3, %v667_v22  ;;  %v526_v48 = vpop.f32.mrf.mxu0  ;;  %v828_v30 = vrot.slane %v777_v10, 4 }
 0x16c   : > { %v1919_v58 = vpop.f32.mrf.mxu1  ;;  %v527_v13 = vadd.f32 %v8166_v20, %v526_v48  ;;  %v767_v48 = vld [vmem:[#allocation2] sm:$0xf] }
 0x16d   : > { %11185 = vst [vmem:[#allocation20_spill] sm:$0xff] %v8507_v51  ;;  %v1920_v18 = vadd.f32 %v8230_v4, %v1919_v58  ;;  %v1897_v58 = vadd.f32 %v8230_v4, %v8385_v63  ;;  %v801_v43 = vsel %vm800_vm2, %v799_v27, %v767_v48  ;;  %v771_v48 = vld [vmem:[#allocation2 + $0x10] sm:$0xf] }
 0x16e   : > { %v567_v34 = vpack.c.bf16 %v527_v13, %v527_v13  ;;  %v829_v13 = vsel %vm800_vm2, %v828_v30, %v769_v37  ;;  %v805_v30 = vperm.slane %v801_v43, %v8273_v49 }
 0x16f   : > { %v8518_v22 = vpack.c.bf16 %v1920_v18, %v1920_v18  ;;  %v833_v18 = vperm.slane %v829_v13, %v8273_v49 }
 0x170   : > { %600 = vst.msk [vmem:[#allocation3 + $0x68] sm:$0xf] %vm573_vm1, %v567_v34  ;;  %690 = vrot.lane.b32.xlu2 %v567_v34, %s8013_s12  ;;  %v814_v51 = vrot.slane %v805_v30, 4 }
 0x171   : > { %v842_v6 = vrot.slane %v833_v18, 4 }
 0x172   : > { %v781_v41 = vld [vmem:[#allocation2 + $0x38] sm:$0xf]  ;;  %v663_v47 = vpop.permute.xlu0 %662 }
 0x173   : > { %v834_v38 = vrot.slane %v781_v41, 4  ;;  %747 = vst.msk [vmem:[#allocation2 + $0x30] sm:$0xf] %vm734_vm3, %v663_v47  ;;  %v528_v31 = vpop.f32.mrf.mxu0  ;;  %v3160_v41 = vunpack.c.l.b16 %v8518_v22 }
 0x174   : > { %v1921_v44 = vpop.f32.mrf.mxu1  ;;  %v529_v3 = vadd.f32 %v8166_v20, %v528_v31 }
 0x175   : > { %v1922_v8 = vadd.f32 %v8230_v4, %v1921_v44  ;;  %v835_v59 = vsel %vm800_vm2, %v834_v38, %v773_v52  ;;  %v8532_v38 = vpack.c.bf16 %v1897_v58, %v1897_v58  ;;  %v2135_v44 = vrot.slane %v1959_v36, 4 }
 0x176   : > { %v839_v34 = vperm.slane %v835_v59, %v8273_v49  ;;  %v568_v10 = vpack.c.bf16 %v529_v3, %v529_v3 }
 0x177   : > { %v8526_v47 = vpack.c.bf16 %v1922_v8, %v1922_v8  ;;  %11186 = vst [vmem:[#allocation21_spill] sm:$0xff] %v8532_v38  ;;  %v2136_v36 = vsel %vm800_vm2, %v2135_v44, %v8532_v38 }
 0x178   : > { %v840_v31 = vrot.slane %v839_v34, 4  ;;  %601 = vst.msk [vmem:[#allocation3 + $0x6c] sm:$0xf] %vm573_vm1, %v568_v10  ;;  %692 = vrot.lane.b32.xlu0 %v568_v10, %s8013_s12 }
 0x179   : > { %v3161_v63 = vunpack.c.l.b16 %v8526_v47 }
 0x17a   : > { %v779_v52 = vld [vmem:[#allocation2 + $0x30] sm:$0xf]  ;;  %v665_v27 = vpop.permute.xlu1 %664  ;;  %v841_v13 = vsel %vm800_vm2, %v840_v31, %v833_v18  ;;  %v1907_v31 = vadd.f32 %v8230_v4, %v8469_v21  ;;  %v2140_v18 = vperm.slane %v2136_v36, %v8273_v49  ;;  %v8567_v21 = vld [vmem:[%s11094_s4] ss:$0 sm:$0xff] }
 0x17b   : > { %v806_v3 = vrot.slane %v779_v52, 4  ;;  %v8535_v37 = vpack.c.b16 %v3161_v63, %v3160_v41  ;;  %748 = vst.msk [vmem:[#allocation2 + $0x34] sm:$0xf] %vm734_vm3, %v665_v27  ;;  %v531_v8 = vpop.f32.mrf.mxu0  ;;  %v843_v63 = vsel %vm800_vm2, %v839_v34, %v842_v6  ;;  %v847_v52 = vperm.slane %v841_v13, %v8321_v42 }
 0x17c   : > { %v1924_v59 = vpop.f32.mrf.mxu1  ;;  %v532_v10 = vadd.f32 %v8166_v20, %v531_v8  ;;  %v2149_v36 = vrot.slane %v2140_v18, 4 }
 0x17d   : > { %11187 = vst [vmem:[#allocation22_spill] sm:$0xff] %v8535_v37  ;;  %v807_v58 = vsel %vm800_vm2, %v806_v3, %v771_v48  ;;  %v1925_v20 = vadd.f32 %v8230_v4, %v1924_v59  ;;  %v8558_v3 = vperm.slane %v843_v63, %v8321_v42  ;;  %v852_v48 = vrot.slane %v847_v52, 4 }
 0x17e   : > { %v811_v43 = vperm.slane %v807_v58, %v8273_v49  ;;  %v569_v41 = vpack.c.bf16 %v532_v10, %v532_v10  ;;  %v8573_v58 = vpack.c.bf16 %v1907_v31, %v1907_v31 }
 0x17f   : > { %v8562_v10 = vpack.c.bf16 %v1925_v20, %v1925_v20 }
 0x180   : > { %v812_v27 = vrot.slane %v811_v43, 4  ;;  %v815_v37 = vsel %vm800_vm2, %v811_v43, %v814_v51  ;;  %602 = vst.msk [vmem:[#allocation3 + $0x70] sm:$0xf] %vm573_vm1, %v569_v41  ;;  %694 = vrot.lane.b32.xlu1 %v569_v41, %s8013_s12 }
 0x181   : > { %v8554_v44 = vperm.slane %v815_v37, %v8321_v42  ;;  %11188 = vst [vmem:[#allocation23_spill] sm:$0xff] %v8573_v58  ;;  %v3190_v43 = vunpack.c.l.b16 %v8562_v10 }
 0x182   : > { %v673_v6 = vpop.permute.xlu2 %672  ;;  %v813_v34 = vsel %vm800_vm2, %v812_v27, %v805_v30  ;;  %v1029_v27 = vshrl.u32 %v847_v52, 16  ;;  %v780_v38 = vld [vmem:[#allocation2 + $0x34] sm:$0xf] }
 0x183   : > { %752 = vst.msk [vmem:[#allocation2 + $0x44] sm:$0xf] %vm734_vm3, %v673_v6  ;;  %v533_v51 = vpop.f32.mrf.mxu0  ;;  %v819_v59 = vperm.slane %v813_v34, %v8321_v42  ;;  %v1042_v13 = vpack.i.b16 %v8558_v3, %v8554_v44  ;;  %v1044_v31 = vshrl.u32 %v8554_v44, 16  ;;  %v918_v46 = vrot.slane %v780_v38, 4 }
 0x184   : > { %v1926_v8 = vpop.f32.mrf.mxu1  ;;  %v534_v37 = vadd.f32 %v8567_v21, %v533_v51  ;;  %v853_v51 = vsel %vm800_vm2, 0, %v852_v48  ;;  %v854_v38 = vrot.slane %v8558_v3, 4 }
 0x185   : > { %v1927_v30 = vadd.f32 %v8230_v4, %v1926_v8  ;;  %1160 = vst.msk [vmem:[#allocation4 + $0x20] sm:$0xf] %vm734_vm3, %v1042_v13  ;;  %v1026_v20 = vpack.i.b16 %v847_v52, %v819_v59  ;;  %v1028_v6 = vshrl.u32 %v819_v59, 16  ;;  %v824_v34 = vrot.slane %v819_v59, 4 }
 0x186   : > { %v570_v41 = vpack.c.bf16 %v534_v37, %v534_v37  ;;  %v1045_v52 = vshrl.u32 %v8558_v3, 16  ;;  %v1037_v17 = vshrl.u32 %v853_v51, 16 }
 0x187   : > { %v1963_v63 = vpack.c.bf16 %v1927_v30, %v1927_v30  ;;  %1152 = vst.msk [vmem:[#allocation4] sm:$0xf] %vm734_vm3, %v1026_v20  ;;  %v1030_v37 = vpack.i.b16 %v1029_v27, %v1028_v6  ;;  %v825_v30 = vsel %vm800_vm2, 0, %v824_v34 }
 0x188   : > { %603 = vst.msk [vmem:[#allocation3 + $0x74] sm:$0xf] %vm573_vm1, %v570_v41  ;;  %696 = vrot.lane.b32.xlu2 %v570_v41, %s8013_s12  ;;  %v1034_v13 = vpack.i.b16 %v853_v51, %v825_v30  ;;  %v1036_v2 = vshrl.u32 %v825_v30, 16  ;;  %v1046_v34 = vpack.i.b16 %v1045_v52, %v1044_v31  ;;  %v776_v51 = vld [vmem:[#allocation2 + $0x24] sm:$0xf]  ;;  %v855_v31 = vsel %vm800_vm2, 0, %v854_v38 }
 0x189   : > { %v2141_v4 = vrot.slane %v1963_v63, 4  ;;  %v3191_v8 = vunpack.c.l.b16 %v1963_v63  ;;  %1154 = vst.msk [vmem:[#allocation4 + $0x8] sm:$0xf] %vm734_vm3, %v1030_v37  ;;  %v912_v3 = vrot.slane %v776_v51, 4 }
 0x18a   : > { %v669_v48 = vpop.permute.xlu0 %668  ;;  %v1038_v6 = vpack.i.b16 %v1037_v17, %v1036_v2  ;;  %1156 = vst.msk [vmem:[#allocation4 + $0x10] sm:$0xf] %vm734_vm3, %v1034_v13  ;;  %v826_v17 = vrot.slane %v8554_v44, 4  ;;  %v8614_v44 = vld [vmem:[%s11092_s2] ss:$0 sm:$0xff] }
 0x18b   : > { %v2142_v59 = vsel %vm800_vm2, %v2141_v4, %v8573_v58  ;;  %v8587_v16 = vpack.c.b16 %v3191_v8, %v3190_v43  ;;  %750 = vst.msk [vmem:[#allocation2 + $0x3c] sm:$0xf] %vm734_vm3, %v669_v48  ;;  %v536_v63 = vpop.f32.mrf.mxu0  ;;  %v772_v4 = vld [vmem:[#allocation2 + $0x14] sm:$0xf]  ;;  %v778_v43 = vld [vmem:[#allocation2 + $0x2c] sm:$0xf]  ;;  %v1902_v13 = vadd.f32 %v8614_v44, %v8434_v55  ;;  %v1912_v38 = vadd.f32 %v8614_v44, %v8489_v62 }
 0x18c   : > { %v2146_v41 = vperm.slane %v2142_v59, %v8273_v49  ;;  %v537_v27 = vadd.f32 %v8567_v21, %v536_v63  ;;  %v1929_v20 = vpop.f32.mrf.mxu1  ;;  %1158 = vst.msk [vmem:[#allocation4 + $0x18] sm:$0xf] %vm734_vm3, %v1038_v6  ;;  %v919_v59 = vsel %vm800_vm2, %v918_v46, %v772_v4  ;;  %v940_v2 = vrot.slane %v778_v43, 4  ;;  %v768_v48 = vld [vmem:[#allocation2 + $0x4] sm:$0xf] }
 0x18d   : > { %11189 = vst [vmem:[#allocation24_spill] sm:$0xff] %v8587_v16  ;;  %v8609_v52 = vperm.slane %v919_v59, %v8273_v49  ;;  %v1930_v63 = vadd.f32 %v8614_v44, %v1929_v20  ;;  %v774_v4 = vld [vmem:[#allocation2 + $0x1c] sm:$0xf]  ;;  %v913_v55 = vsel %vm800_vm2, %v912_v3, %v768_v48  ;;  %v1208_v59 = vld [vmem:[#allocation3 + $0x60] sm:$0xf] }
 0x18e   : > { %v2147_v58 = vrot.slane %v2146_v41, 4  ;;  %v8593_v30 = vsel %vm800_vm2, %v2146_v41, %v2149_v36  ;;  %v571_v8 = vpack.c.bf16 %v537_v27, %v537_v27  ;;  %1162 = vst.msk [vmem:[#allocation4 + $0x28] sm:$0xf] %vm734_vm3, %v1046_v34  ;;  %v827_v36 = vsel %vm800_vm2, 0, %v826_v17  ;;  %v770_v34 = vld [vmem:[#allocation2 + $0xc] sm:$0xf] }
 0x18f   : > { %v1052_v6 = vshrl.u32 %v827_v36, 16  ;;  %v1053_v17 = vshrl.u32 %v855_v31, 16  ;;  %v8640_v48 = vperm.slane %v913_v55, %v8273_v49  ;;  %v1211_v16 = vld [vmem:[#allocation3 + $0x6c] sm:$0xf] }
 0x190   : > { %v8600_v37 = vsel %vm800_vm2, %v2147_v58, %v2140_v18  ;;  %604 = vst.msk [vmem:[#allocation3 + $0x78] sm:$0xf] %vm573_vm1, %v571_v8  ;;  %698 = vrot.lane.b32.xlu0 %v571_v8, %s8013_s12  ;;  %v1050_v58 = vpack.i.b16 %v855_v31, %v827_v36  ;;  %v941_v8 = vsel %vm800_vm2, %v940_v2, %v770_v34  ;;  %v924_v36 = vrot.slane %v8609_v52, 4 }
 0x191   : > { %v1054_v2 = vpack.i.b16 %v1053_v17, %v1052_v6  ;;  %v8637_v3 = vperm.slane %v941_v8, %v8273_v49  ;;  %v1272_v31 = vrot.slane %v1208_v59, 4 }
 0x192   : > { %v782_v46 = vld [vmem:[#allocation2 + $0x3c] sm:$0xf]  ;;  %v671_v18 = vpop.permute.xlu1 %670  ;;  %1164 = vst.msk [vmem:[#allocation4 + $0x30] sm:$0xf] %vm734_vm3, %v1050_v58  ;;  %v8634_v58 = vpack.c.bf16 %v1930_v63, %v1930_v63  ;;  %v2163_v63 = vrot.slane %v8526_v47, 4  ;;  %v925_v55 = vsel %vm800_vm2, %v924_v36, %v8640_v48 }
 0x193   : > { %v946_v41 = vrot.slane %v782_v46, 4  ;;  %751 = vst.msk [vmem:[#allocation2 + $0x40] sm:$0xf] %vm734_vm3, %v671_v18  ;;  %v538_v27 = vpop.f32.mrf.mxu0 }
 0x194   : > { %v539_v43 = vadd.f32 %v8567_v21, %v538_v27  ;;  %v1931_v51 = vpop.f32.mrf.mxu1  ;;  %v8632_v21 = vpack.c.bf16 %v1902_v13, %v1902_v13  ;;  %v1209_v27 = vld [vmem:[#allocation3 + $0x64] sm:$0xf]  ;;  %v8645_v13 = vpack.c.bf16 %v1912_v38, %v1912_v38  ;;  %v3220_v6 = vunpack.c.l.b16 %v8634_v58  ;;  %1166 = vst.msk [vmem:[#allocation4 + $0x38] sm:$0xf] %vm734_vm3, %v1054_v2 }
 0x195   : > { %v947_v20 = vsel %vm800_vm2, %v946_v41, %v774_v4  ;;  %v1932_v62 = vadd.f32 %v8614_v44, %v1931_v51  ;;  %v1210_v41 = vld [vmem:[#allocation3 + $0x68] sm:$0xf]  ;;  %v1212_v4 = vld [vmem:[#allocation3 + $0x70] sm:$0xf]  ;;  %v1384_v51 = vrot.slane %v1209_v27, 4 }
 0x196   : > { %v8629_v46 = vperm.slane %v947_v20, %v8273_v49  ;;  %v572_v18 = vpack.c.bf16 %v539_v43, %v539_v43  ;;  %11190 = vst [vmem:[#allocation25_spill] sm:$0xff] %v8632_v21  ;;  %v1200_v20 = vld [vmem:[#allocation3 + $0x40] sm:$0xf]  ;;  %v1300_v17 = vrot.slane %v1210_v41, 4  ;;  %v1278_v2 = vrot.slane %v1212_v4, 4 }
 0x197   : > { %11191 = vst [vmem:[#allocation26_spill] sm:$0xff] %v8645_v13  ;;  %v1965_v43 = vpack.c.bf16 %v1932_v62, %v1932_v62  ;;  %v1273_v62 = vsel %vm800_vm2, %v1272_v31, %v1200_v20  ;;  %v1201_v27 = vld [vmem:[#allocation3 + $0x44] sm:$0xf]  ;;  %v2164_v29 = vsel %vm800_vm2, %v2163_v63, %v8632_v21  ;;  %v931_v41 = vperm.slane %v925_v55, %v8321_v42 }
 0x198   : > { %v952_v34 = vrot.slane %v8629_v46, 4  ;;  %605 = vst.msk [vmem:[#allocation3 + $0x7c] sm:$0xf] %vm573_vm1, %v572_v18  ;;  %700 = vrot.lane.b32.xlu1 %v572_v18, %s8013_s12  ;;  %v1412_v4 = vrot.slane %v1211_v16, 4  ;;  %v8668_v7 = vperm.slane %v1273_v62, %v8273_v49  ;;  %v2168_v63 = vperm.slane %v2164_v29, %v8273_v49  ;;  %s6954_s12 = scalar_lea.hbm %s11096_s6, %s7641_s5 }
 0x199   : > { %v2169_v38 = vrot.slane %v1965_v43, 4  ;;  %v3221_v18 = vunpack.c.l.b16 %v1965_v43  ;;  %v1202_v43 = vld [vmem:[#allocation3 + $0x48] sm:$0xf]  ;;  %v954_v55 = vrot.slane %v8637_v3, 4  ;;  %v1060_v29 = vshrl.u32 %v931_v41, 16 }
 0x19a   : > { %v679_v8 = vpop.permute.xlu2 %678  ;;  %v953_v59 = vsel %vm800_vm2, %v952_v34, %v8637_v3  ;;  %v1301_v31 = vsel %vm800_vm2, %v1300_v17, %v1202_v43  ;;  %v1213_v17 = vld [vmem:[#allocation3 + $0x74] sm:$0xf] }
 0x19b   : > { %755 = vst.msk [vmem:[#allocation2 + $0x50] sm:$0xf] %vm734_vm3, %v679_v8  ;;  %v959_v47 = vperm.slane %v953_v59, %v8321_v42  ;;  %v2170_v36 = vsel %vm800_vm2, %v2169_v38, %v8645_v13  ;;  %v8661_v34 = vpack.c.b16 %v3221_v18, %v3220_v6  ;;  %v1385_v8 = vsel %vm800_vm2, %v1384_v51, %v1201_v27  ;;  %v1214_v51 = vld [vmem:[#allocation3 + $0x78] sm:$0xf]  ;;  %v1203_v27 = vld [vmem:[#allocation3 + $0x4c] sm:$0xf] }
 0x19c   : > { %v2174_v59 = vperm.slane %v2170_v36, %v8273_v49  ;;  %v1279_v6 = vsel %vm800_vm2, %v1278_v2, %v1204_v57  ;;  %v8674_v18 = vperm.slane %v1385_v8, %v8273_v49  ;;  %v8678_v16 = vperm.slane %v1301_v31, %v8273_v49 }
 0x19d   : > { %11192 = vst [vmem:[#allocation27_spill] sm:$0xff] %v8661_v34  ;;  %v1058_v20 = vpack.i.b16 %v959_v47, %v931_v41  ;;  %v1061_v43 = vshrl.u32 %v959_v47, 16  ;;  %v926_v57 = vrot.slane %v8640_v48, 4  ;;  %v1413_v3 = vsel %vm800_vm2, %v1412_v4, %v1203_v27 }
 0x19e   : > { %v2175_v38 = vrot.slane %v2174_v59, 4  ;;  %v8684_v2 = vperm.slane %v1279_v6, %v8273_v49  ;;  %v936_v8 = vrot.slane %v931_v41, 4  ;;  %v2177_v31 = vrot.slane %v2168_v63, 4 }
 0x19f   : > { %1168 = vst.msk [vmem:[#allocation4 + $0x40] sm:$0xf] %vm734_vm3, %v1058_v20  ;;  %v1286_v20 = vrot.slane %v8668_v7, 4  ;;  %v1306_v34 = vrot.slane %v1214_v51, 4  ;;  %v1062_v13 = vpack.i.b16 %v1061_v43, %v1060_v29  ;;  %v1390_v21 = vrot.slane %v1213_v17, 4 }
 0x1a0   : > { %v2176_v62 = vsel %vm800_vm2, %v2175_v38, %v2168_v63  ;;  %v927_v38 = vsel %vm800_vm2, %v8609_v52, %v926_v57  ;;  %v8692_v48 = vperm.slane %v8600_v37, %v8321_v42  ;;  %v1314_v41 = vrot.slane %v8678_v16, 4  ;;  %v1206_v52 = vld [vmem:[#allocation3 + $0x58] sm:$0xf] }
 0x1a1   : > { %v8695_v4 = vperm.slane %v2176_v62, %v8321_v42  ;;  %v8700_v27 = vperm.slane %v1413_v3, %v8273_v49  ;;  %v955_v63 = vsel %vm800_vm2, %v8629_v46, %v954_v55  ;;  %1170 = vst.msk [vmem:[#allocation4 + $0x48] sm:$0xf] %vm734_vm3, %v1062_v13  ;;  %v1284_v51 = vrot.slane %v8684_v2, 4 }
 0x1a2   : > { %v675_v36 = vpop.permute.xlu0 %674  ;;  %v1287_v37 = vsel %vm800_vm2, %v8684_v2, %v1286_v20  ;;  %v937_v17 = vsel %vm800_vm2, 0, %v936_v8  ;;  %v964_v62 = vrot.slane %v959_v47, 4  ;;  %v8711_v29 = vperm.slane %v8593_v30, %v8321_v42  ;;  %v1215_v2 = vld [vmem:[#allocation3 + $0x7c] sm:$0xf] }
 0x1a3   : > { %753 = vst.msk [vmem:[#allocation2 + $0x48] sm:$0xf] %vm734_vm3, %v675_v36  ;;  %v1205_v36 = vld [vmem:[#allocation3 + $0x54] sm:$0xf]  ;;  %v1307_v43 = vsel %vm800_vm2, %v1306_v34, %v1206_v52  ;;  %v2178_v46 = vsel %vm800_vm2, %v2174_v59, %v2177_v31  ;;  %v935_v13 = vperm.slane %v927_v38, %v8321_v42  ;;  %v963_v47 = vperm.slane %v955_v63, %v8321_v42 }
 0x1a4   : > { %11193 = vst [vmem:[#allocation28_spill] sm:$0xff] %v8711_v29  ;;  %v1391_v55 = vsel %vm800_vm2, %v1390_v21, %v1205_v36  ;;  %v965_v57 = vsel %vm800_vm2, 0, %v964_v62  ;;  %v1068_v30 = vshrl.u32 %v937_v17, 16  ;;  %v2266_v34 = vshrl.u32 %v8692_v48, 16 }
 0x1a5   : > { %v1066_v20 = vpack.i.b16 %v965_v57, %v937_v17  ;;  %v1069_v6 = vshrl.u32 %v965_v57, 16  ;;  %v1311_v59 = vperm.slane %v1307_v43, %v8273_v49  ;;  %v8724_v31 = vperm.slane %v2178_v46, %v8321_v42 }
 0x1a6   : > { %v1074_v21 = vpack.i.b16 %v963_v47, %v935_v13  ;;  %v2267_v38 = vshrl.u32 %v8695_v4, 16  ;;  %v8729_v52 = vperm.slane %v1287_v37, %v8321_v42  ;;  %v1076_v17 = vshrl.u32 %v935_v13, 16 }
 0x1a7   : > { %11194 = vst [vmem:[#allocation29_spill] sm:$0xff] %v8724_v31  ;;  %v1070_v63 = vpack.i.b16 %v1069_v6, %v1068_v30  ;;  %v1077_v62 = vshrl.u32 %v963_v47, 16  ;;  %v1418_v36 = vrot.slane %v1215_v2, 4  ;;  %v2159_v46 = vrot.slane %v8692_v48, 4 }
 0x1a8   : > { %1172 = vst.msk [vmem:[#allocation4 + $0x50] sm:$0xf] %vm734_vm3, %v1066_v20  ;;  %v8733_v43 = vpack.i.b16 %v2267_v38, %v2266_v34  ;;  %v2187_v57 = vrot.slane %v8695_v4, 4  ;;  %v938_v3 = vrot.slane %v935_v13, 4  ;;  %v966_v35 = vrot.slane %v963_v47, 4 }
 0x1a9   : > { %1176 = vst.msk [vmem:[#allocation4 + $0x60] sm:$0xf] %vm734_vm3, %v1074_v21  ;;  %v1078_v37 = vpack.i.b16 %v1077_v62, %v1076_v17  ;;  %v1207_v20 = vld [vmem:[#allocation3 + $0x5c] sm:$0xf]  ;;  %v1312_v6 = vrot.slane %v1311_v59, 4  ;;  %v8740_v30 = vsel %vm800_vm2, 0, %v2159_v46  ;;  %v1315_v38 = vsel %vm800_vm2, %v1311_v59, %v1314_v41 }
 0x1aa   : > { %v677_v8 = vpop.permute.xlu1 %676  ;;  %1174 = vst.msk [vmem:[#allocation4 + $0x58] sm:$0xf] %vm734_vm3, %v1070_v63  ;;  %v8743_v2 = vsel %vm800_vm2, 0, %v2187_v57  ;;  %v939_v21 = vsel %vm800_vm2, 0, %v938_v3  ;;  %v967_v13 = vsel %vm800_vm2, 0, %v966_v35  ;;  %v2272_v47 = vshrl.u32 %v8740_v30, 16 }
 0x1ab   : > { %754 = vst.msk [vmem:[#allocation2 + $0x4c] sm:$0xf] %vm734_vm3, %v677_v8  ;;  %v1395_v8 = vperm.slane %v1391_v55, %v8273_v49  ;;  %v1419_v63 = vsel %vm800_vm2, %v1418_v36, %v1207_v20  ;;  %v1082_v17 = vpack.i.b16 %v967_v13, %v939_v21  ;;  %v2273_v62 = vshrl.u32 %v8743_v2, 16 }
 0x1ac   : > { %1178 = vst.msk [vmem:[#allocation4 + $0x68] sm:$0xf] %vm734_vm3, %v1078_v37  ;;  %v1285_v46 = vsel %vm800_vm2, %v1284_v51, %v8668_v7  ;;  %v1084_v37 = vshrl.u32 %v939_v21, 16  ;;  %v1085_v34 = vshrl.u32 %v967_v13, 16  ;;  %v2278_v55 = vshrl.u32 %v8711_v29, 16 }
 0x1ad   : > { %v8760_v35 = vpack.i.b16 %v2273_v62, %v2272_v47  ;;  %v2279_v3 = vshrl.u32 %v8724_v31, 16  ;;  %v2161_v41 = vrot.slane %v8711_v29, 4  ;;  %v2189_v59 = vrot.slane %v8724_v31, 4  ;;  %1180 = vst.msk [vmem:[#allocation4 + $0x70] sm:$0xf] %vm734_vm3, %v1082_v17 }
 0x1ae   : > { %v1396_v36 = vrot.slane %v1395_v8, 4  ;;  %v1323_v20 = vperm.slane %v1315_v38, %v8321_v42  ;;  %v1423_v7 = vperm.slane %v1419_v63, %v8273_v49  ;;  %v1086_v51 = vpack.i.b16 %v1085_v34, %v1084_v37 }
 0x1af   : > { %11195 = vst [vmem:[#allocation30_spill] sm:$0xff] %v8760_v35  ;;  %v1313_v21 = vsel %vm800_vm2, %v1312_v6, %v8678_v16  ;;  %v8770_v13 = vpack.i.b16 %v2279_v3, %v2278_v55  ;;  %v8773_v47 = vsel %vm800_vm2, 0, %v2161_v41  ;;  %v8776_v62 = vsel %vm800_vm2, 0, %v2189_v59 }
 0x1b0   : > { %11197 = vst [vmem:[#allocation32_spill] sm:$0xff] %v8773_v47  ;;  %v2284_v63 = vshrl.u32 %v8773_v47, 16  ;;  %v2285_v16 = vshrl.u32 %v8776_v62, 16  ;;  %v1426_v6 = vrot.slane %v8700_v27, 4  ;;  %v1291_v55 = vperm.slane %v1285_v46, %v8321_v42 }
 0x1b1   : > { %11196 = vst [vmem:[#allocation31_spill] sm:$0xff] %v8770_v13  ;;  %v1424_v17 = vrot.slane %v1423_v7, 4  ;;  %v1319_v3 = vperm.slane %v1313_v21, %v8321_v42  ;;  %v1397_v41 = vsel %vm800_vm2, %v1396_v36, %v8674_v18  ;;  %v1298_v36 = vrot.slane %v8729_v52, 4 }
 0x1b2   : > { %v685_v57 = vpop.permute.xlu2 %684  ;;  %11198 = vst [vmem:[#allocation33_spill] sm:$0xff] %v8776_v62  ;;  %v8788_v37 = vpack.i.b16 %v2285_v16, %v2284_v63  ;;  %v1508_v62 = vshrl.u32 %v1291_v55, 16  ;;  %v1524_v63 = vshrl.u32 %v8729_v52, 16 }
 0x1b3   : > { %758 = vst.msk [vmem:[#allocation2 + $0x5c] sm:$0xf] %vm734_vm3, %v685_v57  ;;  %v11199_v57 = vrot.slane %v8674_v18, 4  ;;  %v1506_v47 = vpack.i.b16 %v1319_v3, %v1291_v55  ;;  %v1509_v46 = vshrl.u32 %v1319_v3, 16  ;;  %v1324_v16 = vrot.slane %v1319_v3, 4 }
 0x1b4   : > { %1182 = vst.msk [vmem:[#allocation4 + $0x78] sm:$0xf] %vm734_vm3, %v1086_v51  ;;  %v1427_v51 = vsel %vm800_vm2, %v1423_v7, %v1426_v6  ;;  %v1525_v18 = vshrl.u32 %v1323_v20, 16  ;;  %v1425_v7 = vsel %vm800_vm2, %v1424_v17, %v8700_v27 }
 0x1b5   : > { %v1399_v38 = vsel %vm800_vm2, %v1395_v8, %v11199_v57  ;;  %11200 = vst [vmem:[#allocation34_spill] sm:$0xff] %v8788_v37  ;;  %v1522_v8 = vpack.i.b16 %v1323_v20, %v8729_v52  ;;  %v1296_v57 = vrot.slane %v1291_v55, 4  ;;  %v1510_v6 = vpack.i.b16 %v1509_v46, %v1508_v62 }
 0x1b6   : > { %v8795_v59 = vperm.slane %v1399_v38, %v8321_v42  ;;  %v1435_v38 = vperm.slane %v1427_v51, %v8321_v42  ;;  %1569 = vst.msk [vmem:[#allocation5 + $0x4] sm:$0xf] %vm573_vm1, %v1506_v47  ;;  %v1326_v55 = vrot.slane %v1323_v20, 4  ;;  %v1526_v37 = vpack.i.b16 %v1525_v18, %v1524_v63 }
 0x1b7   : > { %1577 = vst.msk [vmem:[#allocation5 + $0x24] sm:$0xf] %vm573_vm1, %v1522_v8  ;;  %v1297_v21 = vsel %vm800_vm2, 0, %v1296_v57  ;;  %v1325_v8 = vsel %vm800_vm2, 0, %v1324_v16  ;;  %v1403_v57 = vperm.slane %v1397_v41, %v8321_v42  ;;  %v1431_v20 = vperm.slane %v1425_v7, %v8321_v42 }
 0x1b8   : > { %1571 = vst.msk [vmem:[#allocation5 + $0xc] sm:$0xf] %vm573_vm1, %v1510_v6  ;;  %v1514_v3 = vpack.i.b16 %v1325_v8, %v1297_v21  ;;  %v1516_v52 = vshrl.u32 %v1297_v21, 16  ;;  %v1517_v13 = vshrl.u32 %v1325_v8, 16  ;;  %v1327_v27 = vsel %vm800_vm2, 0, %v1326_v55 }
 0x1b9   : > { %1579 = vst.msk [vmem:[#allocation5 + $0x2c] sm:$0xf] %vm573_vm1, %v1526_v37  ;;  %v1533_v62 = vshrl.u32 %v1327_v27, 16  ;;  %v1540_v46 = vshrl.u32 %v1403_v57, 16  ;;  %v1408_v63 = vrot.slane %v1403_v57, 4  ;;  %v1538_v16 = vpack.i.b16 %v1431_v20, %v1403_v57 }
 0x1ba   : > { %v681_v34 = vpop.permute.xlu0 %680  ;;  %1573 = vst.msk [vmem:[#allocation5 + $0x14] sm:$0xf] %vm573_vm1, %v1514_v3  ;;  %v1518_v51 = vpack.i.b16 %v1517_v13, %v1516_v52  ;;  %v1541_v21 = vshrl.u32 %v1431_v20, 16  ;;  %v1436_v18 = vrot.slane %v1431_v20, 4  ;;  %v1556_v13 = vshrl.u32 %v8795_v59, 16 }
 0x1bb   : > { %756 = vst.msk [vmem:[#allocation2 + $0x54] sm:$0xf] %vm734_vm3, %v681_v34  ;;  %v1299_v34 = vsel %vm800_vm2, 0, %v1298_v36  ;;  %v1409_v37 = vsel %vm800_vm2, 0, %v1408_v63  ;;  %v1557_v55 = vshrl.u32 %v1435_v38, 16  ;;  %v1410_v3 = vrot.slane %v8795_v59, 4 }
 0x1bc   : > { %v1530_v17 = vpack.i.b16 %v1327_v27, %v1299_v34  ;;  %v1532_v47 = vshrl.u32 %v1299_v34, 16  ;;  %1575 = vst.msk [vmem:[#allocation5 + $0x1c] sm:$0xf] %vm573_vm1, %v1518_v51  ;;  %v1542_v6 = vpack.i.b16 %v1541_v21, %v1540_v46  ;;  %v1437_v7 = vsel %vm800_vm2, 0, %v1436_v18 }
 0x1bd   : > { %v1546_v8 = vpack.i.b16 %v1437_v7, %v1409_v37  ;;  %v1548_v34 = vshrl.u32 %v1409_v37, 16  ;;  %v1549_v57 = vshrl.u32 %v1437_v7, 16  ;;  %1585 = vst.msk [vmem:[#allocation5 + $0x44] sm:$0xf] %vm573_vm1, %v1538_v16  ;;  %v1554_v52 = vpack.i.b16 %v1435_v38, %v8795_v59 }
 0x1be   : > { %1581 = vst.msk [vmem:[#allocation5 + $0x34] sm:$0xf] %vm573_vm1, %v1530_v17  ;;  %v1534_v41 = vpack.i.b16 %v1533_v62, %v1532_v47  ;;  %v1438_v27 = vrot.slane %v1435_v38, 4  ;;  %v1558_v47 = vpack.i.b16 %v1557_v55, %v1556_v13  ;;  %v1411_v62 = vsel %vm800_vm2, 0, %v1410_v3 }
 0x1bf   : > { %1587 = vst.msk [vmem:[#allocation5 + $0x4c] sm:$0xf] %vm573_vm1, %v1542_v6  ;;  %v1550_v17 = vpack.i.b16 %v1549_v57, %v1548_v34  ;;  %v1564_v46 = vshrl.u32 %v1411_v62, 16  ;;  %v1905_v6 = vadd.f32 %v8614_v44, %v8452_v56  ;;  %v1910_v7 = vadd.f32 %v8614_v44, %v8483_v54 }
 0x1c0   : > { %1583 = vst.msk [vmem:[#allocation5 + $0x3c] sm:$0xf] %vm573_vm1, %v1534_v41  ;;  %v1439_v20 = vsel %vm800_vm2, 0, %v1438_v27  ;;  %v1895_v57 = vadd.f32 %v8614_v44, %v8347_v12  ;;  %v783_v27 = vld [vmem:[#allocation2 + $0x40] sm:$0xf]  ;;  %v2057_v56 = vrot.slane %v8634_v58, 4 }
 0x1c1   : > { %1589 = vst.msk [vmem:[#allocation5 + $0x54] sm:$0xf] %vm573_vm1, %v1546_v8  ;;  %v1562_v51 = vpack.i.b16 %v1439_v20, %v1411_v62  ;;  %v1565_v63 = vshrl.u32 %v1439_v20, 16  ;;  %v8846_v3 = vpack.c.bf16 %v1905_v6, %v1905_v6  ;;  %v2029_v62 = vrot.slane %v8562_v10, 4 }
 0x1c2   : > { %v683_v36 = vpop.permute.xlu1 %682  ;;  %1591 = vst.msk [vmem:[#allocation5 + $0x5c] sm:$0xf] %vm573_vm1, %v1550_v17  ;;  %v787_v17 = vld [vmem:[#allocation2 + $0x50] sm:$0xf]  ;;  %v788_v12 = vld [vmem:[#allocation2 + $0x54] sm:$0xf]  ;;  %v8859_v10 = vpack.c.bf16 %v1895_v57, %v1895_v57 }
 0x1c3   : > { %757 = vst.msk [vmem:[#allocation2 + $0x58] sm:$0xf] %vm734_vm3, %v683_v36  ;;  %v1566_v59 = vpack.i.b16 %v1565_v63, %v1564_v46  ;;  %v1900_v46 = vadd.f32 %v8614_v44, %v8413_v1  ;;  %v2030_v58 = vsel %vm800_vm2, %v2029_v62, %v8846_v3  ;;  %v2023_v1 = vrot.slane %v8500_v24, 4 }
 0x1c4   : > { %1593 = vst.msk [vmem:[#allocation5 + $0x64] sm:$0xf] %vm573_vm1, %v1554_v52  ;;  %v8848_v52 = vpack.c.bf16 %v1910_v7, %v1910_v7  ;;  %v784_v7 = vld [vmem:[#allocation2 + $0x44] sm:$0xf] }
 0x1c5   : > { %1595 = vst.msk [vmem:[#allocation5 + $0x6c] sm:$0xf] %vm573_vm1, %v1558_v47 }
 0x1c6   : > { %1597 = vst.msk [vmem:[#allocation5 + $0x74] sm:$0xf] %vm573_vm1, %v1562_v51 }
 0x1c7   : > { %1599 = vst.msk [vmem:[#allocation5 + $0x7c] sm:$0xf] %vm573_vm1, %v1566_v59 }
 0x1c8   : > { %11201 = vst [vmem:[#allocation35_spill] sm:$0xff] %v8846_v3 }
 0x1c9   : > { %11202 = vst [vmem:[#allocation36_spill] sm:$0xff] %v8848_v52 }
 0x1ca   : > { %v691_v41 = vpop.permute.xlu2 %690  ;;  %11203 = vst [vmem:[#allocation37_spill] sm:$0xff] %v8859_v10 }
 0x1cb   : > { %761 = vst.msk [vmem:[#allocation2 + $0x68] sm:$0xf] %vm734_vm3, %v691_v41 }
 0x1d2   : > { %v687_v38 = vpop.permute.xlu0 %686  ;;  %v793_v63 = vld [vmem:[#allocation2 + $0x68] sm:$0xf] }
 0x1d3   : > { %759 = vst.msk [vmem:[#allocation2 + $0x60] sm:$0xf] %vm734_vm3, %v687_v38 }
 0x1da   : > { %v689_v16 = vpop.permute.xlu1 %688  ;;  %v791_v37 = vld [vmem:[#allocation2 + $0x60] sm:$0xf] }
 0x1db   : > { %760 = vst.msk [vmem:[#allocation2 + $0x64] sm:$0xf] %vm734_vm3, %v689_v16  ;;  %v856_v13 = vrot.slane %v791_v37, 4  ;;  %v884_v37 = vrot.slane %v793_v63, 4 }
 0x1dd   : > { %v857_v54 = vsel %vm800_vm2, %v856_v13, %v783_v27 }
 0x1de   : > { %v861_v59 = vperm.slane %v857_v54, %v8273_v49 }
 0x1e0   : > { %v870_v57 = vrot.slane %v861_v59, 4 }
 0x1e2   : > { %v697_v21 = vpop.permute.xlu2 %696  ;;  %v792_v20 = vld [vmem:[#allocation2 + $0x64] sm:$0xf] }
 0x1e3   : > { %764 = vst.msk [vmem:[#allocation2 + $0x74] sm:$0xf] %vm734_vm3, %v697_v21  ;;  %v968_v38 = vrot.slane %v792_v20, 4  ;;  %v2058_v21 = vsel %vm800_vm2, %v2057_v56, %v8848_v52 }
 0x1e5   : > { %v969_v27 = vsel %vm800_vm2, %v968_v38, %v784_v7 }
 0x1e6   : > { %v973_v54 = vperm.slane %v969_v27, %v8273_v49 }
 0x1ea   : > { %v693_v18 = vpop.permute.xlu0 %692  ;;  %v796_v55 = vld [vmem:[#allocation2 + $0x74] sm:$0xf] }
 0x1eb   : > { %762 = vst.msk [vmem:[#allocation2 + $0x6c] sm:$0xf] %vm734_vm3, %v693_v18  ;;  %v974_v47 = vrot.slane %v796_v55, 4  ;;  %v8865_v18 = vpack.c.bf16 %v1900_v46, %v1900_v46 }
 0x1ed   : > { %v975_v16 = vsel %vm800_vm2, %v974_v47, %v788_v12  ;;  %11204 = vst [vmem:[#allocation38_spill] sm:$0xff] %v8865_v18 }
 0x1ee   : > { %v979_v13 = vperm.slane %v975_v16, %v8273_v49 }
 0x1f0   : > { %v980_v20 = vrot.slane %v979_v13, 4 }
 0x1f2   : > { %v695_v36 = vpop.permute.xlu1 %694  ;;  %v794_v24 = vld [vmem:[#allocation2 + $0x6c] sm:$0xf] }
 0x1f3   : > { %763 = vst.msk [vmem:[#allocation2 + $0x70] sm:$0xf] %vm734_vm3, %v695_v36  ;;  %v2051_v36 = vrot.slane %v8518_v22, 4  ;;  %v2024_v22 = vsel %vm800_vm2, %v2023_v1, %v8859_v10 }
 0x1f5   : > { %v2052_v47 = vsel %vm800_vm2, %v2051_v36, %v8865_v18 }
 0x1fa   : > { %v795_v8 = vld [vmem:[#allocation2 + $0x70] sm:$0xf] }
 0x1fb   : > { %v862_v34 = vrot.slane %v795_v8, 4  ;;  %v8872_v8 = vperm.slane %v2030_v58, %v8273_v49  ;;  %v8891_v58 = vperm.slane %v2024_v22, %v8273_v49 }
 0x1fd   : > { %v863_v51 = vsel %vm800_vm2, %v862_v34, %v787_v17  ;;  %v8875_v34 = vperm.slane %v2058_v21, %v8273_v49  ;;  %v785_v17 = vld [vmem:[#allocation2 + $0x48] sm:$0xf]  ;;  %v2035_v12 = vrot.slane %v8872_v8, 4  ;;  %v8894_v21 = vperm.slane %v2052_v47, %v8273_v49 }
 0x1fe   : > { %v867_v41 = vperm.slane %v863_v51, %v8273_v49  ;;  %v885_v62 = vsel %vm800_vm2, %v884_v37, %v785_v17  ;;  %v996_v51 = vrot.slane %v794_v24, 4 }
 0x1ff   : > { %v2063_v63 = vrot.slane %v8875_v34, 4  ;;  %v889_v38 = vperm.slane %v885_v62, %v8273_v49  ;;  %v2036_v27 = vsel %vm800_vm2, %v2035_v12, %v8891_v58 }
 0x200   : > { %v868_v55 = vrot.slane %v867_v41, 4  ;;  %v871_v56 = vsel %vm800_vm2, %v867_v41, %v870_v57  ;;  %v786_v41 = vld [vmem:[#allocation2 + $0x4c] sm:$0xf]  ;;  %v789_v57 = vld [vmem:[#allocation2 + $0x58] sm:$0xf] }
 0x201   : > { %v879_v16 = vperm.slane %v871_v56, %v8321_v42  ;;  %v2064_v24 = vsel %vm800_vm2, %v2063_v63, %v8894_v21  ;;  %v898_v17 = vrot.slane %v889_v38, 4 }
 0x202   : > { %v699_v6 = vpop.permute.xlu0 %698  ;;  %v869_v46 = vsel %vm800_vm2, %v868_v55, %v861_v59  ;;  %v982_v59 = vrot.slane %v973_v54, 4  ;;  %v981_v55 = vsel %vm800_vm2, %v980_v20, %v973_v54  ;;  %v8916_v63 = vperm.slane %v2064_v24, %v8321_v42 }
 0x203   : > { %765 = vst.msk [vmem:[#allocation2 + $0x78] sm:$0xf] %vm734_vm3, %v699_v6  ;;  %v875_v37 = vperm.slane %v869_v46, %v8321_v42  ;;  %v997_v6 = vsel %vm800_vm2, %v996_v51, %v786_v41  ;;  %v882_v62 = vrot.slane %v879_v16, 4  ;;  %v8909_v54 = vperm.slane %v981_v55, %v8321_v42 }
 0x204   : > { %v983_v22 = vsel %vm800_vm2, %v979_v13, %v982_v59  ;;  %v1001_v56 = vperm.slane %v997_v6, %v8273_v49  ;;  %v8913_v41 = vperm.slane %v2036_v27, %v8321_v42 }
 0x205   : > { %v880_v46 = vrot.slane %v875_v37, 4  ;;  %v1092_v52 = vshrl.u32 %v875_v37, 16 }
 0x206   : > { %v1010_v59 = vrot.slane %v1001_v56, 4 }
 0x207   : > { %v881_v55 = vsel %vm800_vm2, 0, %v880_v46 }
 0x208   : > { %v1100_v46 = vshrl.u32 %v881_v55, 16 }
 0x20a   : > { %v797_v1 = vld [vmem:[#allocation2 + $0x78] sm:$0xf]  ;;  %v701_v36 = vpop.permute.xlu1 %700 }
 0x20b   : > { %v890_v7 = vrot.slane %v797_v1, 4  ;;  %766 = vst.msk [vmem:[#allocation2 + $0x7c] sm:$0xf] %vm734_vm3, %v701_v36  ;;  %v883_v1 = vsel %vm800_vm2, 0, %v882_v62  ;;  %v991_v36 = vperm.slane %v983_v22, %v8321_v42 }
 0x20c   : > { %v1116_v62 = vshrl.u32 %v883_v1, 16 }
 0x20d   : > { %v891_v47 = vsel %vm800_vm2, %v890_v7, %v789_v57  ;;  %v992_v57 = vrot.slane %v8909_v54, 4 }
 0x20e   : > { %v895_v51 = vperm.slane %v891_v47, %v8273_v49 }
 0x210   : > { %v896_v20 = vrot.slane %v895_v51, 4  ;;  %v899_v12 = vsel %vm800_vm2, %v895_v51, %v898_v17  ;;  %v790_v51 = vld [vmem:[#allocation2 + $0x5c] sm:$0xf] }
 0x211   : > { %v907_v13 = vperm.slane %v899_v12, %v8321_v42  ;;  %v1108_v12 = vshrl.u32 %v879_v16, 16 }
 0x212   : > { %v798_v6 = vld [vmem:[#allocation2 + $0x7c] sm:$0xf]  ;;  %v897_v7 = vsel %vm800_vm2, %v896_v20, %v889_v38 }
 0x213   : > { %v1002_v17 = vrot.slane %v798_v6, 4  ;;  %v903_v27 = vperm.slane %v897_v7, %v8321_v42  ;;  %v1106_v47 = vpack.i.b16 %v907_v13, %v879_v16  ;;  %v1109_v24 = vshrl.u32 %v907_v13, 16 }
 0x214   : > { %v910_v3 = vrot.slane %v907_v13, 4 }
 0x215   : > { %v1003_v22 = vsel %vm800_vm2, %v1002_v17, %v790_v51  ;;  %v1090_v18 = vpack.i.b16 %v903_v27, %v875_v37  ;;  %v1093_v10 = vshrl.u32 %v903_v27, 16  ;;  %v908_v29 = vrot.slane %v903_v27, 4  ;;  %1161 = vst.msk [vmem:[#allocation4 + $0x24] sm:$0xf] %vm734_vm3, %v1106_v47 }
 0x216   : > { %v1007_v38 = vperm.slane %v1003_v22, %v8273_v49  ;;  %v1110_v20 = vpack.i.b16 %v1109_v24, %v1108_v12  ;;  %v911_v6 = vsel %vm800_vm2, 0, %v910_v3 }
 0x217   : > { %1153 = vst.msk [vmem:[#allocation4 + $0x4] sm:$0xf] %vm734_vm3, %v1090_v18  ;;  %v1094_v7 = vpack.i.b16 %v1093_v10, %v1092_v52  ;;  %v909_v16 = vsel %vm800_vm2, 0, %v908_v29  ;;  %v1114_v13 = vpack.i.b16 %v911_v6, %v883_v1  ;;  %v1117_v31 = vshrl.u32 %v911_v6, 16 }
 0x218   : > { %v1008_v35 = vrot.slane %v1007_v38, 4  ;;  %v1011_v37 = vsel %vm800_vm2, %v1007_v38, %v1010_v59  ;;  %v1098_v17 = vpack.i.b16 %v909_v16, %v881_v55  ;;  %v1101_v27 = vshrl.u32 %v909_v16, 16  ;;  %1163 = vst.msk [vmem:[#allocation4 + $0x2c] sm:$0xf] %vm734_vm3, %v1110_v20 }
 0x219   : > { %1155 = vst.msk [vmem:[#allocation4 + $0xc] sm:$0xf] %vm734_vm3, %v1094_v7  ;;  %v1118_v47 = vpack.i.b16 %v1117_v31, %v1116_v62  ;;  %v1019_v24 = vperm.slane %v1011_v37, %v8321_v42  ;;  %v994_v29 = vrot.slane %v991_v36, 4  ;;  %v2242_v10 = vshrl.u32 %v8913_v41, 16 }
 0x21a   : > { %1157 = vst.msk [vmem:[#allocation4 + $0x14] sm:$0xf] %vm734_vm3, %v1098_v17  ;;  %v1102_v3 = vpack.i.b16 %v1101_v27, %v1100_v46  ;;  %v1009_v52 = vsel %vm800_vm2, %v1008_v35, %v1001_v56  ;;  %v2243_v18 = vshrl.u32 %v8916_v63, 16  ;;  %v993_v31 = vsel %vm800_vm2, 0, %v992_v57 }
 0x21b   : > { %1165 = vst.msk [vmem:[#allocation4 + $0x34] sm:$0xf] %vm734_vm3, %v1114_v13  ;;  %v1015_v1 = vperm.slane %v1009_v52, %v8321_v42  ;;  %v1138_v59 = vpack.i.b16 %v1019_v24, %v991_v36  ;;  %v1140_v55 = vshrl.u32 %v991_v36, 16  ;;  %v1141_v51 = vshrl.u32 %v1019_v24, 16 }
 0x21c   : > { %1159 = vst.msk [vmem:[#allocation4 + $0x1c] sm:$0xf] %vm734_vm3, %v1102_v3  ;;  %v1124_v56 = vshrl.u32 %v8909_v54, 16  ;;  %v2241_v38 = vpack.i.b16 %v8916_v63, %v8913_v41  ;;  %v995_v20 = vsel %vm800_vm2, 0, %v994_v29  ;;  %v1022_v57 = vrot.slane %v1019_v24, 4 }
 0x21d   : > { %1167 = vst.msk [vmem:[#allocation4 + $0x3c] sm:$0xf] %vm734_vm3, %v1118_v47  ;;  %v1122_v35 = vpack.i.b16 %v1015_v1, %v8909_v54  ;;  %v1125_v12 = vshrl.u32 %v1015_v1, 16  ;;  %v1020_v62 = vrot.slane %v1015_v1, 4  ;;  %v1142_v46 = vpack.i.b16 %v1141_v51, %v1140_v55 }
 0x21e   : > { %v7609_v22 = vld [vmem:[#allocation4] sm:$0xff]  ;;  %1177 = vst.msk [vmem:[#allocation4 + $0x64] sm:$0xf] %vm734_vm3, %v1138_v59  ;;  %v2244_v36 = vpack.i.b16 %v2243_v18, %v2242_v10  ;;  %v1132_v16 = vshrl.u32 %v993_v31, 16  ;;  %v1023_v27 = vsel %vm800_vm2, 0, %v1022_v57  ;;  %v1148_v3 = vshrl.u32 %v995_v20, 16 }
 0x21f   : > { %1169 = vst.msk [vmem:[#allocation4 + $0x44] sm:$0xf] %vm734_vm3, %v1122_v35  ;;  %v1126_v6 = vpack.i.b16 %v1125_v12, %v1124_v56  ;;  %v1021_v7 = vsel %vm800_vm2, 0, %v1020_v62  ;;  %v2332_v54 = vsel %vm2327_vm4, %v7609_v22, 0  ;;  %v1146_v24 = vpack.i.b16 %v1023_v27, %v995_v20  ;;  %v7613_v35 = vld [vmem:[#allocation4 + $0x20] sm:$0xff]  ;;  %v7614_v20 = vld [vmem:[#allocation4 + $0x28] sm:$0xff] }
 0x220   : > { %v7610_v13 = vld [vmem:[#allocation4 + $0x8] sm:$0xff]  ;;  %v1130_v37 = vpack.i.b16 %v1021_v7, %v993_v31  ;;  %v1133_v17 = vshrl.u32 %v1021_v7, 16  ;;  %1179 = vst.msk [vmem:[#allocation4 + $0x6c] sm:$0xf] %vm734_vm3, %v1142_v46  ;;  %2341 = vmatpush.bf16.xpose.msra.mxu2 %v2332_v54  ;;  %v1149_v52 = vshrl.u32 %v1023_v27, 16  ;;  %v2320_v10 = vunpack.c.l.b16 %v2241_v38 }
 0x221   : > { %v7611_v47 = vld [vmem:[#allocation4 + $0x10] sm:$0xff]  ;;  %1171 = vst.msk [vmem:[#allocation4 + $0x4c] sm:$0xf] %vm734_vm3, %v1126_v6  ;;  %v2360_v29 = vsel %vm2327_vm4, %v7610_v13, 0  ;;  %v11205_v55 = vpack.i.b16 %v8338_v61, %v8329_v53  ;;  %v2349_v56 = vunpack.c.l.b16 %v2244_v36  ;;  %v2047_v62 = vrot.slane %v8913_v41, 4 }
 0x222   : > { %1173 = vst.msk [vmem:[#allocation4 + $0x54] sm:$0xf] %vm734_vm3, %v1130_v37  ;;  %v1134_v18 = vpack.i.b16 %v1133_v17, %v1132_v16  ;;  %2369 = vmatpush.bf16.xpose.msra.mxu3 %v2360_v29  ;;  %v2388_v1 = vsel %vm2327_vm4, %v7611_v47, 0  ;;  %v1150_v31 = vpack.i.b16 %v1149_v52, %v1148_v3  ;;  %v2075_v22 = vrot.slane %v8916_v63, 4  ;;  %v7615_v27 = vld [vmem:[#allocation4 + $0x30] sm:$0xff] }
 0x223   : > { %v7612_v59 = vld [vmem:[#allocation4 + $0x18] sm:$0xff]  ;;  %1181 = vst.msk [vmem:[#allocation4 + $0x74] sm:$0xf] %vm734_vm3, %v1146_v24  ;;  %v2319_v51 = vunpack.c.l.b16 %v11205_v55  ;;  %v2348_v46 = vunpack.c.l.b16 %v8363_v32  ;;  %v2444_v53 = vsel %vm2327_vm4, %v7613_v35, 0  ;;  %v2048_v57 = vsel %vm800_vm2, 0, %v2047_v62 }
 0x224   : > { %1175 = vst.msk [vmem:[#allocation4 + $0x5c] sm:$0xf] %vm734_vm3, %v1134_v18  ;;  %v2416_v12 = vsel %vm2327_vm4, %v7612_v59, 0  ;;  %v2076_v36 = vsel %vm800_vm2, 0, %v2075_v22  ;;  %v2472_v41 = vsel %vm2327_vm4, %v7614_v20, 0  ;;  %v2248_v63 = vshrl.u32 %v2048_v57, 16 }
 0x225   : > { %1183 = vst.msk [vmem:[#allocation4 + $0x7c] sm:$0xf] %vm734_vm3, %v1150_v31  ;;  %v2321_v38 = vpack.c.b16 %v2320_v10, %v2319_v51  ;;  %v2350_v61 = vpack.c.b16 %v2349_v56, %v2348_v46  ;;  %v2249_v6 = vshrl.u32 %v2076_v36, 16  ;;  %v2247_v7 = vpack.i.b16 %v2076_v36, %v2048_v57  ;;  %v7616_v10 = vld [vmem:[#allocation4 + $0x38] sm:$0xff] }
 0x226   : > { %v2037_v16 = vrot.slane %v8891_v58, 4  ;;  %v2065_v54 = vrot.slane %v8894_v21, 4  ;;  %v11206_v37 = vpack.i.b16 %v8366_v33, %v8361_v26  ;;  %v2404_v29 = vunpack.c.l.b16 %v8387_v0  ;;  %v7617_v56 = vld [vmem:[#allocation4 + $0x40] sm:$0xff] }
 0x227   : > { %7219 = vmatmul.msk.bf16.vlgmr.msra.gmra.mxu2 %vm2327_vm4, %v2321_v38  ;;  %v2250_v32 = vpack.i.b16 %v2249_v6, %v2248_v63  ;;  %v2377_v13 = vunpack.c.l.b16 %v2247_v7  ;;  %v2500_v26 = vsel %vm2327_vm4, %v7615_v27, 0  ;;  %v1867_v31 = vadd.f32 %v8614_v44, %v8205_v50 }
 0x228   : > { %2397 = vmatpush.bf16.xpose.msrb.mxu2 %v2388_v1  ;;  %v2376_v17 = vunpack.c.l.b16 %v11206_v37  ;;  %v2038_v24 = vsel %vm800_vm2, %v8872_v8, %v2037_v16  ;;  %v2066_v3 = vsel %vm800_vm2, %v8875_v34, %v2065_v54  ;;  %v2528_v8 = vsel %vm2327_vm4, %v7616_v10, 0  ;;  %v7618_v20 = vld [vmem:[#allocation4 + $0x48] sm:$0xff] }
 0x229   : > { %7224 = vmatmul.msk.bf16.vlgmr.msra.gmra.mxu3 %vm2327_vm4, %v2350_v61  ;;  %v2405_v47 = vunpack.c.l.b16 %v2250_v32  ;;  %v2046_v58 = vperm.slane %v2038_v24, %v8321_v42  ;;  %v2074_v21 = vperm.slane %v2066_v3, %v8321_v42  ;;  %v1872_v55 = vadd.f32 %v8614_v44, %v8219_v60  ;;  %v7619_v10 = vld [vmem:[#allocation4 + $0x50] sm:$0xff] }
 0x22a   : > { %2425 = vmatpush.bf16.xpose.msrb.mxu3 %v2416_v12  ;;  %v2378_v52 = vpack.c.b16 %v2377_v13, %v2376_v17  ;;  %v11207_v51 = vpack.i.b16 %v8358_v25, %v8355_v23  ;;  %v2460_v46 = vunpack.c.l.b16 %v8393_v9  ;;  %v1862_v50 = vadd.f32 %v8614_v44, %v8191_v39 }
 0x22b   : > { %v2406_v33 = vpack.c.b16 %v2405_v47, %v2404_v29  ;;  %v2254_v34 = vshrl.u32 %v2046_v58, 16  ;;  %v2255_v18 = vshrl.u32 %v2074_v21, 16  ;;  %v2253_v1 = vpack.i.b16 %v2074_v21, %v2046_v58 }
 0x22c   : > { %v2432_v35 = vunpack.c.l.b16 %v11207_v51  ;;  %v2049_v62 = vrot.slane %v2046_v58, 4  ;;  %v2077_v22 = vrot.slane %v2074_v21, 4  ;;  %v9003_v61 = vpack.c.bf16 %v1867_v31, %v1867_v31 }
 0x22d   : > { %v2256_v0 = vpack.i.b16 %v2255_v18, %v2254_v34  ;;  %v2433_v59 = vunpack.c.l.b16 %v2253_v1  ;;  %v9005_v60 = vpack.c.bf16 %v1872_v55, %v1872_v55  ;;  %v2085_v23 = vrot.slane %v8296_v11, 4 }
 0x22e   : > { %v2113_v25 = vrot.slane %v8331_v45, 4  ;;  %v2556_v57 = vsel %vm2327_vm4, %v7617_v56, 0  ;;  %v2050_v36 = vsel %vm800_vm2, 0, %v2049_v62  ;;  %v2584_v39 = vsel %vm2327_vm4, %v7618_v20, 0 }
 0x22f   : > { %v2461_v12 = vunpack.c.l.b16 %v2256_v0  ;;  %v2434_v38 = vpack.c.b16 %v2433_v59, %v2432_v35  ;;  %v2079_v11 = vrot.slane %v8239_v14, 4  ;;  %v2107_v45 = vrot.slane %v8260_v40, 4 }
 0x230   : > { %2453 = vmatpush.bf16.xpose.msra.mxu2 %v2444_v53  ;;  %v1857_v53 = vadd.f32 %v8614_v44, %v8177_v28  ;;  %v2078_v28 = vsel %vm800_vm2, 0, %v2077_v22  ;;  %v2086_v63 = vsel %vm800_vm2, %v2085_v23, %v9003_v61  ;;  %v2114_v6 = vsel %vm800_vm2, %v2113_v25, %v9005_v60 }
 0x231   : > { %v2462_v9 = vpack.c.b16 %v2461_v12, %v2460_v46  ;;  %v2260_v7 = vshrl.u32 %v2050_v36, 16  ;;  %v2261_v32 = vshrl.u32 %v2078_v28, 16  ;;  %v2259_v16 = vpack.i.b16 %v2078_v28, %v2050_v36  ;;  %v7621_v12 = vld [vmem:[#allocation4 + $0x60] sm:$0xff]  ;;  %v7622_v46 = vld [vmem:[#allocation4 + $0x68] sm:$0xff] }
 0x232   : > { %2481 = vmatpush.bf16.xpose.msra.mxu3 %v2472_v41  ;;  %v9015_v44 = vpack.c.bf16 %v1857_v53, %v1857_v53  ;;  %v9017_v41 = vpack.c.bf16 %v1862_v50, %v1862_v50  ;;  %v9026_v54 = vperm.slane %v2086_v63, %v8273_v49  ;;  %v9029_v13 = vperm.slane %v2114_v6, %v8273_v49  ;;  %v7623_v6 = vld [vmem:[#allocation4 + $0x70] sm:$0xff] }
 0x233   : > { %v2262_v37 = vpack.i.b16 %v2261_v32, %v2260_v7  ;;  %v2489_v17 = vunpack.c.l.b16 %v2259_v16  ;;  %v2612_v18 = vsel %vm2327_vm4, %v7619_v10, 0  ;;  %v11209_v55 = vpack.i.b16 %v8695_v4, %v8692_v48  ;;  %v11211_v7 = vld [vmem:[#allocation30_spill] sm:$0xff] }
 0x234   : > { %v2080_v14 = vsel %vm800_vm2, %v2079_v11, %v9015_v44  ;;  %v2108_v40 = vsel %vm800_vm2, %v2107_v45, %v9017_v41  ;;  %v2091_v24 = vrot.slane %v9026_v54, 4  ;;  %v2119_v3 = vrot.slane %v9029_v13, 4 }
 0x235   : > { %v2084_v27 = vperm.slane %v2080_v14, %v8273_v49  ;;  %v2112_v47 = vperm.slane %v2108_v40, %v8273_v49  ;;  %v2517_v58 = vunpack.c.l.b16 %v2262_v37  ;;  %v2545_v51 = vunpack.c.l.b16 %v11209_v55  ;;  %v7624_v40 = vld [vmem:[#allocation4 + $0x78] sm:$0xff] }
 0x236   : > { %v2573_v62 = vunpack.c.l.b16 %v8733_v43  ;;  %v2668_v50 = vsel %vm2327_vm4, %v7621_v12, 0  ;;  %v2696_v48 = vsel %vm2327_vm4, %v7622_v46, 0  ;;  %v11210_v36 = vpack.i.b16 %v8743_v2, %v8740_v30  ;;  %v11217_v46 = vld [vmem:[#allocation32_spill] sm:$0xff] }
 0x237   : > { %7229 = vmatmul.msk.bf16.vlgmr.msrb.gmra.mxu2 %vm2327_vm4, %v2378_v52  ;;  %v11208_v52 = vpack.i.b16 %v8401_v19, %v8398_v15  ;;  %v2120_v34 = vsel %vm800_vm2, %v2119_v3, %v2112_v47  ;;  %v2093_v11 = vrot.slane %v2084_v27, 4  ;;  %v2121_v45 = vrot.slane %v2112_v47, 4 }
 0x238   : > { %2509 = vmatpush.bf16.xpose.msrb.mxu2 %v2500_v26  ;;  %v2516_v26 = vunpack.c.l.b16 %v8415_v5  ;;  %v2126_v15 = vperm.slane %v2120_v34, %v8321_v42  ;;  %v2601_v28 = vunpack.c.l.b16 %v11210_v36  ;;  %v2629_v32 = vunpack.c.l.b16 %v11211_v7  ;;  %v7578_v36 = vld [vmem:[#allocation2 + $0x18] sm:$0xff]  ;;  %v11221_v7 = vld [vmem:[#allocation15_spill] sm:$0xff] }
 0x239   : > { %7234 = vmatmul.msk.bf16.vlgmr.msrb.gmra.mxu3 %vm2327_vm4, %v2406_v33  ;;  %v2488_v29 = vunpack.c.l.b16 %v11208_v52  ;;  %v7620_v33 = vld [vmem:[#allocation4 + $0x58] sm:$0xff]  ;;  %v2094_v37 = vsel %vm800_vm2, %v9026_v54, %v2093_v11  ;;  %v2724_v30 = vsel %vm2327_vm4, %v7623_v6, 0  ;;  %v2872_v11 = vsel %vm2327_vm4, %v7578_v36, 0 }
 0x23a   : > { %2537 = vmatpush.bf16.xpose.msrb.mxu3 %v2528_v8  ;;  %v2092_v8 = vsel %vm800_vm2, %v2091_v24, %v2084_v27  ;;  %v2518_v1 = vpack.c.b16 %v2517_v58, %v2516_v26  ;;  %v2640_v19 = vsel %vm2327_vm4, %v7620_v33, 0  ;;  %v2219_v59 = vshrl.u32 %v2126_v15, 16  ;;  %v7575_v33 = vld [vmem:[#allocation2] sm:$0xff] }
 0x23b   : > { %v2490_v21 = vpack.c.b16 %v2489_v17, %v2488_v29  ;;  %v2098_v0 = vperm.slane %v2092_v8, %v8321_v42  ;;  %v2131_v53 = vrot.slane %v2126_v15, 4  ;;  %v2122_v17 = vsel %vm800_vm2, %v9029_v13, %v2121_v45  ;;  %v11212_v29 = vld [vmem:[#allocation29_spill] sm:$0xff]  ;;  %v11213_v13 = vld [vmem:[#allocation28_spill] sm:$0xff]  ;;  %v11215_v8 = vld [vmem:[#allocation31_spill] sm:$0xff] }
 0x23c   : > { %v2102_v27 = vperm.slane %v2094_v37, %v8321_v42  ;;  %v2130_v47 = vperm.slane %v2122_v17, %v8321_v42  ;;  %v2752_v24 = vsel %vm2327_vm4, %v7624_v40, 0  ;;  %v11214_v10 = vpack.i.b16 %v11212_v29, %v11213_v13  ;;  %v11220_v45 = vld [vmem:[#allocation11_spill] sm:$0xff]  ;;  %v11228_v13 = vld [vmem:[#allocation14_spill] sm:$0xff] }
 0x23d   : > { %v2218_v5 = vshrl.u32 %v2098_v0, 16  ;;  %v2217_v31 = vpack.i.b16 %v2126_v15, %v2098_v0  ;;  %v2103_v20 = vrot.slane %v2098_v0, 4  ;;  %v2132_v43 = vsel %vm800_vm2, 0, %v2131_v53  ;;  %v7576_v0 = vld [vmem:[#allocation2 + $0x8] sm:$0xff] }
 0x23e   : > { %v2230_v3 = vshrl.u32 %v2102_v27, 16  ;;  %v2231_v54 = vshrl.u32 %v2130_v47, 16  ;;  %v2229_v52 = vpack.i.b16 %v2130_v47, %v2102_v27  ;;  %v2657_v58 = vunpack.c.l.b16 %v11214_v10  ;;  %v7580_v17 = vld [vmem:[#allocation2 + $0x28] sm:$0xff] }
 0x23f   : > { %v2220_v35 = vpack.i.b16 %v2219_v59, %v2218_v5  ;;  %v2544_v56 = vunpack.c.l.b16 %v2217_v31  ;;  %v2104_v4 = vsel %vm800_vm2, 0, %v2103_v20  ;;  %v2685_v34 = vunpack.c.l.b16 %v11215_v8 }
 0x240   : > { %v2224_v25 = vshrl.u32 %v2104_v4, 16  ;;  %v2656_v26 = vunpack.c.l.b16 %v2229_v52  ;;  %v2105_v15 = vrot.slane %v2102_v27, 4  ;;  %v2782_v5 = vsel %vm2327_vm4, %v7575_v33, 0 }
 0x241   : > { %v2546_v22 = vpack.c.b16 %v2545_v51, %v2544_v56  ;;  %v2812_v31 = vsel %vm2327_vm4, %v7576_v0, 0  ;;  %v2771_v6 = vunpack.c.l.b16 %v9015_v44  ;;  %v2932_v44 = vsel %vm2327_vm4, %v7580_v17, 0 }
 0x242   : > { %v2106_v55 = vsel %vm800_vm2, 0, %v2105_v15  ;;  %v2830_v10 = vunpack.c.l.b16 %v11228_v13  ;;  %v2861_v8 = vunpack.c.l.b16 %v9005_v60 }
 0x243   : > { %v2236_v12 = vshrl.u32 %v2106_v55, 16 }
 0x247   : > { %7239 = vmatmul.msk.bf16.vlgmr.msra.gmra.mxu2 %vm2327_vm4, %v2434_v38  ;;  %v2572_v38 = vunpack.c.l.b16 %v2220_v35  ;;  %v3248_v35 = vlaneseq }
 0x248   : > { %2565 = vmatpush.bf16.xpose.msra.mxu2 %v2556_v57  ;;  %v2225_v57 = vshrl.u32 %v2132_v43, 16 }
 0x249   : > { %7244 = vmatmul.msk.bf16.vlgmr.msra.gmra.mxu3 %vm2327_vm4, %v2462_v9  ;;  %v2574_v23 = vpack.c.b16 %v2573_v62, %v2572_v38  ;;  %v2223_v9 = vpack.i.b16 %v2132_v43, %v2104_v4  ;;  %v9085_v56 = vshrl.u32 %v3248_v35, 7  ;;  %v11216_v38 = vld [vmem:[#allocation33_spill] sm:$0xff]  ;;  %v11219_v4 = vld [vmem:[#allocation34_spill] sm:$0xff]  ;;  %v9104_v40 = vand.u32 127, %v3248_v35 }
 0x24a   : > { %2593 = vmatpush.bf16.xpose.msra.mxu3 %v2584_v39  ;;  %v2226_v39 = vpack.i.b16 %v2225_v57, %v2224_v25  ;;  %v11218_v20 = vpack.i.b16 %v11216_v38, %v11217_v46  ;;  %v2741_v43 = vunpack.c.l.b16 %v11219_v4 }
 0x24b   : > { %v2600_v63 = vunpack.c.l.b16 %v2223_v9  ;;  %7704 = vset.pattern.permute.xlu0 %v9085_v56  ;;  %v9093_v25 = vadd.s32 8, %v9085_v56  ;;  %vm9110_vm5 = vcmp.eq.s32.totalorder %v9085_v56, %v9104_v40 }
 0x24c   : > { %v2628_v14 = vunpack.c.l.b16 %v2226_v39  ;;  %v2713_v53 = vunpack.c.l.b16 %v11218_v20  ;;  %v7583_v20 = vld [vmem:[#allocation2 + $0x40] sm:$0xff] }
 0x24d   : > { %v2602_v16 = vpack.c.b16 %v2601_v28, %v2600_v63  ;;  %7705 = vset.pattern.permute.xlu1 %v9093_v25  ;;  %v2770_v63 = vunpack.c.l.b16 %v11220_v45  ;;  %vm9130_vm7 = vcmp.eq.s32.totalorder %v9093_v25, %v9104_v40 }
 0x24e   : > { %v2630_v2 = vpack.c.b16 %v2629_v32, %v2628_v14  ;;  %v2800_v32 = vunpack.c.l.b16 %v11221_v7  ;;  %v7579_v14 = vld [vmem:[#allocation2 + $0x20] sm:$0xff] }
 0x24f   : > { %v2772_v37 = vpack.c.b16 %v2771_v6, %v2770_v63 }
 0x257   : > { %7249 = vmatmul.msk.bf16.vlgmr.msrb.gmra.mxu2 %vm2327_vm4, %v2490_v21  ;;  %v2232_v21 = vpack.i.b16 %v2231_v54, %v2230_v3 }
 0x258   : > { %2621 = vmatpush.bf16.xpose.msrb.mxu2 %v2612_v18  ;;  %v2658_v18 = vpack.c.b16 %v2657_v58, %v2656_v26  ;;  %v2831_v58 = vunpack.c.l.b16 %v9003_v61  ;;  %v11229_v26 = vld [vmem:[#allocation17_spill] sm:$0xff] }
 0x259   : > { %7254 = vmatmul.msk.bf16.vlgmr.msrb.gmra.mxu3 %vm2327_vm4, %v2518_v1  ;;  %v2684_v1 = vunpack.c.l.b16 %v2232_v21  ;;  %v2860_v33 = vunpack.c.l.b16 %v11229_v26  ;;  %v7582_v61 = vld [vmem:[#allocation2 + $0x38] sm:$0xff] }
 0x25a   : > { %2649 = vmatpush.bf16.xpose.msrb.mxu3 %v2640_v19  ;;  %v2133_v19 = vrot.slane %v2130_v47, 4  ;;  %v2832_v15 = vpack.c.b16 %v2831_v58, %v2830_v10 }
 0x25b   : > { %v2686_v59 = vpack.c.b16 %v2685_v34, %v2684_v1  ;;  %v2862_v60 = vpack.c.b16 %v2861_v8, %v2860_v33  ;;  %v11246_v33 = vld [vmem:[#allocation37_spill] sm:$0xff] }
 0x25c   : > { %v2134_v51 = vsel %vm800_vm2, 0, %v2133_v19  ;;  %v3010_v8 = vunpack.c.l.b16 %v11246_v33 }
 0x25d   : > { %v2237_v62 = vshrl.u32 %v2134_v51, 16 }
 0x267   : > { %7259 = vmatmul.msk.bf16.vlgmr.msra.gmra.mxu2 %vm2327_vm4, %v2546_v22  ;;  %v2235_v22 = vpack.i.b16 %v2134_v51, %v2106_v55 }
 0x268   : > { %2677 = vmatpush.bf16.xpose.msra.mxu2 %v2668_v50  ;;  %v2238_v50 = vpack.i.b16 %v2237_v62, %v2236_v12 }
 0x269   : > { %7264 = vmatmul.msk.bf16.vlgmr.msra.gmra.mxu3 %vm2327_vm4, %v2574_v23  ;;  %v2712_v23 = vunpack.c.l.b16 %v2235_v22 }
 0x26a   : > { %2705 = vmatpush.bf16.xpose.msra.mxu3 %v2696_v48  ;;  %v7577_v48 = vld [vmem:[#allocation2 + $0x10] sm:$0xff]  ;;  %v2740_v9 = vunpack.c.l.b16 %v2238_v50 }
 0x26b   : > { %v2714_v57 = vpack.c.b16 %v2713_v53, %v2712_v23  ;;  %v2842_v28 = vsel %vm2327_vm4, %v7577_v48, 0  ;;  %v7584_v48 = vld [vmem:[#allocation2 + $0x48] sm:$0xff] }
 0x26c   : > { %v2742_v39 = vpack.c.b16 %v2741_v43, %v2740_v9  ;;  %v11236_v43 = vld [vmem:[#allocation10_spill] sm:$0xff]  ;;  %v11237_v9 = vld [vmem:[#allocation12_spill] sm:$0xff]  ;;  %v3052_v36 = vsel %vm2327_vm4, %v7584_v48, 0 }
 0x277   : > { %7269 = vmatmul.msk.bf16.vlgmr.msrb.gmra.mxu2 %vm2327_vm4, %v2602_v16  ;;  %v2801_v16 = vunpack.c.l.b16 %v9017_v41 }
 0x278   : > { %2733 = vmatpush.bf16.xpose.msrb.mxu2 %v2724_v30 }
 0x279   : > { %7274 = vmatmul.msk.bf16.vlgmr.msrb.gmra.mxu3 %vm2327_vm4, %v2630_v2  ;;  %v2802_v30 = vpack.c.b16 %v2801_v16, %v2800_v32  ;;  %v2902_v2 = vsel %vm2327_vm4, %v7579_v14, 0  ;;  %v7585_v16 = vld [vmem:[#allocation2 + $0x50] sm:$0xff] }
 0x27a   : > { %2761 = vmatpush.bf16.xpose.msrb.mxu3 %v2752_v24 }
 0x287   : > { %7279 = vmatmul.msk.bf16.vlgmr.msra.gmra.mxu2 %vm2327_vm4, %v2658_v18  ;;  %v7581_v18 = vld [vmem:[#allocation2 + $0x30] sm:$0xff] }
 0x288   : > { %2791 = vmatpush.bf16.xpose.msra.mxu2 %v2782_v5 }
 0x289   : > { %7284 = vmatmul.msk.bf16.vlgmr.msra.gmra.mxu3 %vm2327_vm4, %v2686_v59  ;;  %v2962_v59 = vsel %vm2327_vm4, %v7581_v18, 0  ;;  %v11247_v18 = vld [vmem:[#allocation21_spill] sm:$0xff] }
 0x28a   : > { %2821 = vmatpush.bf16.xpose.msra.mxu3 %v2812_v31  ;;  %v2992_v31 = vsel %vm2327_vm4, %v7582_v61, 0 }
 0x297   : > { %7289 = vmatmul.msk.bf16.vlgmr.msrb.gmra.mxu2 %vm2327_vm4, %v2714_v57  ;;  %v3022_v57 = vsel %vm2327_vm4, %v7583_v20, 0 }
 0x298   : > { %2851 = vmatpush.bf16.xpose.msrb.mxu2 %v2842_v28 }
 0x299   : > { %7294 = vmatmul.msk.bf16.vlgmr.msrb.gmra.mxu3 %vm2327_vm4, %v2742_v39 }
 0x29a   : > { %2881 = vmatpush.bf16.xpose.msrb.mxu3 %v2872_v11 }
 0x2a7   : > { %7299 = vmatmul.msk.bf16.vlgmr.msra.gmra.mxu2 %vm2327_vm4, %v2772_v37 }
 0x2a8   : > { %2911 = vmatpush.bf16.xpose.msra.mxu2 %v2902_v2 }
 0x2a9   : > { %7304 = vmatmul.msk.bf16.vlgmr.msra.gmra.mxu3 %vm2327_vm4, %v2802_v30  ;;  %v7586_v30 = vld [vmem:[#allocation2 + $0x58] sm:$0xff] }
 0x2aa   : > { %2941 = vmatpush.bf16.xpose.msra.mxu3 %v2932_v44  ;;  %v2343_v41 = vpop.f32.mrf.mxu2  ;;  %v11242_v44 = vld [vmem:[#allocation16_spill] sm:$0xff] }
 0x2ab   : > { %v9118_v47 = vsel %vm9110_vm5, -1e+30, %v2343_v41  ;;  %v3082_v41 = vsel %vm2327_vm4, %v7585_v16, 0 }
 0x2ac   : > { %11224 = vst [vmem:[#allocation30_spill] sm:$0xff] %v9118_v47  ;;  %v2371_v24 = vpop.f32.mrf.mxu3  ;;  %v3292_v3 = vsel %vm3291_vm6, %v9118_v47, -inf }
 0x2ad   : > { %v9124_v54 = vsel %vm9110_vm5, -1e+30, %v2371_v24  ;;  %3293 = vmax.xlane.f32.xlu2 %v3292_v3  ;;  %v11243_v24 = vld [vmem:[#allocation19_spill] sm:$0xff]  ;;  %v3112_v3 = vsel %vm2327_vm4, %v7586_v30, 0  ;;  %v11257_v30 = vld [vmem:[#allocation26_spill] sm:$0xff] }
 0x2ae   : > { %11225 = vst [vmem:[#allocation29_spill] sm:$0xff] %v9124_v54  ;;  %v3298_v52 = vsel %vm3291_vm6, %v9124_v54, -inf  ;;  %v9523_v54 = vadd.s32 4294967288, %v9104_v40 }
 0x2af   : > { %3299 = vmax.xlane.f32.xlu1 %v3298_v52 }
 0x2b2   : > { %v2345_v21 = vpop.f32.mrf.mxu2 }
 0x2b3   : > { %v9140_v34 = vsel %vm9130_vm7, -1e+30, %v2345_v21 }
 0x2b4   : > { %11230 = vst [vmem:[#allocation28_spill] sm:$0xff] %v9140_v34  ;;  %v2373_v1 = vpop.f32.mrf.mxu3  ;;  %v3295_v0 = vsel %vm3291_vm6, %v9140_v34, -inf }
 0x2b5   : > { %3296 = vmax.xlane.f32.xlu0 %v3295_v0  ;;  %v9146_v19 = vsel %vm9130_vm7, -1e+30, %v2373_v1  ;;  %v3011_v1 = vunpack.c.l.b16 %v11247_v18 }
 0x2b6   : > { %11231 = vst [vmem:[#allocation31_spill] sm:$0xff] %v9146_v19  ;;  %v3301_v5 = vsel %vm3291_vm6, %v9146_v19, -inf }
 0x2b7   : > { %3302 = vmax.xlane.f32.xlu2 %v3301_v5  ;;  %7309 = vmatmul.msk.bf16.vlgmr.msrb.gmra.mxu2 %vm2327_vm4, %v2832_v15  ;;  %v11248_v15 = vld [vmem:[#allocation38_spill] sm:$0xff]  ;;  %v11249_v5 = vld [vmem:[#allocation25_spill] sm:$0xff] }
 0x2b8   : > { %2971 = vmatpush.bf16.xpose.msrb.mxu2 %v2962_v59  ;;  %v3040_v61 = vunpack.c.l.b16 %v11248_v15 }
 0x2b9   : > { %7314 = vmatmul.msk.bf16.vlgmr.msrb.gmra.mxu3 %vm2327_vm4, %v2862_v60  ;;  %v3041_v60 = vunpack.c.l.b16 %v11249_v5 }
 0x2ba   : > { %3001 = vmatpush.bf16.xpose.msrb.mxu3 %v2992_v31  ;;  %v2399_v55 = vpop.f32.mrf.mxu2  ;;  %v7587_v31 = vld [vmem:[#allocation2 + $0x60] sm:$0xff] }
 0x2bb   : > { %v9156_v51 = vsel %vm9110_vm5, -1e+30, %v2399_v55 }
 0x2bc   : > { %11232 = vst [vmem:[#allocation33_spill] sm:$0xff] %v9156_v51  ;;  %v2427_v35 = vpop.f32.mrf.mxu3  ;;  %v3304_v22 = vsel %vm3291_vm6, %v9156_v51, -inf }
 0x2bd   : > { %v9160_v12 = vsel %vm9110_vm5, -1e+30, %v2427_v35 }
 0x2be   : > { %11233 = vst [vmem:[#allocation32_spill] sm:$0xff] %v9160_v12  ;;  %v3310_v62 = vsel %vm3291_vm6, %v9160_v12, -inf }
 0x2bf   : > { %3311 = vmax.xlane.f32.xlu1 %v3310_v62  ;;  %3305 = vmax.xlane.f32.xlu2 %v3304_v22  ;;  %v3012_v62 = vpack.c.b16 %v3011_v1, %v3010_v8 }
 0x2c2   : > { %v2401_v38 = vpop.f32.mrf.mxu2 }
 0x2c3   : > { %v9168_v46 = vsel %vm9130_vm7, -1e+30, %v2401_v38  ;;  %v7588_v38 = vld [vmem:[#allocation2 + $0x68] sm:$0xff] }
 0x2c4   : > { %11234 = vst [vmem:[#allocation34_spill] sm:$0xff] %v9168_v46  ;;  %v2429_v53 = vpop.f32.mrf.mxu3  ;;  %v3307_v50 = vsel %vm3291_vm6, %v9168_v46, -inf  ;;  %v3172_v48 = vsel %vm2327_vm4, %v7588_v38, 0 }
 0x2c5   : > { %3308 = vmax.xlane.f32.xlu0 %v3307_v50  ;;  %v9174_v23 = vsel %vm9130_vm7, -1e+30, %v2429_v53  ;;  %v3042_v53 = vpack.c.b16 %v3041_v60, %v3040_v61  ;;  %v3142_v50 = vsel %vm2327_vm4, %v7587_v31, 0 }
 0x2c6   : > { %11235 = vst [vmem:[#allocation11_spill] sm:$0xff] %v9174_v23  ;;  %v3313_v4 = vsel %vm3291_vm6, %v9174_v23, -inf }
 0x2c7   : > { %7319 = vmatmul.msk.bf16.vlgmr.msra.gmra.mxu2 %vm2327_vm4, %v11236_v43  ;;  %3314 = vmax.xlane.f32.xlu2 %v3313_v4 }
 0x2c8   : > { %3031 = vmatpush.bf16.xpose.msra.mxu2 %v3022_v57 }
 0x2c9   : > { %7324 = vmatmul.msk.bf16.vlgmr.msra.gmra.mxu3 %vm2327_vm4, %v11237_v9 }
 0x2ca   : > { %3061 = vmatpush.bf16.xpose.msra.mxu3 %v3052_v36  ;;  %v2455_v28 = vpop.f32.mrf.mxu2 }
 0x2cb   : > { %v9186_v39 = vsel %vm9110_vm5, -1e+30, %v2455_v28 }
 0x2cc   : > { %11238 = vst [vmem:[#allocation15_spill] sm:$0xff] %v9186_v39  ;;  %v2483_v11 = vpop.f32.mrf.mxu3  ;;  %v3316_v45 = vsel %vm3291_vm6, %v9186_v39, -inf }
 0x2cd   : > { %v9192_v63 = vsel %vm9110_vm5, -1e+30, %v2483_v11  ;;  %3317 = vmax.xlane.f32.xlu0 %v3316_v45  ;;  %v11254_v11 = vld [vmem:[#allocation35_spill] sm:$0xff] }
 0x2ce   : > { %11239 = vst [vmem:[#allocation14_spill] sm:$0xff] %v9192_v63  ;;  %v3322_v6 = vsel %vm3291_vm6, %v9192_v63, -inf  ;;  %v3070_v45 = vunpack.c.l.b16 %v11254_v11 }
 0x2cf   : > { %3323 = vmax.xlane.f32.xlu2 %v3322_v6  ;;  %v11255_v6 = vld [vmem:[#allocation23_spill] sm:$0xff] }
 0x2d2   : > { %v2457_v7 = vpop.f32.mrf.mxu2 }
 0x2d3   : > { %v9198_v32 = vsel %vm9130_vm7, -1e+30, %v2457_v7  ;;  %v3071_v7 = vunpack.c.l.b16 %v11255_v6 }
 0x2d4   : > { %11240 = vst [vmem:[#allocation17_spill] sm:$0xff] %v9198_v32  ;;  %v2485_v14 = vpop.f32.mrf.mxu3  ;;  %v3319_v37 = vsel %vm3291_vm6, %v9198_v32, -inf }
 0x2d5   : > { %3320 = vmax.xlane.f32.xlu1 %v3319_v37  ;;  %v9204_v17 = vsel %vm9130_vm7, -1e+30, %v2485_v14  ;;  %v11256_v14 = vld [vmem:[#allocation36_spill] sm:$0xff] }
 0x2d6   : > { %11241 = vst [vmem:[#allocation10_spill] sm:$0xff] %v9204_v17  ;;  %v3325_v2 = vsel %vm3291_vm6, %v9204_v17, -inf  ;;  %v3100_v37 = vunpack.c.l.b16 %v11256_v14 }
 0x2d7   : > { %7329 = vmatmul.msk.bf16.vlgmr.msrb.gmra.mxu2 %vm2327_vm4, %v11242_v44  ;;  %3326 = vmax.xlane.f32.xlu0 %v3325_v2  ;;  %v3101_v2 = vunpack.c.l.b16 %v11257_v30 }
 0x2d8   : > { %3091 = vmatpush.bf16.xpose.msrb.mxu2 %v3082_v41  ;;  %v7589_v41 = vld [vmem:[#allocation2 + $0x70] sm:$0xff] }
 0x2d9   : > { %7334 = vmatmul.msk.bf16.vlgmr.msrb.gmra.mxu3 %vm2327_vm4, %v11243_v24  ;;  %v3102_v33 = vpack.c.b16 %v3101_v2, %v3100_v37  ;;  %v3202_v8 = vsel %vm2327_vm4, %v7589_v41, 0  ;;  %v7597_v2 = vld [vmem:[#allocation3 + $0x30] sm:$0xff] }
 0x2da   : > { %3121 = vmatpush.bf16.xpose.msrb.mxu3 %v3112_v3  ;;  %v2511_v52 = vpop.f32.mrf.mxu2 }
 0x2db   : > { %v9216_v13 = vsel %vm9110_vm5, -1e+30, %v2511_v52  ;;  %v3072_v52 = vpack.c.b16 %v3071_v7, %v3070_v45 }
 0x2dc   : > { %11244 = vst [vmem:[#allocation12_spill] sm:$0xff] %v9216_v13  ;;  %v2539_v10 = vpop.f32.mrf.mxu3  ;;  %v3328_v58 = vsel %vm3291_vm6, %v9216_v13, -inf }
 0x2dd   : > { %v9222_v21 = vsel %vm9110_vm5, -1e+30, %v2539_v10  ;;  %3329 = vmax.xlane.f32.xlu1 %v3328_v58  ;;  %v7590_v58 = vld [vmem:[#allocation2 + $0x78] sm:$0xff] }
 0x2de   : > { %11245 = vst [vmem:[#allocation16_spill] sm:$0xff] %v9222_v21  ;;  %v3334_v26 = vsel %vm3291_vm6, %v9222_v21, -inf  ;;  %v3232_v18 = vsel %vm2327_vm4, %v7590_v58, 0 }
 0x2df   : > { %3335 = vmax.xlane.f32.xlu0 %v3334_v26 }
 0x2e2   : > { %v2513_v0 = vpop.f32.mrf.mxu2 }
 0x2e3   : > { %v9232_v59 = vsel %vm9130_vm7, -1e+30, %v2513_v0 }
 0x2e4   : > { %11250 = vst [vmem:[#allocation19_spill] sm:$0xff] %v9232_v59  ;;  %v2541_v55 = vpop.f32.mrf.mxu3  ;;  %v3331_v35 = vsel %vm3291_vm6, %v9232_v59, -inf }
 0x2e5   : > { %3332 = vmax.xlane.f32.xlu2 %v3331_v35  ;;  %v9238_v22 = vsel %vm9130_vm7, -1e+30, %v2541_v55 }
 0x2e6   : > { %11251 = vst [vmem:[#allocation37_spill] sm:$0xff] %v9238_v22  ;;  %v3337_v20 = vsel %vm3291_vm6, %v9238_v22, -inf }
 0x2e7   : > { %7339 = vmatmul.msk.bf16.vlgmr.msra.gmra.mxu2 %vm2327_vm4, %v3012_v62  ;;  %3338 = vmax.xlane.f32.xlu1 %v3337_v20  ;;  %v7593_v20 = vld [vmem:[#allocation3 + $0x10] sm:$0xff] }
 0x2e8   : > { %3151 = vmatpush.bf16.xpose.msra.mxu2 %v3142_v50  ;;  %v11264_v50 = vld [vmem:[#allocation20_spill] sm:$0xff] }
 0x2e9   : > { %7344 = vmatmul.msk.bf16.vlgmr.msra.gmra.mxu3 %vm2327_vm4, %v3042_v53 }
 0x2ea   : > { %3181 = vmatpush.bf16.xpose.msra.mxu3 %v3172_v48  ;;  %v2567_v4 = vpop.f32.mrf.mxu2  ;;  %v7594_v48 = vld [vmem:[#allocation3 + $0x18] sm:$0xff] }
 0x2eb   : > { %v9248_v43 = vsel %vm9110_vm5, -1e+30, %v2567_v4  ;;  %v11265_v4 = vld [vmem:[#allocation22_spill] sm:$0xff] }
 0x2ec   : > { %11252 = vst [vmem:[#allocation21_spill] sm:$0xff] %v9248_v43  ;;  %v2595_v57 = vpop.f32.mrf.mxu3  ;;  %v3340_v9 = vsel %vm3291_vm6, %v9248_v43, -inf }
 0x2ed   : > { %v9254_v36 = vsel %vm9110_vm5, -1e+30, %v2595_v57  ;;  %3341 = vmax.xlane.f32.xlu2 %v3340_v9 }
 0x2ee   : > { %11253 = vst [vmem:[#allocation38_spill] sm:$0xff] %v9254_v36  ;;  %v3346_v28 = vsel %vm3291_vm6, %v9254_v36, -inf }
 0x2ef   : > { %3347 = vmax.xlane.f32.xlu1 %v3346_v28 }
 0x2f2   : > { %v2569_v16 = vpop.f32.mrf.mxu2 }
 0x2f3   : > { %v9264_v44 = vsel %vm9130_vm7, -1e+30, %v2569_v16 }
 0x2f4   : > { %11258 = vst [vmem:[#allocation25_spill] sm:$0xff] %v9264_v44  ;;  %v2597_v24 = vpop.f32.mrf.mxu3  ;;  %v3343_v3 = vsel %vm3291_vm6, %v9264_v44, -inf }
 0x2f5   : > { %3344 = vmax.xlane.f32.xlu0 %v3343_v3  ;;  %v9270_v10 = vsel %vm9130_vm7, -1e+30, %v2597_v24  ;;  %v11270_v24 = vld [vmem:[#allocation24_spill] sm:$0xff]  ;;  %v7598_v3 = vld [vmem:[#allocation3 + $0x38] sm:$0xff] }
 0x2f6   : > { %11259 = vst [vmem:[#allocation35_spill] sm:$0xff] %v9270_v10  ;;  %v3349_v26 = vsel %vm3291_vm6, %v9270_v10, -inf }
 0x2f7   : > { %7349 = vmatmul.msk.bf16.vlgmr.msrb.gmra.mxu2 %vm2327_vm4, %v3072_v52  ;;  %3350 = vmax.xlane.f32.xlu2 %v3349_v26  ;;  %v11271_v52 = vld [vmem:[#allocation27_spill] sm:$0xff] }
 0x2f8   : > { %3211 = vmatpush.bf16.xpose.msrb.mxu2 %v3202_v8 }
 0x2f9   : > { %7354 = vmatmul.msk.bf16.vlgmr.msrb.gmra.mxu3 %vm2327_vm4, %v3102_v33 }
 0x2fa   : > { %3241 = vmatpush.bf16.xpose.msrb.mxu3 %v3232_v18  ;;  %v2623_v1 = vpop.f32.mrf.mxu2 }
 0x2fb   : > { %v9280_v0 = vsel %vm9110_vm5, -1e+30, %v2623_v1 }
 0x2fc   : > { %11260 = vst [vmem:[#allocation23_spill] sm:$0xff] %v9280_v0  ;;  %v2651_v15 = vpop.f32.mrf.mxu3  ;;  %v3352_v61 = vsel %vm3291_vm6, %v9280_v0, -inf }
 0x2fd   : > { %v9286_v5 = vsel %vm9110_vm5, -1e+30, %v2651_v15  ;;  %3353 = vmax.xlane.f32.xlu0 %v3352_v61 }
 0x2fe   : > { %11261 = vst [vmem:[#allocation36_spill] sm:$0xff] %v9286_v5  ;;  %v3358_v60 = vsel %vm3291_vm6, %v9286_v5, -inf }
 0x2ff   : > { %3359 = vmax.xlane.f32.xlu2 %v3358_v60 }
 0x302   : > { %v2625_v31 = vpop.f32.mrf.mxu2 }
 0x303   : > { %v9292_v55 = vsel %vm9130_vm7, -1e+30, %v2625_v31 }
 0x304   : > { %11262 = vst [vmem:[#allocation26_spill] sm:$0xff] %v9292_v55  ;;  %v2653_v35 = vpop.f32.mrf.mxu3  ;;  %v3355_v62 = vsel %vm3291_vm6, %v9292_v55, -inf }
 0x305   : > { %3356 = vmax.xlane.f32.xlu1 %v3355_v62  ;;  %v9298_v38 = vsel %vm9130_vm7, -1e+30, %v2653_v35 }
 0x306   : > { %11263 = vst [vmem:[#allocation39_spill] sm:$0xff] %v9298_v38  ;;  %v3361_v53 = vsel %vm3291_vm6, %v9298_v38, -inf }
 0x307   : > { %7359 = vmatmul.msk.bf16.vlgmr.msra.gmra.mxu2 %vm2327_vm4, %v11264_v50  ;;  %3362 = vmax.xlane.f32.xlu0 %v3361_v53 }
 0x308   : > { %5286 = vmatpush.bf16.msra.mxu2 %v7593_v20 }
 0x309   : > { %7364 = vmatmul.msk.bf16.vlgmr.msra.gmra.mxu3 %vm2327_vm4, %v11265_v4 }
 0x30a   : > { %5314 = vmatpush.bf16.msra.mxu3 %v7594_v48  ;;  %v2679_v57 = vpop.f32.mrf.mxu2 }
 0x30b   : > { %v9308_v9 = vsel %vm9110_vm5, -1e+30, %v2679_v57 }
 0x30c   : > { %11266 = vst [vmem:[#allocation20_spill] sm:$0xff] %v9308_v9  ;;  %v2707_v28 = vpop.f32.mrf.mxu3  ;;  %v3364_v11 = vsel %vm3291_vm6, %v9308_v9, -inf }
 0x30d   : > { %v9314_v45 = vsel %vm9110_vm5, -1e+30, %v2707_v28  ;;  %3365 = vmax.xlane.f32.xlu1 %v3364_v11 }
 0x30e   : > { %11267 = vst [vmem:[#allocation22_spill] sm:$0xff] %v9314_v45  ;;  %v3370_v6 = vsel %vm3291_vm6, %v9314_v45, -inf }
 0x30f   : > { %3371 = vmax.xlane.f32.xlu0 %v3370_v6 }
 0x312   : > { %v2681_v7 = vpop.f32.mrf.mxu2 }
 0x313   : > { %v9320_v16 = vsel %vm9130_vm7, -1e+30, %v2681_v7 }
 0x314   : > { %11268 = vst [vmem:[#allocation40_spill] sm:$0xff] %v9320_v16  ;;  %v2709_v14 = vpop.f32.mrf.mxu3  ;;  %v3367_v37 = vsel %vm3291_vm6, %v9320_v16, -inf }
 0x315   : > { %3368 = vmax.xlane.f32.xlu2 %v3367_v37  ;;  %v9326_v30 = vsel %vm9130_vm7, -1e+30, %v2709_v14 }
 0x316   : > { %11269 = vst [vmem:[#allocation41_spill] sm:$0xff] %v9326_v30  ;;  %v3373_v41 = vsel %vm3291_vm6, %v9326_v30, -inf }
 0x317   : > { %7369 = vmatmul.msk.bf16.vlgmr.msrb.gmra.mxu2 %vm2327_vm4, %v11270_v24  ;;  %3374 = vmax.xlane.f32.xlu1 %v3373_v41 }
 0x318   : > { %5398 = vmatpush.bf16.msrb.mxu2 %v7597_v2 }
 0x319   : > { %7374 = vmatmul.msk.bf16.vlgmr.msrb.gmra.mxu3 %vm2327_vm4, %v11271_v52 }
 0x31a   : > { %5426 = vmatpush.bf16.msrb.mxu3 %v7598_v3  ;;  %v2735_v58 = vpop.f32.mrf.mxu2 }
 0x31b   : > { %v9336_v26 = vsel %vm9110_vm5, -1e+30, %v2735_v58 }
 0x31c   : > { %11272 = vst [vmem:[#allocation24_spill] sm:$0xff] %v9336_v26  ;;  %v2763_v33 = vpop.f32.mrf.mxu3  ;;  %v3376_v8 = vsel %vm3291_vm6, %v9336_v26, -inf }
 0x31d   : > { %v9342_v18 = vsel %vm9110_vm5, -1e+30, %v2763_v33  ;;  %3377 = vmax.xlane.f32.xlu2 %v3376_v8 }
 0x31e   : > { %11273 = vst [vmem:[#allocation27_spill] sm:$0xff] %v9342_v18  ;;  %v3382_v1 = vsel %vm3291_vm6, %v9342_v18, -inf }
 0x31f   : > { %3383 = vmax.xlane.f32.xlu1 %v3382_v1 }
 0x320   : > { %v9398_v33 = vpop.xlane.xlu2 %3293 }
 0x322   : > { %v2737_v15 = vpop.f32.mrf.mxu2 }
 0x323   : > { %v9348_v61 = vsel %vm9130_vm7, -1e+30, %v2737_v15 }
 0x324   : > { %11274 = vst [vmem:[#allocation42_spill] sm:$0xff] %v9348_v61  ;;  %v2765_v60 = vpop.f32.mrf.mxu3  ;;  %v3379_v31 = vsel %vm3291_vm6, %v9348_v61, -inf }
 0x325   : > { %3380 = vmax.xlane.f32.xlu0 %v3379_v31  ;;  %v9354_v27 = vsel %vm9130_vm7, -1e+30, %v2765_v60 }
 0x326   : > { %11275 = vst [vmem:[#allocation43_spill] sm:$0xff] %v9354_v27  ;;  %v3385_v35 = vsel %vm3291_vm6, %v9354_v27, -inf }
 0x327   : > { %3386 = vmax.xlane.f32.xlu2 %v3385_v35 }
 0x32a   : > { %v9358_v62 = vpop.f32.mrf.mxu2  ;;  %v9408_v31 = vpop.xlane.xlu2 %3302 }
 0x32b   : > { %v3388_v20 = vsel %vm3291_vm6, %v9358_v62, -inf  ;;  %v3522_v46 = vperm.slane %v9408_v31, %v9523_v54  ;;  %v3516_v31 = vperm.slane %v9398_v33, %v9104_v40 }
 0x32c   : > { %v9362_v53 = vpop.f32.mrf.mxu3 }
 0x32d   : > { %3389 = vmax.xlane.f32.xlu0 %v3388_v20  ;;  %v3394_v50 = vsel %vm3291_vm6, %v9362_v53, -inf }
 0x32f   : > { %3395 = vmax.xlane.f32.xlu2 %v3394_v50 }
 0x332   : > { %v9366_v48 = vpop.f32.mrf.mxu2 }
 0x333   : > { %v3391_v4 = vsel %vm3291_vm6, %v9366_v48, -inf }
 0x334   : > { %v9368_v29 = vpop.f32.mrf.mxu3  ;;  %3392 = vmax.xlane.f32.xlu1 %v3391_v4 }
 0x335   : > { %v3397_v57 = vsel %vm3291_vm6, %v9368_v29, -inf }
 0x336   : > { %3398 = vmax.xlane.f32.xlu0 %v3397_v57  ;;  %v9418_v57 = vpop.xlane.xlu0 %3296 }
 0x337   : > { %v3518_v34 = vperm.slane %v9418_v57, %v9523_v54 }
 0x33a   : > { %v9374_v28 = vpop.f32.mrf.mxu2 }
 0x33b   : > { %v3400_v6 = vsel %vm3291_vm6, %v9374_v28, -inf }
 0x33c   : > { %v9376_v11 = vpop.f32.mrf.mxu3  ;;  %3401 = vmax.xlane.f32.xlu1 %v3400_v6  ;;  %v9420_v6 = vpop.xlane.xlu2 %3305 }
 0x33d   : > { %v3406_v7 = vsel %vm3291_vm6, %v9376_v11, -inf }
 0x33e   : > { %3407 = vmax.xlane.f32.xlu0 %v3406_v7 }
 0x342   : > { %v9382_v14 = vpop.f32.mrf.mxu2 }
 0x343   : > { %v3403_v2 = vsel %vm3291_vm6, %v9382_v14, -inf }
 0x344   : > { %v9384_v37 = vpop.f32.mrf.mxu3  ;;  %3404 = vmax.xlane.f32.xlu2 %v3403_v2 }
 0x345   : > { %v3409_v41 = vsel %vm3291_vm6, %v9384_v37, -inf }
 0x346   : > { %3410 = vmax.xlane.f32.xlu1 %v3409_v41 }
 0x34a   : > { %v9390_v24 = vpop.f32.mrf.mxu2 }
 0x34b   : > { %v3412_v52 = vsel %vm3291_vm6, %v9390_v24, -inf }
 0x34c   : > { %v9392_v3 = vpop.f32.mrf.mxu3  ;;  %3413 = vmax.xlane.f32.xlu2 %v3412_v52 }
 0x34d   : > { %v3418_v58 = vsel %vm3291_vm6, %v9392_v3, -inf }
 0x34e   : > { %3419 = vmax.xlane.f32.xlu1 %v3418_v58  ;;  %v9430_v58 = vpop.xlane.xlu1 %3299 }
 0x352   : > { %v9400_v8 = vpop.f32.mrf.mxu2 }
 0x353   : > { %11276 = vst [vmem:[#allocation44_spill] sm:$0xff] %v9400_v8  ;;  %v3415_v15 = vsel %vm3291_vm6, %v9400_v8, -inf }
 0x354   : > { %v9402_v1 = vpop.f32.mrf.mxu3  ;;  %3416 = vmax.xlane.f32.xlu0 %v3415_v15  ;;  %v9432_v15 = vpop.xlane.xlu0 %3308 }
 0x355   : > { %v3421_v60 = vsel %vm3291_vm6, %v9402_v1, -inf  ;;  %v3525_v47 = vperm.slane %v9432_v15, %v9523_v54 }
 0x356   : > { %3422 = vmax.xlane.f32.xlu2 %v3421_v60  ;;  %v9444_v49 = vpop.xlane.xlu1 %3311 }
 0x35a   : > { %v9410_v35 = vpop.f32.mrf.mxu2 }
 0x35b   : > { %11277 = vst [vmem:[#allocation45_spill] sm:$0xff] %v9410_v35  ;;  %v3424_v50 = vsel %vm3291_vm6, %v9410_v35, -inf }
 0x35c   : > { %v9412_v20 = vpop.f32.mrf.mxu3  ;;  %3425 = vmax.xlane.f32.xlu0 %v3424_v50  ;;  %v9436_v50 = vpop.xlane.xlu2 %3314 }
 0x35d   : > { %11278 = vst [vmem:[#allocation46_spill] sm:$0xff] %v9412_v20  ;;  %v3430_v4 = vsel %vm3291_vm6, %v9412_v20, -inf  ;;  %v9446_v27 = vpop.xlane.xlu0 %3317  ;;  %v11296_v20 = vmov 0  }
 0x35e   : > { %3431 = vmax.xlane.f32.xlu2 %v3430_v4  ;;  %v9458_v26 = vpop.xlane.xlu1 %3320 }
 0x35f   : > { %v3531_v33 = vperm.slane %v9458_v26, %v9523_v54 }
 0x362   : > { %v9422_v7 = vpop.f32.mrf.mxu2 }
 0x363   : > { %v3427_v41 = vsel %vm3291_vm6, %v9422_v7, -inf }
 0x364   : > { %v9424_v2 = vpop.f32.mrf.mxu3  ;;  %3428 = vmax.xlane.f32.xlu1 %v3427_v41 }
 0x365   : > { %11279 = vst [vmem:[#allocation47_spill] sm:$0xff] %v9424_v2  ;;  %v3433_v52 = vsel %vm3291_vm6, %v9424_v2, -inf  ;;  %v9460_v16 = vpop.xlane.xlu0 %3326 }
 0x366   : > { %3434 = vmax.xlane.f32.xlu0 %v3433_v52  ;;  %v9472_v55 = vpop.xlane.xlu1 %3329 }
 0x36a   : > { %v9434_v60 = vpop.f32.mrf.mxu2 }
 0x36b   : > { %11280 = vst [vmem:[#allocation48_spill] sm:$0xff] %v9434_v60  ;;  %v3436_v42 = vsel %vm3291_vm6, %v9434_v60, -inf }
 0x36c   : > { %v9438_v4 = vpop.f32.mrf.mxu3  ;;  %3437 = vmax.xlane.f32.xlu1 %v3436_v42  ;;  %v9456_v42 = vpop.xlane.xlu2 %3323 }
 0x36d   : > { %11281 = vst [vmem:[#allocation49_spill] sm:$0xff] %v9438_v4  ;;  %v3442_v41 = vsel %vm3291_vm6, %v9438_v4, -inf  ;;  %v9480_v0 = vpop.xlane.xlu0 %3335 }
 0x36e   : > { %3443 = vmax.xlane.f32.xlu0 %v3442_v41  ;;  %v9484_v44 = vpop.xlane.xlu1 %3338 }
 0x372   : > { %v9448_v52 = vpop.f32.mrf.mxu2 }
 0x373   : > { %11282 = vst [vmem:[#allocation50_spill] sm:$0xff] %v9448_v52  ;;  %v3439_v18 = vsel %vm3291_vm6, %v9448_v52, -inf }
 0x374   : > { %v9450_v61 = vpop.f32.mrf.mxu3  ;;  %3440 = vmax.xlane.f32.xlu2 %v3439_v18  ;;  %v9470_v9 = vpop.xlane.xlu2 %3332 }
 0x375   : > { %11283 = vst [vmem:[#allocation51_spill] sm:$0xff] %v9450_v61  ;;  %v3445_v30 = vsel %vm3291_vm6, %v9450_v61, -inf  ;;  %v9494_v59 = vpop.xlane.xlu0 %3344  ;;  %v3537_v26 = vperm.slane %v9470_v9, %v9523_v54 }
 0x376   : > { %3446 = vmax.xlane.f32.xlu1 %v3445_v30 }
 0x37a   : > { %v9462_v41 = vpop.f32.mrf.mxu2 }
 0x37b   : > { %11284 = vst [vmem:[#allocation52_spill] sm:$0xff] %v9462_v41  ;;  %v3448_v38 = vsel %vm3291_vm6, %v9462_v41, -inf }
 0x37c   : > { %v9464_v45 = vpop.f32.mrf.mxu3  ;;  %3449 = vmax.xlane.f32.xlu2 %v3448_v38  ;;  %v9486_v36 = vpop.xlane.xlu2 %3341 }
 0x37d   : > { %11285 = vst [vmem:[#allocation53_spill] sm:$0xff] %v9464_v45  ;;  %v3454_v18 = vsel %vm3291_vm6, %v9464_v45, -inf }
 0x37e   : > { %3455 = vmax.xlane.f32.xlu1 %v3454_v18 }
 0x382   : > { %v9474_v5 = vpop.f32.mrf.mxu2 }
 0x383   : > { %11286 = vst [vmem:[#allocation54_spill] sm:$0xff] %v9474_v5  ;;  %v3451_v10 = vsel %vm3291_vm6, %v9474_v5, -inf }
 0x384   : > { %v9476_v30 = vpop.f32.mrf.mxu3  ;;  %3452 = vmax.xlane.f32.xlu0 %v3451_v10  ;;  %v9498_v13 = vpop.xlane.xlu2 %3350 }
 0x385   : > { %11287 = vst [vmem:[#allocation55_spill] sm:$0xff] %v9476_v30  ;;  %v3457_v38 = vsel %vm3291_vm6, %v9476_v30, -inf }
 0x386   : > { %3458 = vmax.xlane.f32.xlu2 %v3457_v38  ;;  %v9500_v38 = vpop.xlane.xlu1 %3347 }
 0x387   : > { %v3545_v9 = vperm.slane %v9500_v38, %v9104_v40 }
 0x38a   : > { %v9488_v18 = vpop.f32.mrf.mxu2 }
 0x38b   : > { %11288 = vst [vmem:[#allocation56_spill] sm:$0xff] %v9488_v18  ;;  %v3460_v43 = vsel %vm3291_vm6, %v9488_v18, -inf }
 0x38c   : > { %v9490_v22 = vpop.f32.mrf.mxu3  ;;  %3461 = vmax.xlane.f32.xlu0 %v3460_v43  ;;  %v9510_v43 = vpop.xlane.xlu0 %3353 }
 0x38d   : > { %11289 = vst [vmem:[#allocation57_spill] sm:$0xff] %v9490_v22  ;;  %v3466_v10 = vsel %vm3291_vm6, %v9490_v22, -inf  ;;  %v9512_v12 = vpop.xlane.xlu2 %3359 }
 0x38e   : > { %3467 = vmax.xlane.f32.xlu2 %v3466_v10  ;;  %v3357_v10 = vpop.xlane.xlu1 %3356 }
 0x392   : > { %v9502_v21 = vpop.f32.mrf.mxu2 }
 0x393   : > { %11290 = vst [vmem:[#allocation58_spill] sm:$0xff] %v9502_v21  ;;  %v3463_v39 = vsel %vm3291_vm6, %v9502_v21, -inf }
 0x394   : > { %v9504_v63 = vpop.f32.mrf.mxu3  ;;  %3464 = vmax.xlane.f32.xlu1 %v3463_v39 }
 0x395   : > { %11291 = vst [vmem:[#allocation59_spill] sm:$0xff] %v9504_v63  ;;  %v3469_v17 = vsel %vm3291_vm6, %v9504_v63, -inf  ;;  %v9531_v19 = vpop.xlane.xlu2 %3368  ;;  %v3527_v63 = vperm.slane %v9444_v49, %v9104_v40  ;;  %v3533_v49 = vperm.slane %v9456_v42, %v9104_v40  ;;  %v3536_v42 = vperm.slane %v9472_v55, %v9104_v40 }
 0x396   : > { %3470 = vmax.xlane.f32.xlu0 %v3469_v17  ;;  %v9525_v17 = vpop.xlane.xlu0 %3362 }
 0x39a   : > { %v9514_v32 = vpop.f32.mrf.mxu2 }
 0x39b   : > { %11292 = vst [vmem:[#allocation60_spill] sm:$0xff] %v9514_v32  ;;  %v3472_v23 = vsel %vm3291_vm6, %v9514_v32, -inf  ;;  %v3528_v32 = vperm.slane %v9436_v50, %v9523_v54  ;;  %v3534_v50 = vperm.slane %v9460_v16, %v9523_v54  ;;  %v3546_v16 = vperm.slane %v9498_v13, %v9523_v54 }
 0x39c   : > { %v9516_v51 = vpop.f32.mrf.mxu3  ;;  %3473 = vmax.xlane.f32.xlu1 %v3472_v23  ;;  %v3521_v23 = vperm.slane %v9430_v58, %v9104_v40  ;;  %v3543_v13 = vperm.slane %v9494_v59, %v9523_v54  ;;  %v3539_v59 = vperm.slane %v9480_v0, %v9104_v40 }
 0x39d   : > { %11293 = vst [vmem:[#allocation61_spill] sm:$0xff] %v9516_v51  ;;  %v3478_v39 = vsel %vm3291_vm6, %v9516_v51, -inf  ;;  %v3366_v51 = vpop.xlane.xlu1 %3365  ;;  %v3547_v55 = vsel %vm3519_vm8, %v3546_v16, %v3545_v9 }
 0x39e   : > { %3479 = vmax.xlane.f32.xlu0 %v3478_v39  ;;  %v3524_v39 = vperm.slane %v9420_v6, %v9104_v40  ;;  %v3523_v15 = vsel %vm3519_vm8, %v3522_v46, %v3521_v23  ;;  %v3520_v6 = vsel %vm3519_vm8, %v3518_v34, %v3516_v31  ;;  %v3372_v34 = vpop.xlane.xlu0 %3371 }
 0x39f   : > { %v3567_v46 = vsel %vm3566_vm9, %v3523_v15, %v3520_v6  ;;  %v3378_v15 = vpop.xlane.xlu2 %3377  ;;  %v3538_v6 = vsel %vm3519_vm8, %v3537_v26, %v3536_v42 }
 0x3a0   : > { %v3526_v57 = vsel %vm3519_vm8, %v3525_v47, %v3524_v39  ;;  %v3530_v47 = vperm.slane %v9446_v27, %v9104_v40 }
 0x3a1   : > { %v3569_v23 = vsel %vm3568_vm10, %v3526_v57, %v3567_v46 }
 0x3a2   : > { %v3532_v39 = vsel %vm3519_vm8, %v3531_v33, %v3530_v47  ;;  %v3551_v33 = vperm.slane %v9512_v12, %v9104_v40 }
 0x3a4   : > { %v9539_v22 = vpop.f32.mrf.mxu3 }
 0x3a5   : > { %11294 = vst [vmem:[#allocation62_spill] sm:$0xff] %v9539_v22  ;;  %v3481_v58 = vsel %vm3291_vm6, %v9539_v22, -inf  ;;  %v3529_v22 = vsel %vm3519_vm8, %v3528_v32, %v3527_v63  ;;  %v3535_v63 = vsel %vm3519_vm8, %v3534_v50, %v3533_v49  ;;  %v3549_v32 = vperm.slane %v3357_v10, %v9523_v54  ;;  %v3375_v27 = vpop.xlane.xlu1 %3374 }
 0x3a6   : > { %3482 = vmax.xlane.f32.xlu1 %v3481_v58  ;;  %v3571_v31 = vsel %vm3570_vm11, %v3529_v22, %v3569_v23  ;;  %v3540_v58 = vperm.slane %v9484_v44, %v9523_v54  ;;  %v3542_v22 = vperm.slane %v9486_v36, %v9104_v40  ;;  %v3548_v10 = vperm.slane %v9510_v43, %v9104_v40  ;;  %v3381_v46 = vpop.xlane.xlu0 %3380 }
 0x3a7   : > { %v3573_v57 = vsel %vm3572_vm12, %v3532_v39, %v3571_v31  ;;  %v3552_v44 = vperm.slane %v9525_v17, %v9523_v54  ;;  %v3555_v36 = vperm.slane %v9531_v19, %v9523_v54  ;;  %v3554_v23 = vperm.slane %v3366_v51, %v9104_v40  ;;  %v3387_v16 = vpop.xlane.xlu2 %3386 }
 0x3a8   : > { %v3550_v38 = vsel %vm3519_vm8, %v3549_v32, %v3548_v10  ;;  %v3544_v43 = vsel %vm3519_vm8, %v3543_v13, %v3542_v22  ;;  %v3575_v50 = vsel %vm3574_vm13, %v3535_v63, %v3573_v57  ;;  %v3541_v47 = vsel %vm3519_vm8, %v3540_v58, %v3539_v59 }
 0x3a9   : > { %v3580_v17 = vsel %vm3566_vm9, %v3547_v55, %v3544_v43  ;;  %v3577_v0 = vsel %vm3576_vm14, %v3538_v6, %v3575_v50  ;;  %v3553_v19 = vsel %vm3519_vm8, %v3552_v44, %v3551_v33  ;;  %v3558_v39 = vperm.slane %v3375_v27, %v9523_v54 }
 0x3aa   : > { %v3581_v49 = vsel %vm3568_vm10, %v3550_v38, %v3580_v17  ;;  %v3556_v12 = vsel %vm3519_vm8, %v3555_v36, %v3554_v23  ;;  %v3561_v26 = vperm.slane %v3381_v46, %v9523_v54  ;;  %v3557_v31 = vperm.slane %v3372_v34, %v9104_v40  ;;  %v9630_v36 = vpop.f32.mrf.mxu2 }
 0x3ab   : > { %v3582_v51 = vsel %vm3570_vm11, %v3553_v19, %v3581_v49  ;;  %v3560_v63 = vperm.slane %v3378_v15, %v9104_v40  ;;  %v3579_v42 = vsel %vm3578_vm15, %v3541_v47, %v3577_v0  ;;  %v3564_v9 = vperm.slane %v3387_v16, %v9523_v54  ;;  %11295 = vst [vmem:[#allocation63_spill] sm:$0xff] %v9630_v36 }
 0x3ac   : > { %v3559_v58 = vsel %vm3519_vm8, %v3558_v39, %v3557_v31  ;;  %v3583_v27 = vsel %vm3572_vm12, %v3556_v12, %v3582_v51  ;;  %v3475_v33 = vsel %vm3291_vm6, %v9630_v36, -inf  ;;  %v11161_v36 = vmov 0  }
 0x3ad   : > { %v3384_v32 = vpop.xlane.xlu1 %3383  ;;  %v3562_v13 = vsel %vm3519_vm8, %v3561_v26, %v3560_v63  ;;  %v3584_v34 = vsel %vm3574_vm13, %v3559_v58, %v3583_v27 }
 0x3ae   : > { %v3563_v22 = vperm.slane %v3384_v32, %v9104_v40  ;;  %v3585_v15 = vsel %vm3576_vm14, %v3562_v13, %v3584_v34  ;;  %v9661_v31 = vpop.xlane.xlu0 %3389 }
 0x3af   : > { %v9619_v55 = vpop.xlane.xlu2 %3395 }
 0x3b0   : > { %v3565_v10 = vsel %vm3519_vm8, %v3564_v9, %v3563_v22 }
 0x3b1   : > { %v3586_v57 = vsel %vm3578_vm15, %v3565_v10, %v3585_v15 }
 0x3b5   : > { %v9657_v16 = vpop.xlane.xlu1 %3392 }
 0x3b6   : > { %v9666_v32 = vpop.xlane.xlu0 %3398 }
 0x3b7   : > { %3589 = vxpose.xlu2.b32.start [1/2] (short) (narrow) %v3579_v42, 16  ;;  %v9621_v44 = vpop.xlane.xlu2 %3404 }
 0x3bd   : > { %v9664_v63 = vpop.xlane.xlu1 %3401 }
 0x3be   : > { %v9671_v58 = vpop.xlane.xlu0 %3407 }
 0x3bf   : > { %3590 = vxpose.xlu2.b32.end [2/2] (short) (narrow) %v3586_v57, 16  ;;  %v9623_v6 = vpop.xlane.xlu2 %3413 }
 0x3c5   : > { %v9669_v42 = vpop.xlane.xlu1 %3410 }
 0x3c7   : > { %v9677_v13 = vpop.xlane.xlu0 %3416 }
 0x3c9   : > { %v9625_v59 = vpop.xlane.xlu2 %3422 }
 0x3cd   : > { %v9675_v27 = vpop.xlane.xlu1 %3419 }
 0x3cf   : > { %v9684_v15 = vpop.xlane.xlu0 %3425 }
 0x3d1   : > { %v9628_v38 = vpop.xlane.xlu2 %3431 }
 0x3d7   : > { %v9680_v22 = vpop.xlane.xlu1 %3428 }
 0x3df   : > { %v9686_v57 = vpop.xlane.xlu1 %3437 }
 0x3e7   : > { %v9632_v43 = vpop.xlane.xlu2 %3440 }
 0x3ef   : > { %v9636_v46 = vpop.xlane.xlu2 %3449 }
 0x3f9   : > { %v9638_v50 = vpop.xlane.xlu2 %3458 }
 0x401   : > { %v9640_v17 = vpop.xlane.xlu2 %3467 }
 0x421   : > { %7708 = vset.pattern.permute.xlu2 %v9093_v25 }
 0x430   : > { %3476 = vmax.xlane.f32.xlu2 %v3475_v33  ;;  %v9688_v33 = vpop.xlane.xlu0 %3434 }
 0x450   : > { %v9642_v23 = vpop.trf.xlu2 }
 0x451   : > { %v3623_v47 = vperm.slane %v9642_v23, 0  ;;  %v3662_v0 = vperm.slane %v9642_v23, 3  ;;  %v3649_v19 = vperm.slane %v9642_v23, 2  ;;  %v3636_v26 = vperm.slane %v9642_v23, 1 }
 0x452   : > { %v3675_v51 = vperm.slane %v9642_v23, 4  ;;  %v3701_v9 = vperm.slane %v9642_v23, 6  ;;  %v3714_v34 = vperm.slane %v9642_v23, 7  ;;  %v3688_v10 = vperm.slane %v9642_v23, 5 }
 0x453   : > { %3628 = vperm.xlu0 %7704, %v3623_v47   ;;  %3634 = vperm.xlu1 %7705, %v3623_v47  }
 0x454   : > { %3673 = vperm.xlu2 %7708, %v3662_v0  }
 0x458   : > { %v9646_v49 = vpop.trf.xlu2 }
 0x459   : > { %v11155_v39 = vperm.slane %v9646_v49, 6  ;;  %v11154_v12 = vperm.slane %v9646_v49, 7  ;;  %v3740_v47 = vperm.slane %v9646_v49, 1  ;;  %v3779_v30 = vperm.slane %v9646_v49, 4 }
 0x45a   : > { %v3727_v18 = vperm.slane %v9646_v49, 0  ;;  %v3792_v21 = vperm.slane %v9646_v49, 5 }
 0x45b   : > { %3654 = vperm.xlu0 %7704, %v3649_v19   ;;  %7706 = vset.pattern.permute.xlu1 %v9085_v56 }
 0x45c   : > { %3816 = vperm.xlu2 %7708, %v11155_v39  }
 0x463   : > { %3667 = vperm.xlu0 %7704, %v3662_v0   ;;  %3641 = vperm.xlu1 %7706, %v3636_v26   ;;  %v9693_v0 = vpop.xlane.xlu1 %3446 }
 0x464   : > { %3829 = vperm.xlu2 %7708, %v11154_v12  }
 0x46b   : > { %7710 = vset.pattern.permute.xlu0 %v9093_v25  ;;  %7707 = vset.pattern.permute.xlu1 %v9093_v25  ;;  %v9697_v23 = vpop.xlane.xlu1 %3455 }
 0x46c   : > { %7725 = vset.pattern.permute.xlu2 %v11161_v36 }
 0x473   : > { %3686 = vperm.xlu0 %7710, %v3675_v51   ;;  %3647 = vperm.xlu1 %7707, %v3636_v26   ;;  %v9703_v12 = vpop.xlane.xlu1 %3464 }
 0x47b   : > { %7712 = vset.pattern.permute.xlu0 %v9085_v56  ;;  %3660 = vperm.xlu1 %7707, %v3649_v19   ;;  %v9695_v19 = vpop.xlane.xlu0 %3443 }
 0x483   : > { %3706 = vperm.xlu0 %7712, %v3701_v9   ;;  %7709 = vset.pattern.permute.xlu1 %v9085_v56  ;;  %v9700_v26 = vpop.xlane.xlu0 %3452 }
 0x48b   : > { %7714 = vset.pattern.permute.xlu0 %v9093_v25  ;;  %3680 = vperm.xlu1 %7709, %v3675_v51   ;;  %v3753_v51 = vperm.slane %v9646_v49, 2  ;;  %v9706_v39 = vpop.xlane.xlu0 %3461 }
 0x493   : > { %3725 = vperm.xlu0 %7714, %v3714_v34   ;;  %3693 = vperm.xlu1 %7709, %v3688_v10  }
 0x49b   : > { %7716 = vset.pattern.permute.xlu0 %v9085_v56  ;;  %7711 = vset.pattern.permute.xlu1 %v9093_v25 }
 0x4a3   : > { %3745 = vperm.xlu0 %7716, %v3740_v47   ;;  %3699 = vperm.xlu1 %7711, %v3688_v10   ;;  %v9710_v10 = vpop.xlane.xlu1 %3473  ;;  %v9725_v61 = vpop.xlane.xlu2 %3476 }
 0x4ab   : > { %7718 = vset.pattern.permute.xlu0 %v9093_v25  ;;  %3712 = vperm.xlu1 %7711, %v3701_v9   ;;  %v9712_v9 = vpop.xlane.xlu0 %3470  ;;  %v9716_v45 = vpop.xlane.xlu1 %3482 }
 0x4ae   : > { %v3674_v52 = vpop.permute.xlu2 %3673 }
 0x4af   : > { %v3870_v8 = vmax.f32 %v9669_v42, %v3674_v52 }
 0x4b3   : > { %3764 = vperm.xlu0 %7718, %v3753_v51   ;;  %7713 = vset.pattern.permute.xlu1 %v9085_v56  ;;  %v9718_v5 = vpop.xlane.xlu0 %3479 }
 0x4bb   : > { %7720 = vset.pattern.permute.xlu0 %v9085_v56  ;;  %3719 = vperm.xlu1 %7713, %v3714_v34  }
 0x4c3   : > { %3784 = vperm.xlu0 %7720, %v3779_v30   ;;  %3732 = vperm.xlu1 %7713, %v3727_v18  }
 0x4c5   : > { %v3635_v36 = vpop.permute.xlu1 %3634  ;;  %v3629_v34 = vpop.permute.xlu0 %3628 }
 0x4c6   : > { %v3863_v2 = vmax.f32 %v9661_v31, %v3629_v34 }
 0x4cb   : > { %7722 = vset.pattern.permute.xlu0 %v9093_v25  ;;  %7715 = vset.pattern.permute.xlu1 %v9093_v25 }
 0x4cd   : > { %v3655_v35 = vpop.permute.xlu0 %3654 }
 0x4ce   : > { %v3867_v60 = vmax.f32 %v9664_v63, %v3655_v35 }
 0x4d3   : > { %3803 = vperm.xlu0 %7722, %v3792_v21   ;;  %3738 = vperm.xlu1 %7715, %v3727_v18  }
 0x4d5   : > { %v3642_v4 = vpop.permute.xlu1 %3641 }
 0x4d6   : > { %v3865_v41 = vmax.f32 %v9619_v55, %v3642_v4  ;;  %v3766_v55 = vperm.slane %v9646_v49, 3 }
 0x4d8   : > { %3907 = vperm.xlu2 %7725, %v3865_v41  }
 0x4db   : > { %7723 = vset.pattern.permute.xlu0 %v11296_v20  ;;  %3751 = vperm.xlu1 %7715, %v3740_v47  }
 0x4dc   : > { %3897 = vperm.xlu0 %7723, %v3863_v2  }
 0x4e0   : > { %3917 = vperm.xlu2 %7725, %v3867_v60  }
 0x4e3   : > { %7717 = vset.pattern.permute.xlu1 %v9085_v56 }
 0x4e5   : > { %v3648_v18 = vpop.permute.xlu1 %3647 }
 0x4e8   : > { %3932 = vperm.xlu2 %7725, %v3870_v8  }
 0x4eb   : > { %3758 = vperm.xlu1 %7717, %v3753_v51  }
 0x4ed   : > { %v3661_v4 = vpop.permute.xlu1 %3660 }
 0x4ee   : > { %v3868_v41 = vmax.f32 %v9621_v44, %v3661_v4  ;;  %v3668_v44 = vpop.permute.xlu0 %3667 }
 0x4f0   : > { %3922 = vperm.xlu0 %7723, %v3868_v41  }
 0x4f3   : > { %3771 = vperm.xlu1 %7717, %v3766_v55  }
 0x4f6   : > { %v3687_v47 = vpop.permute.xlu0 %3686 }
 0x4fb   : > { %7719 = vset.pattern.permute.xlu1 %v9093_v25 }
 0x4fd   : > { %v3681_v2 = vpop.permute.xlu1 %3680 }
 0x4fe   : > { %v3871_v35 = vmax.f32 %v9623_v6, %v3681_v2  ;;  %v11297_v6 = vperm.slane %v9646_v49, 6  ;;  %v3707_v51 = vpop.permute.xlu0 %3706  ;;  %v9748_v2 = vpop.permute.xlu2 %3816 }
 0x500   : > { %3937 = vperm.xlu0 %7723, %v3871_v35  }
 0x503   : > { %3777 = vperm.xlu1 %7719, %v3766_v55   ;;  %v3866_v55 = vmax.f32 %v9666_v32, %v3648_v18 }
 0x505   : > { %v3694_v60 = vpop.permute.xlu1 %3693 }
 0x506   : > { %v3873_v31 = vmax.f32 %v9675_v27, %v3694_v60  ;;  %v11298_v27 = vperm.slane %v9646_v49, 7  ;;  %v3726_v4 = vpop.permute.xlu0 %3725  ;;  %v9751_v60 = vpop.permute.xlu2 %3829 }
 0x508   : > { %3947 = vperm.xlu2 %7725, %v3873_v31  }
 0x50b   : > { %3790 = vperm.xlu1 %7719, %v3779_v30  }
 0x513   : > { %7721 = vset.pattern.permute.xlu1 %v9085_v56 }
 0x515   : > { %v3700_v8 = vpop.permute.xlu1 %3699  ;;  %v3746_v41 = vpop.permute.xlu0 %3745 }
 0x516   : > { %v3874_v52 = vmax.f32 %v9625_v59, %v3700_v8  ;;  %v3864_v59 = vmax.f32 %v9657_v16, %v3635_v36 }
 0x518   : > { %3952 = vperm.xlu0 %7723, %v3874_v52  }
 0x51b   : > { %3797 = vperm.xlu1 %7721, %v3792_v21  }
 0x51d   : > { %v3713_v63 = vpop.permute.xlu1 %3712 }
 0x51e   : > { %v3876_v42 = vmax.f32 %v9680_v22, %v3713_v63 }
 0x520   : > { %3962 = vperm.xlu2 %7725, %v3876_v42  }
 0x523   : > { %3810 = vperm.xlu1 %7721, %v11297_v6  }
 0x525   : > { %v3765_v49 = vpop.permute.xlu0 %3764 }
 0x52b   : > { %3823 = vperm.xlu1 %7721, %v11298_v27  }
 0x52d   : > { %v3720_v30 = vpop.permute.xlu1 %3719 }
 0x52e   : > { %v3877_v34 = vmax.f32 %v9628_v38, %v3720_v30  ;;  %v3869_v38 = vmax.f32 %v9671_v58, %v3668_v44  ;;  %v3875_v58 = vmax.f32 %v9684_v15, %v3707_v51  ;;  %v3878_v44 = vmax.f32 %v9688_v33, %v3726_v4 }
 0x530   : > { %3967 = vperm.xlu0 %7723, %v3877_v34  }
 0x532   : > { %v9755_v8 = vpop.permute.xlu2 %3907 }
 0x533   : > { %7724 = vset.pattern.permute.xlu1 %v11296_v20 }
 0x534   : > { %3902 = vperm.xlu1 %7724, %v3864_v59  }
 0x535   : > { %v3733_v21 = vpop.permute.xlu1 %3732  ;;  %v3785_v16 = vpop.permute.xlu0 %3784 }
 0x536   : > { %v3879_v22 = vmax.f32 %v9686_v57, %v3733_v21  ;;  %v3872_v57 = vmax.f32 %v9677_v13, %v3687_v47  ;;  %v3887_v59 = vmax.f32 %v9706_v39, %v3785_v16  ;;  %v7601_v21 = vld [vmem:[#allocation3 + $0x50] sm:$0xff] }
 0x538   : > { %3977 = vperm.xlu2 %7725, %v3879_v22  }
 0x53a   : > { %v9759_v52 = vpop.permute.xlu2 %3917 }
 0x53b   : > { %v4059_v13 = vsub.f32 %v9374_v28, %v9759_v52 }
 0x53c   : > { %3912 = vperm.xlu1 %7724, %v3866_v55  }
 0x53d   : > { %v4095_v47 = vmul.f32 1.442695, %v4059_v13 }
 0x53f   : > { %7739 = vpow2.f32 %v4095_v47 }
 0x544   : > { %3927 = vperm.xlu1 %7724, %v3869_v38  }
 0x545   : > { %v3739_v35 = vpop.permute.xlu1 %3738  ;;  %v3804_v18 = vpop.permute.xlu0 %3803 }
 0x546   : > { %v3880_v36 = vmax.f32 %v9632_v43, %v3739_v35  ;;  %v9773_v28 = vpop.eup %7739 }
 0x548   : > { %3982 = vperm.xlu0 %7723, %v3880_v36   ;;  %v3892_v36 = vmax.f32 %v9725_v61, %v9748_v2 }
 0x54c   : > { %3942 = vperm.xlu1 %7724, %v3872_v57  }
 0x54d   : > { %v3752_v31 = vpop.permute.xlu1 %3751 }
 0x54e   : > { %v3882_v32 = vmax.f32 %v9693_v0, %v3752_v31  ;;  %v9762_v43 = vpop.permute.xlu0 %3897  ;;  %v3881_v0 = vmax.f32 %v9695_v19, %v3746_v41  ;;  %v5181_v19 = vpack.c.bf16 %v9773_v28, %v9773_v28  ;;  %v3890_v41 = vmax.f32 %v9712_v9, %v3804_v18 }
 0x54f   : > { %v3894_v9 = vmax.f32 %v9716_v45, %v9751_v60  ;;  %v4057_v31 = vsub.f32 %v9362_v53, %v9755_v8  ;;  %v9803_v60 = vpop.permute.xlu2 %3932  ;;  %v4154_v53 = vperm.slane %v9755_v8, %v9104_v40 }
 0x550   : > { %3992 = vperm.xlu2 %7725, %v3882_v32   ;;  %v5267_v34 = vunpack.c.l.b16 %v5181_v19 }
 0x551   : > { %v4091_v2 = vmul.f32 1.442695, %v4057_v31  ;;  %v7600_v31 = vld [vmem:[#allocation3 + $0x48] sm:$0xff] }
 0x554   : > { %3957 = vperm.xlu1 %7724, %v3875_v58   ;;  %v4062_v58 = vsub.f32 %v9384_v37, %v9803_v60 }
 0x55c   : > { %3972 = vperm.xlu1 %7724, %v3878_v44   ;;  %v4151_v44 = vperm.slane %v9762_v43, %v9104_v40 }
 0x55d   : > { %v3759_v63 = vpop.permute.xlu1 %3758 }
 0x55e   : > { %v3883_v42 = vmax.f32 %v9636_v46, %v3759_v63  ;;  %v3884_v46 = vmax.f32 %v9700_v26, %v3765_v49 }
 0x560   : > { %3997 = vperm.xlu0 %7723, %v3883_v42   ;;  %v4157_v42 = vperm.slane %v9759_v52, %v9104_v40  ;;  %v4101_v52 = vmul.f32 1.442695, %v4062_v58 }
 0x562   : > { %v9768_v6 = vpop.permute.xlu0 %3922 }
 0x563   : > { %v4060_v15 = vsub.f32 %v9382_v14, %v9768_v6 }
 0x564   : > { %3987 = vperm.xlu1 %7724, %v3881_v0  }
 0x565   : > { %v4097_v33 = vmul.f32 1.442695, %v4060_v15  ;;  %v3772_v51 = vpop.permute.xlu1 %3771 }
 0x566   : > { %v3885_v27 = vmax.f32 %v9697_v23, %v3772_v51  ;;  %v9832_v51 = vpop.permute.xlu2 %3947 }
 0x567   : > { %7741 = vpow2.f32 %v4097_v33 }
 0x568   : > { %4007 = vperm.xlu2 %7725, %v3885_v27  }
 0x56c   : > { %4002 = vperm.xlu1 %7724, %v3884_v46  }
 0x56d   : > { %v9778_v30 = vpop.eup %7741 }
 0x56e   : > { %v5182_v14 = vpack.c.bf16 %v9778_v30, %v9778_v30 }
 0x570   : > { %v5268_v4 = vunpack.c.l.b16 %v5182_v14 }
 0x572   : > { %v5269_v23 = vpack.c.b16 %v5268_v4, %v5267_v34  ;;  %v4065_v4 = vsub.f32 %v9392_v3, %v9832_v51 }
 0x574   : > { %4017 = vperm.xlu1 %7724, %v3887_v59   ;;  %7389 = vmatmul.msk.bf16.vlgmr.msra.gmra.mxu2 %vm3291_vm6, %v5269_v23  ;;  %v4107_v3 = vmul.f32 1.442695, %v4065_v4 }
 0x575   : > { %5510 = vmatpush.bf16.msra.mxu2 %v7601_v21  ;;  %v3778_v26 = vpop.permute.xlu1 %3777 }
 0x576   : > { %v3886_v22 = vmax.f32 %v9638_v50, %v3778_v26 }
 0x578   : > { %4012 = vperm.xlu0 %7723, %v3886_v22   ;;  %v7599_v22 = vld [vmem:[#allocation3 + $0x40] sm:$0xff] }
 0x57c   : > { %4032 = vperm.xlu1 %7724, %v3890_v41  }
 0x57d   : > { %v3791_v55 = vpop.permute.xlu1 %3790 }
 0x57e   : > { %v3888_v49 = vmax.f32 %v9703_v12, %v3791_v55  ;;  %v4055_v12 = vsub.f32 %v9358_v62, %v9762_v43 }
 0x580   : > { %4022 = vperm.xlu2 %7725, %v3888_v49  }
 0x58d   : > { %v3798_v38 = vpop.permute.xlu1 %3797 }
 0x58e   : > { %v3889_v39 = vmax.f32 %v9640_v17, %v3798_v38  ;;  %v4087_v17 = vmul.f32 1.442695, %v4055_v12  ;;  %v11299_v12 = vld [vmem:[#allocation44_spill] sm:$0xff] }
 0x590   : > { %4027 = vperm.xlu0 %7723, %v3889_v39   ;;  %7743 = vpow2.f32 %v4087_v17 }
 0x595   : > { %v3811_v35 = vpop.permute.xlu1 %3810 }
 0x596   : > { %v3891_v16 = vmax.f32 %v9710_v10, %v3811_v35  ;;  %v9805_v62 = vpop.eup %7743 }
 0x597   : > { %v5177_v8 = vpack.c.bf16 %v9805_v62, %v9805_v62 }
 0x598   : > { %4037 = vperm.xlu2 %7725, %v3891_v16   ;;  %4042 = vperm.xlu0 %7723, %v3892_v36  }
 0x599   : > { %v5211_v19 = vunpack.c.l.b16 %v5177_v8 }
 0x59d   : > { %v3824_v50 = vpop.permute.xlu1 %3823 }
 0x59e   : > { %v3893_v57 = vmax.f32 %v9718_v5, %v3824_v50  ;;  %v9801_v5 = vpop.permute.xlu0 %3937 }
 0x59f   : > { %v4063_v21 = vsub.f32 %v9390_v24, %v9801_v5  ;;  %v9854_v24 = vpop.permute.xlu2 %3962 }
 0x5a0   : > { %4047 = vperm.xlu1 %7724, %v3893_v57   ;;  %4052 = vperm.xlu2 %7725, %v3894_v9   ;;  %v4068_v57 = vsub.f32 %v9422_v7, %v9854_v24 }
 0x5a1   : > { %v4103_v35 = vmul.f32 1.442695, %v4063_v21 }
 0x5a6   : > { %v3903_v61 = vpop.permute.xlu1 %3902  ;;  %v9827_v43 = vpop.permute.xlu0 %3952 }
 0x5a7   : > { %v4056_v10 = vsub.f32 %v9366_v48, %v3903_v61  ;;  %v4152_v32 = vperm.slane %v3903_v61, %v9523_v54  ;;  %v4158_v48 = vperm.slane %v9768_v6, %v9523_v54  ;;  %v4066_v34 = vsub.f32 %v9402_v1, %v9827_v43 }
 0x5a8   : > { %7726 = vset.pattern.permute.xlu1 %v9085_v56  ;;  %7727 = vset.pattern.permute.xlu2 %v9093_v25 }
 0x5a9   : > { %v4089_v45 = vmul.f32 1.442695, %v4056_v10  ;;  %v4153_v0 = vsel %vm3519_vm8, %v4152_v32, %v4151_v44  ;;  %v4159_v15 = vsel %vm3519_vm8, %v4158_v48, %v4157_v42  ;;  %v4109_v1 = vmul.f32 1.442695, %v4066_v34  ;;  %v11300_v42 = vld [vmem:[#allocation50_spill] sm:$0xff] }
 0x5aa   : > { %v4113_v48 = vmul.f32 1.442695, %v4068_v57 }
 0x5ab   : > { %7745 = vpow2.f32 %v4089_v45 }
 0x5ac   : > { %7747 = vpow2.f32 %v4091_v2 }
 0x5ae   : > { %v3913_v18 = vpop.permute.xlu1 %3912  ;;  %v9850_v38 = vpop.permute.xlu0 %3967 }
 0x5af   : > { %v4058_v13 = vsub.f32 %v9368_v29, %v3913_v18  ;;  %v4155_v63 = vperm.slane %v3913_v18, %v9523_v54  ;;  %v9876_v18 = vpop.permute.xlu2 %3977 }
 0x5b1   : > { %v9822_v47 = vpop.eup %7745  ;;  %v4093_v6 = vmul.f32 1.442695, %v4058_v13  ;;  %v4156_v37 = vsel %vm3519_vm8, %v4155_v63, %v4154_v53 }
 0x5b2   : > { %v5178_v29 = vpack.c.bf16 %v9822_v47, %v9822_v47  ;;  %v4199_v33 = vsel %vm3566_vm9, %v4156_v37, %v4153_v0  ;;  %v7748_v46 = vpop.eup %7747 }
 0x5b3   : > { %7749 = vpow2.f32 %v4093_v6  ;;  %v9835_v27 = vsel %vm3568_vm10, %v4159_v15, %v4199_v33  ;;  %v5179_v41 = vpack.c.bf16 %v7748_v46, %v7748_v46  ;;  %v4557_v2 = vsel %vm3291_vm6, %v7748_v46, 0.0  ;;  %v11301_v6 = vld [vmem:[#allocation48_spill] sm:$0xff]  ;;  %v11302_v33 = vld [vmem:[#allocation46_spill] sm:$0xff]  ;;  %v11303_v46 = vld [vmem:[#allocation45_spill] sm:$0xff] }
 0x5b4   : > { %v5212_v14 = vunpack.c.l.b16 %v5178_v29  ;;  %7751 = vpow2.f32 %v4101_v52  ;;  %v4071_v37 = vsub.f32 %v11301_v6, %v9876_v18  ;;  %v4069_v52 = vsub.f32 %v11302_v33, %v9850_v38 }
 0x5b6   : > { %v9841_v59 = vpop.permute.xlu1 %3927  ;;  %v5213_v23 = vpack.c.b16 %v5212_v14, %v5211_v19  ;;  %v7602_v14 = vld [vmem:[#allocation3 + $0x58] sm:$0xff] }
 0x5b7   : > { %v4061_v26 = vsub.f32 %v9376_v11, %v9841_v59  ;;  %v5239_v11 = vunpack.c.l.b16 %v5179_v41  ;;  %v4554_v41 = vsel %vm3291_vm6, %v9822_v47, 0.0 }
 0x5b8   : > { %7379 = vmatmul.msk.bf16.vlgmr.msrb.gmra.mxu0 %vm3291_vm6, %v5213_v23  ;;  %v4551_v23 = vsel %vm3291_vm6, %v9805_v62, 0.0 }
 0x5b9   : > { %v9848_v55 = vpop.eup %7749  ;;  %v4099_v49 = vmul.f32 1.442695, %v4061_v26  ;;  %5454 = vmatpush.bf16.msrb.mxu0 %v7599_v22 }
 0x5ba   : > { %v5180_v39 = vpack.c.bf16 %v9848_v55, %v9848_v55  ;;  %v9856_v16 = vpop.eup %7751  ;;  %v9872_v53 = vpop.permute.xlu0 %3982 }
 0x5bb   : > { %7753 = vpow2.f32 %v4099_v49  ;;  %v5184_v61 = vpack.c.bf16 %v9856_v16, %v9856_v16  ;;  %v4072_v8 = vsub.f32 %v11300_v42, %v9872_v53  ;;  %v4560_v42 = vsel %vm3291_vm6, %v9848_v55, 0.0 }
 0x5bc   : > { %v5240_v36 = vunpack.c.l.b16 %v5180_v39  ;;  %7755 = vpow2.f32 %v4109_v1 }
 0x5bd   : > { %7757 = vpow2.f32 %v4107_v3  ;;  %v5296_v44 = vunpack.c.l.b16 %v5184_v61  ;;  %v4121_v26 = vmul.f32 1.442695, %v4072_v8  ;;  %v4119_v3 = vmul.f32 1.442695, %v4071_v37 }
 0x5be   : > { %v9858_v50 = vpop.permute.xlu1 %3942  ;;  %v5241_v9 = vpack.c.b16 %v5240_v36, %v5239_v11  ;;  %7759 = vpow2.f32 %v4103_v35  ;;  %v4115_v35 = vmul.f32 1.442695, %v4069_v52  ;;  %v9904_v36 = vpop.permute.xlu2 %3992  ;;  %v4566_v8 = vsel %vm3291_vm6, %v9778_v30, 0.0 }
 0x5bf   : > { %v4064_v17 = vsub.f32 %v11299_v12, %v9858_v50 }
 0x5c0   : > { %7384 = vmatmul.msk.bf16.vlgmr.msrb.gmra.mxu1 %vm3291_vm6, %v5241_v9 }
 0x5c1   : > { %v9867_v10 = vpop.eup %7753  ;;  %v4105_v45 = vmul.f32 1.442695, %v4064_v17  ;;  %5482 = vmatpush.bf16.msrb.mxu1 %v7600_v31  ;;  %v11304_v31 = vld [vmem:[#allocation51_spill] sm:$0xff] }
 0x5c2   : > { %v5183_v32 = vpack.c.bf16 %v9867_v10, %v9867_v10  ;;  %4558 = vadd.xlane.f32.xlu0 %v4557_v2  ;;  %v9874_v7 = vpop.eup %7755  ;;  %v4074_v61 = vsub.f32 %v11304_v31, %v9904_v36 }
 0x5c3   : > { %7761 = vpow2.f32 %v4105_v45  ;;  %v7758_v58 = vpop.eup %7757  ;;  %v5188_v0 = vpack.c.bf16 %v9874_v7, %v9874_v7  ;;  %v11305_v45 = vld [vmem:[#allocation47_spill] sm:$0xff] }
 0x5c4   : > { %v5295_v13 = vunpack.c.l.b16 %v5183_v32  ;;  %v9878_v63 = vpop.eup %7759  ;;  %7763 = vpow2.f32 %v4113_v48  ;;  %v5187_v34 = vpack.c.bf16 %v7758_v58, %v7758_v58  ;;  %v4581_v1 = vsel %vm3291_vm6, %v7758_v58, 0.0  ;;  %v7603_v32 = vld [vmem:[#allocation3 + $0x60] sm:$0xff]  ;;  %v7604_v48 = vld [vmem:[#allocation3 + $0x68] sm:$0xff] }
 0x5c5   : > { %v5185_v4 = vpack.c.bf16 %v9878_v63, %v9878_v63  ;;  %v5352_v49 = vunpack.c.l.b16 %v5188_v0 }
 0x5c6   : > { %v5297_v15 = vpack.c.b16 %v5296_v44, %v5295_v13  ;;  %v9886_v29 = vpop.permute.xlu1 %3957  ;;  %v5351_v62 = vunpack.c.l.b16 %v5187_v34 }
 0x5c7   : > { %v4067_v19 = vsub.f32 %v11303_v46, %v9886_v29  ;;  %v5323_v11 = vunpack.c.l.b16 %v5185_v4  ;;  %v9927_v46 = vpop.permute.xlu2 %4007 }
 0x5c8   : > { %7394 = vmatmul.msk.bf16.vlgmr.msra.gmra.mxu3 %vm3291_vm6, %v5297_v15  ;;  %v5353_v12 = vpack.c.b16 %v5352_v49, %v5351_v62  ;;  %v4125_v15 = vmul.f32 1.442695, %v4074_v61  ;;  %v4563_v62 = vsel %vm3291_vm6, %v9773_v28, 0.0 }
 0x5c9   : > { %v9897_v21 = vpop.eup %7761  ;;  %v4111_v22 = vmul.f32 1.442695, %v4067_v19  ;;  %5538 = vmatpush.bf16.msra.mxu3 %v7602_v14  ;;  %4552 = vadd.xlane.f32.xlu2 %v4551_v23  ;;  %v11306_v23 = vld [vmem:[#allocation52_spill] sm:$0xff] }
 0x5ca   : > { %v5186_v39 = vpack.c.bf16 %v9897_v21, %v9897_v21  ;;  %4555 = vadd.xlane.f32.xlu1 %v4554_v41  ;;  %4582 = vadd.xlane.f32.xlu0 %v4581_v1  ;;  %v7764_v57 = vpop.eup %7763  ;;  %v7605_v1 = vld [vmem:[#allocation3 + $0x70] sm:$0xff] }
 0x5cb   : > { %7765 = vpow2.f32 %v4111_v22  ;;  %v5190_v58 = vpack.c.bf16 %v7764_v57, %v7764_v57  ;;  %v4590_v6 = vsel %vm3291_vm6, %v7764_v57, 0.0  ;;  %v11307_v22 = vld [vmem:[#allocation49_spill] sm:$0xff] }
 0x5cc   : > { %v5324_v9 = vunpack.c.l.b16 %v5186_v39  ;;  %7767 = vpow2.f32 %v4121_v26 }
 0x5cd   : > { %7769 = vpow2.f32 %v4119_v3  ;;  %v5380_v52 = vunpack.c.l.b16 %v5190_v58 }
 0x5ce   : > { %v5325_v47 = vpack.c.b16 %v5324_v9, %v5323_v11  ;;  %v9906_v17 = vpop.permute.xlu1 %3972  ;;  %7771 = vpow2.f32 %v4115_v35  ;;  %v4572_v11 = vsel %vm3291_vm6, %v9856_v16, 0.0  ;;  %v11308_v16 = vld [vmem:[#allocation58_spill] sm:$0xff] }
 0x5cf   : > { %v4070_v2 = vsub.f32 %v11305_v45, %v9906_v17 }
 0x5d0   : > { %7399 = vmatmul.msk.bf16.vlgmr.msra.gmra.mxu0 %vm3291_vm6, %v5325_v47  ;;  %7404 = vmatmul.msk.bf16.vlgmr.msra.gmra.mxu1 %vm3291_vm6, %v5353_v12 }
 0x5d1   : > { %v9914_v44 = vpop.eup %7765  ;;  %v4117_v13 = vmul.f32 1.442695, %v4070_v2  ;;  %5566 = vmatpush.bf16.msra.mxu0 %v7603_v32  ;;  %5594 = vmatpush.bf16.msra.mxu1 %v7604_v48 }
 0x5d2   : > { %v5189_v0 = vpack.c.bf16 %v9914_v44, %v9914_v44  ;;  %4561 = vadd.xlane.f32.xlu2 %v4560_v42  ;;  %4567 = vadd.xlane.f32.xlu1 %v4566_v8  ;;  %v9923_v37 = vpop.eup %7767  ;;  %v9929_v19 = vpop.permute.xlu0 %3997  ;;  %v7606_v8 = vld [vmem:[#allocation3 + $0x78] sm:$0xff] }
 0x5d3   : > { %7773 = vpow2.f32 %v4117_v13  ;;  %4591 = vadd.xlane.f32.xlu0 %v4590_v6  ;;  %v9925_v33 = vpop.eup %7769  ;;  %v5194_v14 = vpack.c.bf16 %v9923_v37, %v9923_v37  ;;  %v4075_v26 = vsub.f32 %v11306_v23, %v9929_v19  ;;  %v11309_v13 = vld [vmem:[#allocation54_spill] sm:$0xff] }
 0x5d4   : > { %v5379_v55 = vunpack.c.l.b16 %v5189_v0  ;;  %v9931_v30 = vpop.eup %7771  ;;  %7775 = vpow2.f32 %v4125_v15  ;;  %v5193_v49 = vpack.c.bf16 %v9925_v33, %v9925_v33  ;;  %v7625_v0 = vld [vmem:[#allocation5] sm:$0xff] }
 0x5d5   : > { %v5191_v3 = vpack.c.bf16 %v9931_v30, %v9931_v30  ;;  %v5436_v9 = vunpack.c.l.b16 %v5194_v14  ;;  %v4127_v12 = vmul.f32 1.442695, %v4075_v26  ;;  %v4578_v14 = vsel %vm3291_vm6, %v9897_v21, 0.0  ;;  %v11311_v21 = vld [vmem:[#allocation56_spill] sm:$0xff] }
 0x5d6   : > { %v5381_v34 = vpack.c.b16 %v5380_v52, %v5379_v55  ;;  %v9935_v4 = vpop.permute.xlu1 %3987  ;;  %v5435_v47 = vunpack.c.l.b16 %v5193_v49  ;;  %v4569_v55 = vsel %vm3291_vm6, %v9867_v10, 0.0 }
 0x5d7   : > { %v4073_v41 = vsub.f32 %v11307_v22, %v9935_v4  ;;  %v5407_v31 = vunpack.c.l.b16 %v5191_v3 }
 0x5d8   : > { %7409 = vmatmul.msk.bf16.vlgmr.msrb.gmra.mxu2 %vm3291_vm6, %v5381_v34  ;;  %v5437_v32 = vpack.c.b16 %v5436_v9, %v5435_v47  ;;  %v11310_v34 = vld [vmem:[#allocation53_spill] sm:$0xff]  ;;  %v4575_v47 = vsel %vm3291_vm6, %v9878_v63, 0.0 }
 0x5d9   : > { %v9946_v39 = vpop.eup %7773  ;;  %v4123_v35 = vmul.f32 1.442695, %v4073_v41  ;;  %5622 = vmatpush.bf16.msrb.mxu2 %v7605_v1  ;;  %v4077_v23 = vsub.f32 %v11310_v34, %v9927_v46 }
 0x5da   : > { %v5192_v57 = vpack.c.bf16 %v9946_v39, %v9946_v39  ;;  %4564 = vadd.xlane.f32.xlu2 %v4563_v62  ;;  %4573 = vadd.xlane.f32.xlu1 %v4572_v11  ;;  %v9954_v45 = vpop.permute.xlu2 %4022  ;;  %v9956_v2 = vpop.eup %7775  ;;  %v7626_v11 = vld [vmem:[#allocation5 + $0x8] sm:$0xff] }
 0x5db   : > { %7777 = vpow2.f32 %v4123_v35  ;;  %v4080_v58 = vsub.f32 %v11308_v16, %v9954_v45  ;;  %v5196_v6 = vpack.c.bf16 %v9956_v2, %v9956_v2  ;;  %v4131_v3 = vmul.f32 1.442695, %v4077_v23 }
 0x5dc   : > { %v5408_v61 = vunpack.c.l.b16 %v5192_v57  ;;  %7779 = vpow2.f32 %v4127_v12  ;;  %v4596_v23 = vsel %vm3291_vm6, %v9946_v39, 0.0  ;;  %v4173_v39 = vperm.slane %v9906_v17, %v9523_v54 }
 0x5dd   : > { %v4137_v22 = vmul.f32 1.442695, %v4080_v58  ;;  %v5464_v41 = vunpack.c.l.b16 %v5196_v6  ;;  %v7627_v6 = vld [vmem:[#allocation5 + $0x10] sm:$0xff] }
 0x5de   : > { %v5409_v28 = vpack.c.b16 %v5408_v61, %v5407_v31  ;;  %v9958_v48 = vpop.permute.xlu1 %4002  ;;  %v4587_v31 = vsel %vm3291_vm6, %v9914_v44, 0.0  ;;  %v4160_v44 = vperm.slane %v9841_v59, %v9104_v40  ;;  %v4163_v59 = vperm.slane %v9801_v5, %v9104_v40 }
 0x5df   : > { %v4076_v42 = vsub.f32 %v11309_v13, %v9958_v48  ;;  %v4169_v5 = vperm.slane %v9886_v29, %v9104_v40  ;;  %v4172_v29 = vperm.slane %v9850_v38, %v9104_v40  ;;  %v4593_v38 = vsel %vm3291_vm6, %v9931_v30, 0.0 }
 0x5e0   : > { %7414 = vmatmul.msk.bf16.vlgmr.msrb.gmra.mxu3 %vm3291_vm6, %v5409_v28  ;;  %7419 = vmatmul.msk.bf16.vlgmr.msrb.gmra.mxu0 %vm3291_vm6, %v5437_v32  ;;  %v11312_v28 = vld [vmem:[#allocation55_spill] sm:$0xff] }
 0x5e1   : > { %v9968_v15 = vpop.eup %7777  ;;  %v4129_v52 = vmul.f32 1.442695, %v4076_v42  ;;  %5650 = vmatpush.bf16.msrb.mxu3 %v7606_v8  ;;  %5742 = vmatpush.bf16.msrb.mxu0 %v7625_v0  ;;  %v4164_v0 = vperm.slane %v9858_v50, %v9523_v54  ;;  %v4584_v50 = vsel %vm3291_vm6, %v9874_v7, 0.0 }
 0x5e2   : > { %v5195_v26 = vpack.c.bf16 %v9968_v15, %v9968_v15  ;;  %4570 = vadd.xlane.f32.xlu2 %v4569_v55  ;;  %4579 = vadd.xlane.f32.xlu1 %v4578_v14  ;;  %v9978_v49 = vpop.eup %7779  ;;  %v4161_v55 = vperm.slane %v9803_v60, %v9523_v54 }
 0x5e3   : > { %7781 = vpow2.f32 %v4129_v52  ;;  %v5197_v9 = vpack.c.bf16 %v9978_v49, %v9978_v49 }
 0x5e4   : > { %v5463_v1 = vunpack.c.l.b16 %v5195_v26  ;;  %7783 = vpow2.f32 %v4137_v22  ;;  %v4162_v26 = vsel %vm3519_vm8, %v4161_v55, %v4160_v44  ;;  %v4167_v22 = vperm.slane %v9827_v43, %v9523_v54 }
 0x5e5   : > { %7785 = vpow2.f32 %v4131_v3  ;;  %v5491_v58 = vunpack.c.l.b16 %v5197_v9  ;;  %v4170_v43 = vperm.slane %v9854_v24, %v9523_v54 }
 0x5e6   : > { %v5465_v35 = vpack.c.b16 %v5464_v41, %v5463_v1  ;;  %v9980_v10 = vpop.permute.xlu1 %4017  ;;  %v4165_v41 = vsel %vm3519_vm8, %v4164_v0, %v4163_v59  ;;  %v7628_v0 = vld [vmem:[#allocation5 + $0x18] sm:$0xff]  ;;  %v11314_v59 = vld [vmem:[#allocation60_spill] sm:$0xff] }
 0x5e7   : > { %v4079_v62 = vsub.f32 %v11311_v21, %v9980_v10  ;;  %v4166_v21 = vperm.slane %v9832_v51, %v9104_v40 }
 0x5e8   : > { %7424 = vmatmul.msk.bf16.vlgmr.msrb.gmra.mxu1 %vm3291_vm6, %v5465_v35 }
 0x5e9   : > { %v9987_v57 = vpop.eup %7781  ;;  %v4135_v12 = vmul.f32 1.442695, %v4079_v62  ;;  %5770 = vmatpush.bf16.msrb.mxu1 %v7626_v11  ;;  %v4201_v62 = vsel %vm3570_vm11, %v4162_v26, %v9835_v27  ;;  %v4168_v51 = vsel %vm3519_vm8, %v4167_v22, %v4166_v21  ;;  %v4174_v27 = vsel %vm3519_vm8, %v4173_v39, %v4172_v29 }
 0x5ea   : > { %v5198_v61 = vpack.c.bf16 %v9987_v57, %v9987_v57  ;;  %4576 = vadd.xlane.f32.xlu2 %v4575_v47  ;;  %v9995_v32 = vpop.permute.xlu0 %4012  ;;  %4588 = vadd.xlane.f32.xlu1 %v4587_v31  ;;  %v9999_v42 = vpop.eup %7783  ;;  %v4202_v9 = vsel %vm3572_vm12, %v4165_v41, %v4201_v62  ;;  %v4171_v47 = vsel %vm3519_vm8, %v4170_v43, %v4169_v5  ;;  %v4614_v55 = vsel %vm3291_vm6, %v9987_v57, 0.0  ;;  %v11316_v43 = vld [vmem:[#allocation62_spill] sm:$0xff]  ;;  %v11317_v62 = vld [vmem:[#allocation63_spill] sm:$0xff] }
 0x5eb   : > { %7787 = vpow2.f32 %v4135_v12  ;;  %v4078_v16 = vsub.f32 %v11312_v28, %v9995_v32  ;;  %v10005_v52 = vpop.eup %7785  ;;  %v5202_v14 = vpack.c.bf16 %v9999_v42, %v9999_v42  ;;  %v7629_v12 = vld [vmem:[#allocation5 + $0x20] sm:$0xff]  ;;  %v4605_v28 = vsel %vm3291_vm6, %v9968_v15, 0.0 }
 0x5ec   : > { %v5492_v13 = vunpack.c.l.b16 %v5198_v61  ;;  %v5199_v7 = vpack.c.bf16 %v10005_v52, %v10005_v52  ;;  %v4602_v15 = vsel %vm3291_vm6, %v9923_v37, 0.0  ;;  %v4178_v22 = vperm.slane %v9935_v4, %v9104_v40 }
 0x5ed   : > { %v4133_v63 = vmul.f32 1.442695, %v4078_v16  ;;  %v5548_v1 = vunpack.c.l.b16 %v5202_v14  ;;  %v4203_v16 = vsel %vm3574_vm13, %v4168_v51, %v4202_v9  ;;  %v4176_v37 = vperm.slane %v9872_v53, %v9523_v54 }
 0x5ee   : > { %v5493_v8 = vpack.c.b16 %v5492_v13, %v5491_v58  ;;  %v5519_v31 = vunpack.c.l.b16 %v5199_v7  ;;  %v10047_v24 = vpop.permute.xlu1 %4032  ;;  %v4204_v13 = vsel %vm3576_vm14, %v4171_v47, %v4203_v16  ;;  %v4182_v57 = vperm.slane %v9958_v48, %v9523_v54 }
 0x5ef   : > { %7789 = vpow2.f32 %v4133_v63  ;;  %v11313_v63 = vld [vmem:[#allocation59_spill] sm:$0xff]  ;;  %v4179_v39 = vperm.slane %v9904_v36, %v9523_v54  ;;  %v4175_v53 = vperm.slane %v9876_v18, %v9104_v40  ;;  %v4184_v48 = vperm.slane %v9927_v46, %v9104_v40 }
 0x5f0   : > { %7429 = vmatmul.msk.bf16.vlgmr.msra.gmra.mxu2 %vm3291_vm6, %v5493_v8  ;;  %v4082_v44 = vsub.f32 %v11313_v63, %v10047_v24  ;;  %v4205_v8 = vsel %vm3578_vm15, %v4174_v27, %v4204_v13  ;;  %v4181_v21 = vperm.slane %v9929_v19, %v9104_v40  ;;  %v4187_v46 = vperm.slane %v9980_v10, %v9104_v40 }
 0x5f1   : > { %v10012_v34 = vpop.eup %7787  ;;  %5798 = vmatpush.bf16.msra.mxu2 %v7627_v6  ;;  %v4188_v51 = vperm.slane %v9954_v45, %v9523_v54 }
 0x5f2   : > { %v5201_v60 = vpack.c.bf16 %v10012_v34, %v10012_v34  ;;  %4585 = vadd.xlane.f32.xlu2 %v4584_v50  ;;  %4597 = vadd.xlane.f32.xlu1 %v4596_v23  ;;  %v4038_v30 = vpop.permute.xlu2 %4037  ;;  %v4141_v6 = vmul.f32 1.442695, %v4082_v44  ;;  %v11315_v23 = vld [vmem:[#allocation57_spill] sm:$0xff]  ;;  %v4623_v4 = vsel %vm3291_vm6, %v10012_v34, 0.0  ;;  %v4177_v34 = vsel %vm3519_vm8, %v4176_v37, %v4175_v53  ;;  %v7631_v53 = vld [vmem:[#allocation5 + $0x30] sm:$0xff] }
 0x5f3   : > { %v4083_v50 = vsub.f32 %v11314_v59, %v4038_v30  ;;  %v4183_v18 = vsel %vm3519_vm8, %v4182_v57, %v4181_v21  ;;  %v4189_v45 = vsel %vm3519_vm8, %v4188_v51, %v4187_v46  ;;  %v4617_v46 = vsel %vm3291_vm6, %v10005_v52, 0.0 }
 0x5f4   : > { %v5547_v3 = vunpack.c.l.b16 %v5201_v60  ;;  %7791 = vpow2.f32 %v4141_v6 }
 0x5f5   : > { %v10032_v35 = vpop.eup %7789  ;;  %v4143_v41 = vmul.f32 1.442695, %v4083_v50  ;;  %v7630_v50 = vld [vmem:[#allocation5 + $0x28] sm:$0xff] }
 0x5f6   : > { %v5549_v11 = vpack.c.b16 %v5548_v1, %v5547_v3  ;;  %v5200_v17 = vpack.c.bf16 %v10032_v35, %v10032_v35  ;;  %v4185_v1 = vperm.slane %v9995_v32, %v9523_v54  ;;  %v4611_v3 = vsel %vm3291_vm6, %v9978_v49, 0.0 }
 0x5f7   : > { %v4180_v32 = vsel %vm3519_vm8, %v4179_v39, %v4178_v22 }
 0x5f8   : > { %v5520_v61 = vunpack.c.l.b16 %v5200_v17  ;;  %7439 = vmatmul.msk.bf16.vlgmr.msra.gmra.mxu0 %vm3291_vm6, %v5549_v11  ;;  %v4186_v19 = vsel %vm3519_vm8, %v4185_v1, %v4184_v48  ;;  %v4206_v47 = vsel %vm3566_vm9, %v4180_v32, %v4177_v34  ;;  %v7632_v34 = vld [vmem:[#allocation5 + $0x38] sm:$0xff] }
 0x5f9   : > { %5854 = vmatpush.bf16.msra.mxu0 %v7629_v12  ;;  %v4207_v27 = vsel %vm3568_vm10, %v4183_v18, %v4206_v47  ;;  %v4599_v18 = vsel %vm3291_vm6, %v9925_v33, 0.0 }
 0x5fa   : > { %v5521_v58 = vpack.c.b16 %v5520_v61, %v5519_v31  ;;  %4594 = vadd.xlane.f32.xlu2 %v4593_v38  ;;  %4606 = vadd.xlane.f32.xlu1 %v4605_v28  ;;  %v4053_v5 = vpop.permute.xlu2 %4052  ;;  %v7792_v7 = vpop.eup %7791  ;;  %v4191_v38 = vperm.slane %v10047_v24, %v9523_v54  ;;  %v4208_v10 = vsel %vm3570_vm11, %v4186_v19, %v4207_v27 }
 0x5fb   : > { %v4086_v49 = vsub.f32 %v11316_v43, %v4053_v5  ;;  %v5204_v11 = vpack.c.bf16 %v7792_v7, %v7792_v7  ;;  %v4197_v24 = vperm.slane %v4053_v5, %v9523_v54 }
 0x5fc   : > { %4215 = vxpose.xlu0.b32.start [1/2] (short) (narrow) %v4205_v8, 16  ;;  %7434 = vmatmul.msk.bf16.vlgmr.msra.gmra.mxu3 %vm3291_vm6, %v5521_v58  ;;  %v4193_v58 = vperm.slane %v4038_v30, %v9104_v40  ;;  %v4620_v8 = vsel %vm3291_vm6, %v10032_v35, 0.0  ;;  %v11318_v30 = vld [vmem:[#allocation61_spill] sm:$0xff] }
 0x5fd   : > { %5826 = vmatpush.bf16.msra.mxu3 %v7628_v0  ;;  %v4149_v28 = vmul.f32 1.442695, %v4086_v49  ;;  %v5576_v16 = vunpack.c.l.b16 %v5204_v11  ;;  %v4632_v0 = vsel %vm3291_vm6, %v7792_v7, 0.0  ;;  %v4608_v11 = vsel %vm3291_vm6, %v9956_v2, 0.0 }
 0x602   : > { %4603 = vadd.xlane.f32.xlu2 %v4602_v15  ;;  %v4028_v14 = vpop.permute.xlu0 %4027  ;;  %4615 = vadd.xlane.f32.xlu1 %v4614_v55 }
 0x603   : > { %v4081_v26 = vsub.f32 %v11315_v23, %v4028_v14  ;;  %v4190_v9 = vperm.slane %v4028_v14, %v9104_v40  ;;  %v4209_v23 = vsel %vm3572_vm12, %v4189_v45, %v4208_v10 }
 0x605   : > { %v4139_v60 = vmul.f32 1.442695, %v4081_v26  ;;  %v4192_v44 = vsel %vm3519_vm8, %v4191_v38, %v4190_v9  ;;  %v4626_v9 = vsel %vm3291_vm6, %v9999_v42, 0.0 }
 0x606   : > { %v4210_v26 = vsel %vm3574_vm13, %v4192_v44, %v4209_v23 }
 0x607   : > { %7793 = vpow2.f32 %v4139_v60 }
 0x608   : > { %7795 = vpow2.f32 %v4143_v41 }
 0x60a   : > { %4612 = vadd.xlane.f32.xlu2 %v4611_v3  ;;  %v4043_v36 = vpop.permute.xlu0 %4042  ;;  %4624 = vadd.xlane.f32.xlu1 %v4623_v4 }
 0x60b   : > { %v4084_v29 = vsub.f32 %v11317_v62, %v4043_v36  ;;  %v4194_v61 = vperm.slane %v4043_v36, %v9523_v54 }
 0x60d   : > { %v7794_v17 = vpop.eup %7793  ;;  %v4145_v12 = vmul.f32 1.442695, %v4084_v29  ;;  %v4195_v15 = vsel %vm3519_vm8, %v4194_v61, %v4193_v58 }
 0x60e   : > { %v5203_v31 = vpack.c.bf16 %v7794_v17, %v7794_v17  ;;  %v10105_v63 = vpop.eup %7795  ;;  %v4211_v37 = vsel %vm3576_vm14, %v4195_v15, %v4210_v26  ;;  %v4629_v3 = vsel %vm3291_vm6, %v7794_v17, 0.0 }
 0x60f   : > { %7797 = vpow2.f32 %v4145_v12  ;;  %v5205_v35 = vpack.c.bf16 %v10105_v63, %v10105_v63  ;;  %v4635_v2 = vsel %vm3291_vm6, %v10105_v63, 0.0 }
 0x610   : > { %v5575_v13 = vunpack.c.l.b16 %v5203_v31  ;;  %7799 = vpow2.f32 %v4149_v28 }
 0x611   : > { %v5603_v7 = vunpack.c.l.b16 %v5205_v35 }
 0x612   : > { %v5577_v6 = vpack.c.b16 %v5576_v16, %v5575_v13  ;;  %4621 = vadd.xlane.f32.xlu2 %v4620_v8  ;;  %v4048_v55 = vpop.permute.xlu1 %4047  ;;  %4633 = vadd.xlane.f32.xlu1 %v4632_v0 }
 0x613   : > { %v4085_v14 = vsub.f32 %v11318_v30, %v4048_v55  ;;  %v4196_v59 = vperm.slane %v4048_v55, %v9104_v40 }
 0x614   : > { %7444 = vmatmul.msk.bf16.vlgmr.msra.gmra.mxu1 %vm3291_vm6, %v5577_v6 }
 0x615   : > { %v7798_v60 = vpop.eup %7797  ;;  %v4147_v22 = vmul.f32 1.442695, %v4085_v14  ;;  %5882 = vmatpush.bf16.msra.mxu1 %v7630_v50  ;;  %v4198_v41 = vsel %vm3519_vm8, %v4197_v24, %v4196_v59 }
 0x616   : > { %v5206_v57 = vpack.c.bf16 %v7798_v60, %v7798_v60  ;;  %v4212_v5 = vsel %vm3578_vm15, %v4198_v41, %v4211_v37  ;;  %v7800_v1 = vpop.eup %7799  ;;  %v4638_v62 = vsel %vm3291_vm6, %v7798_v60, 0.0 }
 0x617   : > { %7801 = vpow2.f32 %v4147_v22  ;;  %4216 = vxpose.xlu0.b32.end [2/2] (short) (narrow) %v4212_v5, 16  ;;  %v5208_v48 = vpack.c.bf16 %v7800_v1, %v7800_v1  ;;  %v4644_v52 = vsel %vm3291_vm6, %v7800_v1, 0.0 }
 0x618   : > { %v5604_v39 = vunpack.c.l.b16 %v5206_v57 }
 0x619   : > { %v5632_v43 = vunpack.c.l.b16 %v5208_v48 }
 0x61a   : > { %v5605_v4 = vpack.c.b16 %v5604_v39, %v5603_v7  ;;  %4630 = vadd.xlane.f32.xlu2 %v4629_v3 }
 0x61c   : > { %7449 = vmatmul.msk.bf16.vlgmr.msrb.gmra.mxu2 %vm3291_vm6, %v5605_v4 }
 0x61d   : > { %v7802_v21 = vpop.eup %7801  ;;  %5910 = vmatpush.bf16.msrb.mxu2 %v7631_v53 }
 0x61e   : > { %v5207_v36 = vpack.c.bf16 %v7802_v21, %v7802_v21  ;;  %v4641_v32 = vsel %vm3291_vm6, %v7802_v21, 0.0  ;;  %v11324_v21 = vld [vmem:[#allocation28_spill] sm:$0xff] }
 0x61f   : > { %4642 = vadd.xlane.f32.xlu1 %v4641_v32 }
 0x620   : > { %v5631_v49 = vunpack.c.l.b16 %v5207_v36 }
 0x622   : > { %v5633_v29 = vpack.c.b16 %v5632_v43, %v5631_v49  ;;  %4639 = vadd.xlane.f32.xlu2 %v4638_v62 }
 0x624   : > { %7454 = vmatmul.msk.bf16.vlgmr.msrb.gmra.mxu3 %vm3291_vm6, %v5633_v29 }
 0x625   : > { %5938 = vmatpush.bf16.msrb.mxu3 %v7632_v34  ;;  %v11325_v34 = vld [vmem:[#allocation31_spill] sm:$0xff] }
 0x635   : > { %v10134_v17 = vpop.xlane.xlu0 %4558 }
 0x63c   : > { %v10138_v19 = vpop.xlane.xlu2 %4552 }
 0x63d   : > { %v10142_v12 = vpop.xlane.xlu0 %4582  ;;  %v10155_v38 = vpop.xlane.xlu1 %4555 }
 0x645   : > { %v10144_v33 = vpop.xlane.xlu2 %4561  ;;  %v10159_v58 = vpop.xlane.xlu1 %4567 }
 0x646   : > { %v10148_v47 = vpop.xlane.xlu0 %4591 }
 0x64d   : > { %v10150_v51 = vpop.xlane.xlu2 %4564  ;;  %v10163_v45 = vpop.xlane.xlu1 %4573 }
 0x655   : > { %v10153_v42 = vpop.xlane.xlu2 %4570  ;;  %v10167_v0 = vpop.xlane.xlu1 %4579 }
 0x65d   : > { %v10157_v28 = vpop.xlane.xlu2 %4576  ;;  %v10171_v15 = vpop.xlane.xlu1 %4588 }
 0x665   : > { %v10161_v13 = vpop.xlane.xlu2 %4585  ;;  %v10179_v59 = vpop.xlane.xlu1 %4597 }
 0x66d   : > { %v10165_v8 = vpop.xlane.xlu2 %4594  ;;  %v10184_v35 = vpop.xlane.xlu1 %4606 }
 0x675   : > { %v10169_v6 = vpop.xlane.xlu2 %4603  ;;  %v10189_v22 = vpop.xlane.xlu1 %4615 }
 0x67d   : > { %v10175_v55 = vpop.xlane.xlu2 %4612  ;;  %v10195_v5 = vpop.xlane.xlu1 %4624 }
 0x67e   : > { %7728 = vset.pattern.permute.xlu0 %v9085_v56  ;;  %11321 = vst [vmem:[#allocation48_spill] sm:$0xff] %v10195_v5 }
 0x685   : > { %v10182_v23 = vpop.xlane.xlu2 %4621  ;;  %v10198_v1 = vpop.xlane.xlu1 %4633 }
 0x686   : > { %11322 = vst [vmem:[#allocation46_spill] sm:$0xff] %v10198_v1 }
 0x688   : > { %4600 = vadd.xlane.f32.xlu0 %v4599_v18 }
 0x68d   : > { %v10187_v60 = vpop.xlane.xlu2 %4630 }
 0x68e   : > { %11319 = vst [vmem:[#allocation44_spill] sm:$0xff] %v10187_v60 }
 0x690   : > { %4609 = vadd.xlane.f32.xlu0 %v4608_v11  ;;  %v11326_v11 = vld [vmem:[#allocation30_spill] sm:$0xff] }
 0x692   : > { %v10203_v48 = vpop.xlane.xlu1 %4642 }
 0x693   : > { %11323 = vst [vmem:[#allocation45_spill] sm:$0xff] %v10203_v48 }
 0x695   : > { %v10192_v37 = vpop.xlane.xlu2 %4639 }
 0x696   : > { %11320 = vst [vmem:[#allocation50_spill] sm:$0xff] %v10192_v37 }
 0x698   : > { %4618 = vadd.xlane.f32.xlu0 %v4617_v46 }
 0x6a0   : > { %4627 = vadd.xlane.f32.xlu0 %v4626_v9 }
 0x6a8   : > { %4636 = vadd.xlane.f32.xlu0 %v4635_v2 }
 0x6b0   : > { %4645 = vadd.xlane.f32.xlu0 %v4644_v52 }
 0x6b3   : > { %v4231_v31 = vpop.trf.xlu0 }
 0x6b4   : > { %v4247_v61 = vperm.slane %v4231_v31, 0  ;;  %v4260_v27 = vperm.slane %v4231_v31, 1  ;;  %v4325_v10 = vperm.slane %v4231_v31, 6  ;;  %v4273_v16 = vperm.slane %v4231_v31, 2 }
 0x6b5   : > { %v4286_v63 = vperm.slane %v4231_v31, 3  ;;  %v4299_v44 = vperm.slane %v4231_v31, 4  ;;  %v4312_v24 = vperm.slane %v4231_v31, 5  ;;  %v4338_v30 = vperm.slane %v4231_v31, 7 }
 0x6b6   : > { %4258 = vperm.xlu2 %7727, %v4247_v61   ;;  %4252 = vperm.xlu1 %7726, %v4247_v61  }
 0x6bb   : > { %v10177_v14 = vpop.trf.xlu0 }
 0x6bc   : > { %v4351_v50 = vperm.slane %v10177_v14, 0  ;;  %v4364_v26 = vperm.slane %v10177_v14, 1  ;;  %v4377_v41 = vperm.slane %v10177_v14, 2  ;;  %v4390_v57 = vperm.slane %v10177_v14, 3 }
 0x6bd   : > { %v4403_v39 = vperm.slane %v10177_v14, 4  ;;  %v4416_v53 = vperm.slane %v10177_v14, 5  ;;  %v4429_v43 = vperm.slane %v10177_v14, 6  ;;  %v4442_v52 = vperm.slane %v10177_v14, 7 }
 0x6be   : > { %4271 = vperm.xlu2 %7727, %v4260_v27   ;;  %4265 = vperm.xlu1 %7726, %v4260_v27  }
 0x6c4   : > { %4330 = vperm.xlu0 %7728, %v4325_v10  }
 0x6c6   : > { %4284 = vperm.xlu2 %7727, %v4273_v16   ;;  %4278 = vperm.xlu1 %7726, %v4273_v16   ;;  %v11327_v16 = vld [vmem:[#allocation34_spill] sm:$0xff] }
 0x6ce   : > { %4297 = vperm.xlu2 %7727, %v4286_v63   ;;  %4291 = vperm.xlu1 %7726, %v4286_v63  }
 0x6d6   : > { %4310 = vperm.xlu2 %7727, %v4299_v44   ;;  %4304 = vperm.xlu1 %7726, %v4299_v44   ;;  %v11328_v44 = vld [vmem:[#allocation29_spill] sm:$0xff] }
 0x6de   : > { %4323 = vperm.xlu2 %7727, %v4312_v24   ;;  %4317 = vperm.xlu1 %7726, %v4312_v24  }
 0x6e6   : > { %7730 = vset.pattern.permute.xlu2 %v9085_v56  ;;  %7729 = vset.pattern.permute.xlu1 %v9093_v25 }
 0x6ee   : > { %4343 = vperm.xlu2 %7730, %v4338_v30   ;;  %4336 = vperm.xlu1 %7729, %v4325_v10  }
 0x6f6   : > { %4349 = vperm.xlu1 %7729, %v4338_v30   ;;  %4356 = vperm.xlu2 %7730, %v4351_v50  }
 0x6fb   : > { %v10200_v4 = vpop.xlane.xlu0 %4600 }
 0x6fe   : > { %4362 = vperm.xlu1 %7729, %v4351_v50   ;;  %4369 = vperm.xlu2 %7730, %v4364_v26  }
 0x703   : > { %v10207_v62 = vpop.xlane.xlu0 %4609 }
 0x706   : > { %4375 = vperm.xlu1 %7729, %v4364_v26   ;;  %4382 = vperm.xlu2 %7730, %v4377_v41  }
 0x70b   : > { %v10214_v27 = vpop.xlane.xlu0 %4618 }
 0x70e   : > { %4388 = vperm.xlu1 %7729, %v4377_v41   ;;  %4395 = vperm.xlu2 %7730, %v4390_v57  }
 0x710   : > { %v4259_v7 = vpop.permute.xlu2 %4258 }
 0x711   : > { %v4456_v36 = vsub.f32 %v11324_v21, %v4259_v7 }
 0x713   : > { %v4489_v49 = vmul.f32 1.442695, %v4456_v36  ;;  %v11329_v36 = vld [vmem:[#allocation11_spill] sm:$0xff] }
 0x715   : > { %7803 = vpow2.f32 %v4489_v49 }
 0x716   : > { %4401 = vperm.xlu1 %7729, %v4390_v57   ;;  %4408 = vperm.xlu2 %7730, %v4403_v39  }
 0x718   : > { %v4272_v3 = vpop.permute.xlu2 %4271 }
 0x719   : > { %v4458_v18 = vsub.f32 %v11325_v34, %v4272_v3  ;;  %v10228_v34 = vpop.xlane.xlu0 %4627 }
 0x71a   : > { %11331 = vst [vmem:[#allocation51_spill] sm:$0xff] %v10228_v34 }
 0x71b   : > { %v4493_v31 = vmul.f32 1.442695, %v4458_v18  ;;  %v10212_v61 = vpop.eup %7803 }
 0x71c   : > { %v5658_v30 = vpack.c.bf16 %v10212_v61, %v10212_v61 }
 0x71e   : > { %4414 = vperm.xlu1 %7729, %v4403_v39   ;;  %4421 = vperm.xlu2 %7730, %v4416_v53   ;;  %v5724_v57 = vunpack.c.l.b16 %v5658_v30  ;;  %v11332_v30 = vld [vmem:[#allocation17_spill] sm:$0xff] }
 0x720   : > { %v4285_v32 = vpop.permute.xlu2 %4284 }
 0x721   : > { %v4460_v63 = vsub.f32 %v11327_v16, %v4285_v32 }
 0x723   : > { %v4497_v41 = vmul.f32 1.442695, %v4460_v63 }
 0x726   : > { %4427 = vperm.xlu1 %7729, %v4416_v53   ;;  %4434 = vperm.xlu2 %7730, %v4429_v43  }
 0x728   : > { %v4253_v29 = vpop.permute.xlu1 %4252  ;;  %v4298_v2 = vpop.permute.xlu2 %4297 }
 0x729   : > { %v4455_v46 = vsub.f32 %v11326_v11, %v4253_v29  ;;  %v4462_v32 = vsub.f32 %v11329_v36, %v4298_v2  ;;  %v7633_v29 = vld [vmem:[#allocation5 + $0x40] sm:$0xff]  ;;  %v10239_v36 = vpop.xlane.xlu0 %4636 }
 0x72a   : > { %11334 = vst [vmem:[#allocation47_spill] sm:$0xff] %v10239_v36 }
 0x72b   : > { %v4487_v9 = vmul.f32 1.442695, %v4455_v46 }
 0x72d   : > { %7805 = vpow2.f32 %v4487_v9 }
 0x72e   : > { %4440 = vperm.xlu1 %7729, %v4429_v43   ;;  %4447 = vperm.xlu2 %7730, %v4442_v52   ;;  %7807 = vpow2.f32 %v4493_v31  ;;  %v11330_v43 = vld [vmem:[#allocation33_spill] sm:$0xff]  ;;  %v4501_v31 = vmul.f32 1.442695, %v4462_v32 }
 0x730   : > { %v4266_v10 = vpop.permute.xlu1 %4265  ;;  %v4311_v39 = vpop.permute.xlu2 %4310 }
 0x731   : > { %v4457_v24 = vsub.f32 %v11328_v44, %v4266_v10 }
 0x733   : > { %v10220_v50 = vpop.eup %7805  ;;  %v4491_v14 = vmul.f32 1.442695, %v4457_v24 }
 0x734   : > { %v5657_v26 = vpack.c.bf16 %v10220_v50, %v10220_v50  ;;  %v10224_v3 = vpop.eup %7807 }
 0x735   : > { %7809 = vpow2.f32 %v4491_v14  ;;  %v5660_v18 = vpack.c.bf16 %v10224_v3, %v10224_v3  ;;  %v4464_v14 = vsub.f32 %v11332_v30, %v4311_v39 }
 0x736   : > { %v5723_v7 = vunpack.c.l.b16 %v5657_v26  ;;  %4453 = vperm.xlu1 %7729, %v4442_v52   ;;  %7811 = vpow2.f32 %v4497_v41  ;;  %v11333_v26 = vld [vmem:[#allocation32_spill] sm:$0xff] }
 0x737   : > { %v5752_v2 = vunpack.c.l.b16 %v5660_v18 }
 0x738   : > { %v5725_v53 = vpack.c.b16 %v5724_v57, %v5723_v7  ;;  %v4279_v21 = vpop.permute.xlu1 %4278  ;;  %v4324_v44 = vpop.permute.xlu2 %4323  ;;  %v7634_v57 = vld [vmem:[#allocation5 + $0x48] sm:$0xff] }
 0x739   : > { %v4459_v49 = vsub.f32 %v11330_v43, %v4279_v21 }
 0x73a   : > { %7459 = vmatmul.msk.bf16.vlgmr.msrb.gmra.mxu0 %vm3291_vm6, %v5725_v53 }
 0x73b   : > { %v7810_v11 = vpop.eup %7809  ;;  %v4495_v46 = vmul.f32 1.442695, %v4459_v49  ;;  %5966 = vmatpush.bf16.msrb.mxu0 %v7633_v29  ;;  %v4505_v49 = vmul.f32 1.442695, %v4464_v14 }
 0x73c   : > { %v5659_v9 = vpack.c.bf16 %v7810_v11, %v7810_v11  ;;  %v4653_v52 = vsel %vm3291_vm6, %v7810_v11, 0.0  ;;  %v7812_v16 = vpop.eup %7811 }
 0x73d   : > { %7813 = vpow2.f32 %v4495_v46  ;;  %4654 = vadd.xlane.f32.xlu0 %v4653_v52  ;;  %v5662_v7 = vpack.c.bf16 %v7812_v16, %v7812_v16  ;;  %v4662_v43 = vsel %vm3291_vm6, %v7812_v16, 0.0  ;;  %v11335_v52 = vld [vmem:[#allocation10_spill] sm:$0xff] }
 0x73e   : > { %v5751_v10 = vunpack.c.l.b16 %v5659_v9  ;;  %7815 = vpow2.f32 %v4501_v31  ;;  %v4466_v31 = vsub.f32 %v11335_v52, %v4324_v44  ;;  %v11339_v52 = vld [vmem:[#allocation16_spill] sm:$0xff] }
 0x73f   : > { %v5780_v39 = vunpack.c.l.b16 %v5662_v7 }
 0x740   : > { %v5753_v63 = vpack.c.b16 %v5752_v2, %v5751_v10  ;;  %v4292_v24 = vpop.permute.xlu1 %4291  ;;  %v11336_v2 = vld [vmem:[#allocation15_spill] sm:$0xff] }
 0x741   : > { %v4461_v41 = vsub.f32 %v11333_v26, %v4292_v24  ;;  %v4509_v26 = vmul.f32 1.442695, %v4466_v31 }
 0x742   : > { %7464 = vmatmul.msk.bf16.vlgmr.msrb.gmra.mxu1 %vm3291_vm6, %v5753_v63  ;;  %v7635_v63 = vld [vmem:[#allocation5 + $0x50] sm:$0xff] }
 0x743   : > { %v10237_v53 = vpop.eup %7813  ;;  %v4499_v21 = vmul.f32 1.442695, %v4461_v41  ;;  %5994 = vmatpush.bf16.msrb.mxu1 %v7634_v57  ;;  %v10255_v41 = vpop.xlane.xlu0 %4645 }
 0x744   : > { %v5661_v32 = vpack.c.bf16 %v10237_v53, %v10237_v53  ;;  %v10244_v18 = vpop.eup %7815  ;;  %11337 = vst [vmem:[#allocation52_spill] sm:$0xff] %v10255_v41 }
 0x745   : > { %7817 = vpow2.f32 %v4499_v21  ;;  %4663 = vadd.xlane.f32.xlu0 %v4662_v43  ;;  %v5664_v24 = vpack.c.bf16 %v10244_v18, %v10244_v18  ;;  %v11338_v43 = vld [vmem:[#allocation14_spill] sm:$0xff] }
 0x746   : > { %v5779_v29 = vunpack.c.l.b16 %v5661_v32  ;;  %7819 = vpow2.f32 %v4505_v49 }
 0x747   : > { %v5808_v44 = vunpack.c.l.b16 %v5664_v24 }
 0x748   : > { %v5781_v11 = vpack.c.b16 %v5780_v39, %v5779_v29  ;;  %v4305_v46 = vpop.permute.xlu1 %4304  ;;  %v4344_v9 = vpop.permute.xlu2 %4343  ;;  %v7636_v39 = vld [vmem:[#allocation5 + $0x58] sm:$0xff] }
 0x749   : > { %v4463_v10 = vsub.f32 %v11336_v2, %v4305_v46  ;;  %v4469_v31 = vsub.f32 %v11339_v52, %v4344_v9  ;;  %v7637_v9 = vld [vmem:[#allocation5 + $0x60] sm:$0xff] }
 0x74a   : > { %7469 = vmatmul.msk.bf16.vlgmr.msra.gmra.mxu2 %vm3291_vm6, %v5781_v11 }
 0x74b   : > { %v10251_v16 = vpop.eup %7817  ;;  %v4503_v30 = vmul.f32 1.442695, %v4463_v10  ;;  %6022 = vmatpush.bf16.msra.mxu2 %v7635_v63 }
 0x74c   : > { %v5663_v14 = vpack.c.bf16 %v10251_v16, %v10251_v16  ;;  %v10257_v7 = vpop.eup %7819 }
 0x74d   : > { %7821 = vpow2.f32 %v4503_v30  ;;  %v5666_v29 = vpack.c.bf16 %v10257_v7, %v10257_v7  ;;  %v4331_v30 = vpop.permute.xlu0 %4330 }
 0x74e   : > { %v5807_v57 = vunpack.c.l.b16 %v5663_v14  ;;  %7823 = vpow2.f32 %v4509_v26  ;;  %v4647_v26 = vsel %vm3291_vm6, %v10220_v50, 0.0 }
 0x74f   : > { %v5836_v24 = vunpack.c.l.b16 %v5666_v29 }
 0x750   : > { %v5809_v21 = vpack.c.b16 %v5808_v44, %v5807_v57  ;;  %v4318_v32 = vpop.permute.xlu1 %4317  ;;  %v4357_v11 = vpop.permute.xlu2 %4356  ;;  %v4515_v57 = vmul.f32 1.442695, %v4469_v31 }
 0x751   : > { %v4465_v49 = vsub.f32 %v11338_v43, %v4318_v32  ;;  %v11340_v32 = vld [vmem:[#allocation12_spill] sm:$0xff] }
 0x752   : > { %7474 = vmatmul.msk.bf16.vlgmr.msra.gmra.mxu3 %vm3291_vm6, %v5809_v21  ;;  %v4467_v43 = vsub.f32 %v11340_v32, %v4331_v30 }
 0x753   : > { %v7822_v46 = vpop.eup %7821  ;;  %v4507_v2 = vmul.f32 1.442695, %v4465_v49  ;;  %6050 = vmatpush.bf16.msra.mxu3 %v7636_v39 }
 0x754   : > { %v5665_v10 = vpack.c.bf16 %v7822_v46, %v7822_v46  ;;  %v4671_v63 = vsel %vm3291_vm6, %v7822_v46, 0.0  ;;  %v7824_v44 = vpop.eup %7823  ;;  %v4511_v52 = vmul.f32 1.442695, %v4467_v43 }
 0x755   : > { %7825 = vpow2.f32 %v4507_v2  ;;  %4672 = vadd.xlane.f32.xlu0 %v4671_v63  ;;  %v5668_v49 = vpack.c.bf16 %v7824_v44, %v7824_v44  ;;  %v4680_v50 = vsel %vm3291_vm6, %v7824_v44, 0.0  ;;  %v4650_v63 = vsel %vm3291_vm6, %v10212_v61, 0.0 }
 0x756   : > { %v5835_v14 = vunpack.c.l.b16 %v5665_v10  ;;  %7827 = vpow2.f32 %v4515_v57  ;;  %v4656_v10 = vsel %vm3291_vm6, %v10224_v3, 0.0  ;;  %v4665_v61 = vsel %vm3291_vm6, %v10251_v16, 0.0 }
 0x757   : > { %4648 = vadd.xlane.f32.xlu2 %v4647_v26  ;;  %v5864_v31 = vunpack.c.l.b16 %v5668_v49  ;;  %7829 = vpow2.f32 %v4511_v52  ;;  %v11341_v26 = vld [vmem:[#allocation19_spill] sm:$0xff]  ;;  %v11343_v52 = vld [vmem:[#allocation37_spill] sm:$0xff]  ;;  %v4674_v16 = vsel %vm3291_vm6, %v10257_v7, 0.0 }
 0x758   : > { %v5837_v21 = vpack.c.b16 %v5836_v24, %v5835_v14  ;;  %v4370_v46 = vpop.permute.xlu2 %4369  ;;  %v11346_v7 = vld [vmem:[#allocation23_spill] sm:$0xff] }
 0x75a   : > { %7479 = vmatmul.msk.bf16.vlgmr.msra.gmra.mxu0 %vm3291_vm6, %v5837_v21  ;;  %v7638_v21 = vld [vmem:[#allocation5 + $0x68] sm:$0xff] }
 0x75b   : > { %v10269_v39 = vpop.eup %7825  ;;  %6078 = vmatpush.bf16.msra.mxu0 %v7637_v9  ;;  %v4659_v9 = vsel %vm3291_vm6, %v10237_v53, 0.0  ;;  %v4668_v53 = vsel %vm3291_vm6, %v10244_v18, 0.0 }
 0x75c   : > { %v5667_v29 = vpack.c.bf16 %v10269_v39, %v10269_v39  ;;  %v7828_v14 = vpop.eup %7827 }
 0x75d   : > { %4681 = vadd.xlane.f32.xlu0 %v4680_v50  ;;  %v4689_v32 = vsel %vm3291_vm6, %v7828_v14, 0.0  ;;  %v7830_v43 = vpop.eup %7829 }
 0x75e   : > { %v5863_v2 = vunpack.c.l.b16 %v5667_v29  ;;  %v11342_v29 = vld [vmem:[#allocation21_spill] sm:$0xff] }
 0x75f   : > { %4657 = vadd.xlane.f32.xlu2 %v4656_v10  ;;  %v4471_v50 = vsub.f32 %v11342_v29, %v4357_v11  ;;  %v7639_v29 = vld [vmem:[#allocation5 + $0x70] sm:$0xff] }
 0x760   : > { %v5865_v24 = vpack.c.b16 %v5864_v31, %v5863_v2  ;;  %v4337_v30 = vpop.permute.xlu1 %4336  ;;  %4651 = vadd.xlane.f32.xlu1 %v4650_v63  ;;  %v4383_v3 = vpop.permute.xlu2 %4382  ;;  %v5669_v2 = vpack.c.bf16 %v7830_v43, %v7830_v43 }
 0x761   : > { %v4468_v57 = vsub.f32 %v11341_v26, %v4337_v30  ;;  %v4519_v30 = vmul.f32 1.442695, %v4471_v50  ;;  %v5671_v50 = vpack.c.bf16 %v7828_v14, %v7828_v14  ;;  %v4677_v14 = vsel %vm3291_vm6, %v10269_v39, 0.0 }
 0x762   : > { %7484 = vmatmul.msk.bf16.vlgmr.msra.gmra.mxu1 %vm3291_vm6, %v5865_v24  ;;  %v5891_v26 = vunpack.c.l.b16 %v5669_v2 }
 0x763   : > { %v4513_v44 = vmul.f32 1.442695, %v4468_v57  ;;  %6106 = vmatpush.bf16.msra.mxu1 %v7638_v21 }
 0x765   : > { %7831 = vpow2.f32 %v4513_v44  ;;  %4690 = vadd.xlane.f32.xlu0 %v4689_v32  ;;  %v11344_v32 = vld [vmem:[#allocation38_spill] sm:$0xff] }
 0x767   : > { %4666 = vadd.xlane.f32.xlu2 %v4665_v61  ;;  %v4473_v61 = vsub.f32 %v11344_v32, %v4370_v46 }
 0x768   : > { %v4350_v49 = vpop.permute.xlu1 %4349  ;;  %4660 = vadd.xlane.f32.xlu1 %v4659_v9  ;;  %v10291_v44 = vpop.permute.xlu2 %4395  ;;  %v11345_v9 = vld [vmem:[#allocation25_spill] sm:$0xff] }
 0x769   : > { %v4470_v31 = vsub.f32 %v11343_v52, %v4350_v49 }
 0x76b   : > { %v7832_v10 = vpop.eup %7831  ;;  %v4517_v63 = vmul.f32 1.442695, %v4470_v31  ;;  %v4475_v31 = vsub.f32 %v11346_v7, %v4383_v3  ;;  %v11347_v3 = vld [vmem:[#allocation35_spill] sm:$0xff] }
 0x76c   : > { %v5670_v24 = vpack.c.bf16 %v7832_v10, %v7832_v10 }
 0x76d   : > { %7833 = vpow2.f32 %v4517_v63  ;;  %v4523_v63 = vmul.f32 1.442695, %v4473_v61  ;;  %v4527_v46 = vmul.f32 1.442695, %v4475_v31 }
 0x76e   : > { %v5892_v57 = vunpack.c.l.b16 %v5670_v24  ;;  %7835 = vpow2.f32 %v4519_v30  ;;  %v5919_v24 = vunpack.c.l.b16 %v5671_v50  ;;  %v4683_v30 = vsel %vm3291_vm6, %v7830_v43, 0.0 }
 0x76f   : > { %4675 = vadd.xlane.f32.xlu2 %v4674_v16 }
 0x770   : > { %v5893_v21 = vpack.c.b16 %v5892_v57, %v5891_v26  ;;  %v4363_v11 = vpop.permute.xlu1 %4362  ;;  %4669 = vadd.xlane.f32.xlu1 %v4668_v53  ;;  %v4409_v61 = vpop.permute.xlu2 %4408 }
 0x771   : > { %v4472_v49 = vsub.f32 %v11345_v9, %v4363_v11  ;;  %v7640_v11 = vld [vmem:[#allocation5 + $0x78] sm:$0xff] }
 0x772   : > { %7489 = vmatmul.msk.bf16.vlgmr.msrb.gmra.mxu2 %vm3291_vm6, %v5893_v21 }
 0x773   : > { %v7834_v52 = vpop.eup %7833  ;;  %v4521_v2 = vmul.f32 1.442695, %v4472_v49  ;;  %6134 = vmatpush.bf16.msrb.mxu2 %v7639_v29  ;;  %v10302_v49 = vpop.f32.mrf.mxu0 }
 0x774   : > { %v5672_v18 = vpack.c.bf16 %v7834_v52, %v7834_v52  ;;  %v7836_v57 = vpop.eup %7835  ;;  %11348 = vst [vmem:[#allocation49_spill] sm:$0xff] %v10302_v49  ;;  %v4692_v31 = vsel %vm3291_vm6, %v7834_v52, 0.0 }
 0x775   : > { %7837 = vpow2.f32 %v4521_v2  ;;  %v5673_v32 = vpack.c.bf16 %v7836_v57, %v7836_v57 }
 0x776   : > { %v5920_v26 = vunpack.c.l.b16 %v5672_v18  ;;  %7839 = vpow2.f32 %v4523_v63  ;;  %v4686_v18 = vsel %vm3291_vm6, %v7832_v10, 0.0 }
 0x777   : > { %4684 = vadd.xlane.f32.xlu2 %v4683_v30  ;;  %7841 = vpow2.f32 %v4527_v46  ;;  %v5947_v50 = vunpack.c.l.b16 %v5673_v32  ;;  %v11349_v30 = vld [vmem:[#allocation36_spill] sm:$0xff] }
 0x778   : > { %v5921_v16 = vpack.c.b16 %v5920_v26, %v5919_v24  ;;  %v4376_v53 = vpop.permute.xlu1 %4375  ;;  %4678 = vadd.xlane.f32.xlu1 %v4677_v14  ;;  %v4477_v46 = vsub.f32 %v11349_v30, %v10291_v44  ;;  %v11350_v14 = vld [vmem:[#allocation26_spill] sm:$0xff]  ;;  %v4422_v10 = vpop.permute.xlu2 %4421 }
 0x779   : > { %v4474_v21 = vsub.f32 %v11347_v3, %v4376_v53 }
 0x77a   : > { %7494 = vmatmul.msk.bf16.vlgmr.msrb.gmra.mxu3 %vm3291_vm6, %v5921_v16 }
 0x77b   : > { %v7838_v9 = vpop.eup %7837  ;;  %v4525_v43 = vmul.f32 1.442695, %v4474_v21  ;;  %6162 = vmatpush.bf16.msrb.mxu3 %v7640_v11  ;;  %v10311_v21 = vpop.f32.mrf.mxu1  ;;  %v11352_v11 = vld [vmem:[#allocation20_spill] sm:$0xff] }
 0x77c   : > { %v5674_v29 = vpack.c.bf16 %v7838_v9, %v7838_v9  ;;  %v4698_v39 = vsel %vm3291_vm6, %v7838_v9, 0.0  ;;  %v7840_v2 = vpop.eup %7839  ;;  %11351 = vst [vmem:[#allocation58_spill] sm:$0xff] %v10311_v21  ;;  %v4479_v32 = vsub.f32 %v11352_v11, %v4409_v61  ;;  %v11354_v61 = vld [vmem:[#allocation39_spill] sm:$0xff] }
 0x77d   : > { %7843 = vpow2.f32 %v4525_v43  ;;  %4699 = vadd.xlane.f32.xlu0 %v4698_v39  ;;  %v7842_v26 = vpop.eup %7841  ;;  %v5675_v53 = vpack.c.bf16 %v7840_v2, %v7840_v2  ;;  %v4531_v39 = vmul.f32 1.442695, %v4477_v46 }
 0x77e   : > { %v5948_v7 = vunpack.c.l.b16 %v5674_v29  ;;  %v4707_v43 = vsel %vm3291_vm6, %v7842_v26, 0.0  ;;  %v10315_v29 = vpop.f32.mrf.mxu0 }
 0x77f   : > { %4693 = vadd.xlane.f32.xlu2 %v4692_v31  ;;  %11353 = vst [vmem:[#allocation54_spill] sm:$0xff] %v10315_v29  ;;  %v5975_v44 = vunpack.c.l.b16 %v5675_v53  ;;  %v4695_v31 = vsel %vm3291_vm6, %v7836_v57, 0.0 }
 0x780   : > { %v5949_v63 = vpack.c.b16 %v5948_v7, %v5947_v50  ;;  %v4389_v24 = vpop.permute.xlu1 %4388  ;;  %4687 = vadd.xlane.f32.xlu1 %v4686_v18  ;;  %v4701_v7 = vsel %vm3291_vm6, %v7840_v2, 0.0  ;;  %v4535_v18 = vmul.f32 1.442695, %v4479_v32 }
 0x781   : > { %v4476_v16 = vsub.f32 %v11350_v14, %v4389_v24  ;;  %v5677_v14 = vpack.c.bf16 %v7842_v26, %v7842_v26 }
 0x782   : > { %7499 = vmatmul.msk.bf16.vlgmr.msrb.gmra.mxu0 %vm3291_vm6, %v5949_v63 }
 0x783   : > { %v7844_v3 = vpop.eup %7843  ;;  %v4529_v52 = vmul.f32 1.442695, %v4476_v16  ;;  %v11355_v16 = vld [vmem:[#allocation22_spill] sm:$0xff]  ;;  %v10322_v2 = vpop.f32.mrf.mxu1  ;;  %v6003_v57 = vunpack.c.l.b16 %v5677_v14 }
 0x784   : > { %v5676_v9 = vpack.c.bf16 %v7844_v3, %v7844_v3  ;;  %11356 = vst [vmem:[#allocation53_spill] sm:$0xff] %v10322_v2 }
 0x785   : > { %7845 = vpow2.f32 %v4529_v52  ;;  %4708 = vadd.xlane.f32.xlu0 %v4707_v43  ;;  %v4481_v52 = vsub.f32 %v11355_v16, %v4422_v10  ;;  %v4435_v43 = vpop.permute.xlu2 %4434 }
 0x786   : > { %v5976_v50 = vunpack.c.l.b16 %v5676_v9  ;;  %7847 = vpow2.f32 %v4531_v39  ;;  %v10324_v9 = vpop.f32.mrf.mxu0 }
 0x787   : > { %4702 = vadd.xlane.f32.xlu2 %v4701_v7  ;;  %7849 = vpow2.f32 %v4535_v18  ;;  %11357 = vst [vmem:[#allocation56_spill] sm:$0xff] %v10324_v9  ;;  %v4539_v26 = vmul.f32 1.442695, %v4481_v52  ;;  %v11359_v52 = vld [vmem:[#allocation24_spill] sm:$0xff] }
 0x788   : > { %v5977_v63 = vpack.c.b16 %v5976_v50, %v5975_v44  ;;  %v4402_v24 = vpop.permute.xlu1 %4401  ;;  %4696 = vadd.xlane.f32.xlu1 %v4695_v31  ;;  %v4704_v50 = vsel %vm3291_vm6, %v7844_v3, 0.0  ;;  %v11358_v31 = vld [vmem:[#allocation40_spill] sm:$0xff]  ;;  %v4483_v3 = vsub.f32 %v11359_v52, %v4435_v43 }
 0x789   : > { %v4478_v30 = vsub.f32 %v11354_v61, %v4402_v24 }
 0x78a   : > { %7504 = vmatmul.msk.bf16.vlgmr.msrb.gmra.mxu1 %vm3291_vm6, %v5977_v63 }
 0x78b   : > { %v7846_v46 = vpop.eup %7845  ;;  %v4533_v53 = vmul.f32 1.442695, %v4478_v30 }
 0x78c   : > { %v5678_v11 = vpack.c.bf16 %v7846_v46, %v7846_v46  ;;  %v4710_v39 = vsel %vm3291_vm6, %v7846_v46, 0.0  ;;  %v7848_v44 = vpop.eup %7847 }
 0x78d   : > { %7851 = vpow2.f32 %v4533_v53  ;;  %v7850_v63 = vpop.eup %7849  ;;  %v5679_v24 = vpack.c.bf16 %v7848_v44, %v7848_v44 }
 0x78e   : > { %v6004_v32 = vunpack.c.l.b16 %v5678_v11  ;;  %7853 = vpow2.f32 %v4539_v26  ;;  %v4719_v11 = vsel %vm3291_vm6, %v7850_v63, 0.0 }
 0x78f   : > { %4711 = vadd.xlane.f32.xlu2 %v4710_v39  ;;  %v6031_v16 = vunpack.c.l.b16 %v5679_v24  ;;  %v4713_v39 = vsel %vm3291_vm6, %v7848_v44, 0.0  ;;  %v5681_v24 = vpack.c.bf16 %v7850_v63, %v7850_v63 }
 0x790   : > { %v6005_v7 = vpack.c.b16 %v6004_v32, %v6003_v57  ;;  %v4415_v10 = vpop.permute.xlu1 %4414  ;;  %4705 = vadd.xlane.f32.xlu1 %v4704_v50  ;;  %v10333_v57 = vpop.f32.mrf.mxu1 }
 0x791   : > { %v4480_v18 = vsub.f32 %v11358_v31, %v4415_v10  ;;  %11360 = vst [vmem:[#allocation55_spill] sm:$0xff] %v10333_v57  ;;  %v10335_v32 = vpop.f32.mrf.mxu0  ;;  %v4448_v50 = vpop.permute.xlu2 %4447  ;;  %v11362_v31 = vld [vmem:[#allocation41_spill] sm:$0xff] }
 0x792   : > { %7509 = vmatmul.msk.bf16.vlgmr.msra.gmra.mxu2 %vm3291_vm6, %v6005_v7  ;;  %11361 = vst [vmem:[#allocation59_spill] sm:$0xff] %v10335_v32 }
 0x793   : > { %v7852_v61 = vpop.eup %7851  ;;  %v4537_v30 = vmul.f32 1.442695, %v4480_v18 }
 0x794   : > { %v5680_v14 = vpack.c.bf16 %v7852_v61, %v7852_v61  ;;  %v4716_v46 = vsel %vm3291_vm6, %v7852_v61, 0.0  ;;  %v7854_v10 = vpop.eup %7853  ;;  %v4543_v61 = vmul.f32 1.442695, %v4483_v3 }
 0x795   : > { %7855 = vpow2.f32 %v4537_v30  ;;  %4717 = vadd.xlane.f32.xlu0 %v4716_v46  ;;  %v10340_v30 = vpop.f32.mrf.mxu2  ;;  %v4725_v44 = vsel %vm3291_vm6, %v7854_v10, 0.0  ;;  %v5683_v57 = vpack.c.bf16 %v7854_v10, %v7854_v10 }
 0x796   : > { %v6032_v53 = vunpack.c.l.b16 %v5680_v14  ;;  %11363 = vst [vmem:[#allocation60_spill] sm:$0xff] %v10340_v30  ;;  %v11364_v14 = vld [vmem:[#allocation27_spill] sm:$0xff] }
 0x797   : > { %4720 = vadd.xlane.f32.xlu2 %v4719_v11  ;;  %v4485_v46 = vsub.f32 %v11364_v14, %v4448_v50  ;;  %v11367_v50 = vld [vmem:[#allocation42_spill] sm:$0xff]  ;;  %v10350_v14 = vpop.f32.mrf.mxu3 }
 0x798   : > { %v6033_v26 = vpack.c.b16 %v6032_v53, %v6031_v16  ;;  %v4428_v7 = vpop.permute.xlu1 %4427  ;;  %4714 = vadd.xlane.f32.xlu1 %v4713_v39  ;;  %v6059_v16 = vunpack.c.l.b16 %v5681_v24  ;;  %11368 = vst [vmem:[#allocation63_spill] sm:$0xff] %v10350_v14 }
 0x799   : > { %v4482_v18 = vsub.f32 %v11362_v31, %v4428_v7  ;;  %v4547_v39 = vmul.f32 1.442695, %v4485_v46  ;;  %v10347_v31 = vpop.f32.mrf.mxu0 }
 0x79a   : > { %7514 = vmatmul.msk.bf16.vlgmr.msra.gmra.mxu3 %vm3291_vm6, %v6033_v26  ;;  %v10345_v26 = vpop.f32.mrf.mxu1  ;;  %11366 = vst [vmem:[#allocation62_spill] sm:$0xff] %v10347_v31 }
 0x79b   : > { %v7856_v43 = vpop.eup %7855  ;;  %v4541_v52 = vmul.f32 1.442695, %v4482_v18  ;;  %11365 = vst [vmem:[#allocation57_spill] sm:$0xff] %v10345_v26 }
 0x79c   : > { %v5682_v11 = vpack.c.bf16 %v7856_v43, %v7856_v43  ;;  %v4722_v63 = vsel %vm3291_vm6, %v7856_v43, 0.0 }
 0x79d   : > { %7857 = vpow2.f32 %v4541_v52  ;;  %4726 = vadd.xlane.f32.xlu0 %v4725_v44  ;;  %v6087_v44 = vunpack.c.l.b16 %v5683_v57 }
 0x79e   : > { %7859 = vpow2.f32 %v4543_v61  ;;  %v6060_v53 = vunpack.c.l.b16 %v5682_v11  ;;  %v10354_v11 = vpop.f32.mrf.mxu2 }
 0x79f   : > { %7861 = vpow2.f32 %v4547_v39  ;;  %11369 = vst [vmem:[#allocation61_spill] sm:$0xff] %v10354_v11  ;;  %v11371_v39 = vld [vmem:[#allocation43_spill] sm:$0xff] }
 0x7a0   : > { %v6061_v3 = vpack.c.b16 %v6060_v53, %v6059_v16  ;;  %v4441_v7 = vpop.permute.xlu1 %4440  ;;  %4723 = vadd.xlane.f32.xlu1 %v4722_v63 }
 0x7a1   : > { %v4484_v18 = vsub.f32 %v11367_v50, %v4441_v7  ;;  %v10361_v31 = vpop.f32.mrf.mxu0 }
 0x7a2   : > { %7519 = vmatmul.msk.bf16.vlgmr.msra.gmra.mxu0 %vm3291_vm6, %v6061_v3  ;;  %v10357_v3 = vpop.f32.mrf.mxu1  ;;  %11372 = vst [vmem:[#allocation31_spill] sm:$0xff] %v10361_v31 }
 0x7a3   : > { %v7858_v24 = vpop.eup %7857  ;;  %v4545_v61 = vmul.f32 1.442695, %v4484_v18  ;;  %11370 = vst [vmem:[#allocation28_spill] sm:$0xff] %v10357_v3 }
 0x7a4   : > { %v7860_v46 = vpop.eup %7859  ;;  %v5684_v52 = vpack.c.bf16 %v7858_v24, %v7858_v24  ;;  %v4728_v43 = vsel %vm3291_vm6, %v7858_v24, 0.0 }
 0x7a5   : > { %7863 = vpow2.f32 %v4545_v61  ;;  %4729 = vadd.xlane.f32.xlu2 %v4728_v43  ;;  %v4731_v53 = vsel %vm3291_vm6, %v7860_v46, 0.0  ;;  %v7862_v10 = vpop.eup %7861  ;;  %v5685_v18 = vpack.c.bf16 %v7860_v46, %v7860_v46  ;;  %v10363_v43 = vpop.f32.mrf.mxu3 }
 0x7a6   : > { %v6088_v16 = vunpack.c.l.b16 %v5684_v52  ;;  %11373 = vst [vmem:[#allocation30_spill] sm:$0xff] %v10363_v43 }
 0x7a8   : > { %v6089_v63 = vpack.c.b16 %v6088_v16, %v6087_v44  ;;  %v4454_v7 = vpop.permute.xlu1 %4453  ;;  %4732 = vadd.xlane.f32.xlu1 %v4731_v53  ;;  %v4737_v44 = vsel %vm3291_vm6, %v7862_v10, 0.0  ;;  %v10367_v16 = vpop.f32.mrf.mxu2  ;;  %v6115_v53 = vunpack.c.l.b16 %v5685_v18 }
 0x7a9   : > { %v4486_v50 = vsub.f32 %v11371_v39, %v4454_v7  ;;  %11374 = vst [vmem:[#allocation34_spill] sm:$0xff] %v10367_v16  ;;  %v10372_v3 = vpop.f32.mrf.mxu0 }
 0x7aa   : > { %7524 = vmatmul.msk.bf16.vlgmr.msra.gmra.mxu1 %vm3291_vm6, %v6089_v63  ;;  %v5687_v63 = vpack.c.bf16 %v7862_v10, %v7862_v10  ;;  %11376 = vst [vmem:[#allocation11_spill] sm:$0xff] %v10372_v3 }
 0x7ab   : > { %v7864_v24 = vpop.eup %7863  ;;  %v4549_v61 = vmul.f32 1.442695, %v4486_v50  ;;  %v10370_v50 = vpop.f32.mrf.mxu1 }
 0x7ac   : > { %v5686_v57 = vpack.c.bf16 %v7864_v24, %v7864_v24  ;;  %v4734_v52 = vsel %vm3291_vm6, %v7864_v24, 0.0  ;;  %11375 = vst [vmem:[#allocation29_spill] sm:$0xff] %v10370_v50 }
 0x7ad   : > { %7865 = vpow2.f32 %v4549_v61  ;;  %4735 = vadd.xlane.f32.xlu0 %v4734_v52  ;;  %4738 = vadd.xlane.f32.xlu2 %v4737_v44  ;;  %v10374_v31 = vpop.f32.mrf.mxu3  ;;  %v6143_v61 = vunpack.c.l.b16 %v5687_v63 }
 0x7ae   : > { %v6116_v46 = vunpack.c.l.b16 %v5686_v57  ;;  %11377 = vst [vmem:[#allocation33_spill] sm:$0xff] %v10374_v31 }
 0x7b0   : > { %v6117_v7 = vpack.c.b16 %v6116_v46, %v6115_v53  ;;  %v10377_v44 = vpop.f32.mrf.mxu2 }
 0x7b1   : > { %11378 = vst [vmem:[#allocation17_spill] sm:$0xff] %v10377_v44  ;;  %v10382_v57 = vpop.f32.mrf.mxu0 }
 0x7b2   : > { %7529 = vmatmul.msk.bf16.vlgmr.msrb.gmra.mxu2 %vm3291_vm6, %v6117_v7  ;;  %11380 = vst [vmem:[#allocation10_spill] sm:$0xff] %v10382_v57 }
 0x7b3   : > { %v7866_v39 = vpop.eup %7865  ;;  %v10380_v10 = vpop.f32.mrf.mxu1 }
 0x7b4   : > { %v5688_v24 = vpack.c.bf16 %v7866_v39, %v7866_v39  ;;  %v4740_v32 = vsel %vm3291_vm6, %v7866_v39, 0.0  ;;  %11379 = vst [vmem:[#allocation32_spill] sm:$0xff] %v10380_v10 }
 0x7b5   : > { %4741 = vadd.xlane.f32.xlu1 %v4740_v32  ;;  %v10384_v53 = vpop.f32.mrf.mxu3 }
 0x7b6   : > { %v6144_v52 = vunpack.c.l.b16 %v5688_v24  ;;  %11381 = vst [vmem:[#allocation15_spill] sm:$0xff] %v10384_v53  ;;  %v4655_v24 = vpop.xlane.xlu0 %4654 }
 0x7b8   : > { %v6145_v18 = vpack.c.b16 %v6144_v52, %v6143_v61  ;;  %v10386_v46 = vpop.f32.mrf.mxu2 }
 0x7b9   : > { %11382 = vst [vmem:[#allocation14_spill] sm:$0xff] %v10386_v46  ;;  %v10390_v3 = vpop.f32.mrf.mxu0 }
 0x7ba   : > { %7534 = vmatmul.msk.bf16.vlgmr.msrb.gmra.mxu3 %vm3291_vm6, %v6145_v18  ;;  %11384 = vst [vmem:[#allocation12_spill] sm:$0xff] %v10390_v3 }
 0x7bb   : > { %v10388_v7 = vpop.f32.mrf.mxu1 }
 0x7bc   : > { %11383 = vst [vmem:[#allocation16_spill] sm:$0xff] %v10388_v7 }
 0x7bd   : > { %v10392_v32 = vpop.f32.mrf.mxu3 }
 0x7be   : > { %11385 = vst [vmem:[#allocation19_spill] sm:$0xff] %v10392_v32  ;;  %v4664_v53 = vpop.xlane.xlu0 %4663 }
 0x7c0   : > { %v10394_v63 = vpop.f32.mrf.mxu2 }
 0x7c1   : > { %11386 = vst [vmem:[#allocation21_spill] sm:$0xff] %v10394_v63  ;;  %v5746_v52 = vpop.f32.mrf.mxu0 }
 0x7c3   : > { %v10396_v61 = vpop.f32.mrf.mxu1 }
 0x7c4   : > { %11387 = vst [vmem:[#allocation37_spill] sm:$0xff] %v10396_v61 }
 0x7c5   : > { %v10398_v18 = vpop.f32.mrf.mxu3 }
 0x7c6   : > { %11388 = vst [vmem:[#allocation38_spill] sm:$0xff] %v10398_v18 }
 0x7c8   : > { %v10400_v57 = vpop.f32.mrf.mxu2  ;;  %v4673_v31 = vpop.xlane.xlu0 %4672 }
 0x7c9   : > { %11389 = vst [vmem:[#allocation25_spill] sm:$0xff] %v10400_v57  ;;  %v6170_v57 = vpack.c.bf16 %v5746_v52, %v5746_v52 }
 0x7ca   : > { %v4649_v39 = vpop.xlane.xlu2 %4648 }
 0x7cb   : > { %v5774_v46 = vpop.f32.mrf.mxu1  ;;  %v4775_v52 = vperm.slane %v4649_v39, %v9104_v40 }
 0x7cc   : > { %v6172_v29 = vpack.c.bf16 %v5774_v46, %v5774_v46 }
 0x7cd   : > { %v10404_v44 = vpop.f32.mrf.mxu3 }
 0x7ce   : > { %11390 = vst [vmem:[#allocation23_spill] sm:$0xff] %v10404_v44 }
 0x7d0   : > { %v10406_v16 = vpop.f32.mrf.mxu2  ;;  %v4682_v2 = vpop.xlane.xlu0 %4681 }
 0x7d1   : > { %11391 = vst [vmem:[#allocation35_spill] sm:$0xff] %v10406_v16 }
 0x7d2   : > { %v4658_v10 = vpop.xlane.xlu2 %4657 }
 0x7d3   : > { %v4652_v50 = vpop.xlane.xlu1 %4651  ;;  %v4779_v16 = vperm.slane %v4658_v10, %v9523_v54 }
 0x7d4   : > { %v4776_v41 = vperm.slane %v4652_v50, %v9523_v54 }
 0x7d5   : > { %v10410_v18 = vpop.f32.mrf.mxu3 }
 0x7d6   : > { %11392 = vst [vmem:[#allocation36_spill] sm:$0xff] %v10410_v18  ;;  %v4777_v46 = vsel %vm3519_vm8, %v4776_v41, %v4775_v52 }
 0x7d7   : > { %v10402_v7 = vpop.f32.mrf.mxu0 }
 0x7d8   : > { %v10412_v21 = vpop.f32.mrf.mxu2  ;;  %v4691_v41 = vpop.xlane.xlu0 %4690 }
 0x7da   : > { %v4667_v32 = vpop.xlane.xlu2 %4666 }
 0x7db   : > { %v4661_v63 = vpop.xlane.xlu1 %4660 }
 0x7dd   : > { %v10420_v37 = vpop.f32.mrf.mxu3 }
 0x7df   : > { %v5858_v43 = vpop.f32.mrf.mxu0  ;;  %v10408_v26 = vpop.f32.mrf.mxu1 }
 0x7e0   : > { %v6178_v30 = vpack.c.bf16 %v5858_v43, %v5858_v43  ;;  %v4781_v43 = vperm.slane %v4661_v63, %v9104_v40  ;;  %v5802_v63 = vpop.f32.mrf.mxu2 }
 0x7e2   : > { %v6313_v11 = vrot.slane %v6178_v30, 4  ;;  %v4676_v9 = vpop.xlane.xlu2 %4675  ;;  %v4778_v30 = vperm.slane %v4655_v24, %v9104_v40 }
 0x7e3   : > { %v4670_v14 = vpop.xlane.xlu1 %4669  ;;  %v4788_v1 = vperm.slane %v4676_v9, %v9523_v54 }
 0x7e4   : > { %v6314_v49 = vsel %vm800_vm2, %v6313_v11, %v6170_v57  ;;  %v4785_v11 = vperm.slane %v4670_v14, %v9523_v54  ;;  %v4780_v50 = vsel %vm3519_vm8, %v4779_v16, %v4778_v30 }
 0x7e5   : > { %v4823_v14 = vsel %vm3566_vm9, %v4780_v50, %v4777_v46 }
 0x7e7   : > { %v5886_v44 = vpop.f32.mrf.mxu1 }
 0x7e8   : > { %v6180_v48 = vpack.c.bf16 %v5886_v44, %v5886_v44  ;;  %v4782_v44 = vperm.slane %v4664_v53, %v9523_v54  ;;  %v4791_v53 = vperm.slane %v4682_v2, %v9523_v54  ;;  %v4796_v2 = vperm.slane %v4691_v41, %v9104_v40 }
 0x7ea   : > { %v6341_v36 = vrot.slane %v6180_v48, 4  ;;  %v4685_v18 = vpop.xlane.xlu2 %4684  ;;  %v4784_v48 = vperm.slane %v4667_v32, %v9104_v40  ;;  %v4783_v24 = vsel %vm3519_vm8, %v4782_v44, %v4781_v43  ;;  %v5830_v44 = vpop.f32.mrf.mxu3 }
 0x7eb   : > { %v4679_v57 = vpop.xlane.xlu1 %4678 }
 0x7ec   : > { %v6342_v10 = vsel %vm800_vm2, %v6341_v36, %v6172_v29  ;;  %v4786_v39 = vsel %vm3519_vm8, %v4785_v11, %v4784_v48  ;;  %v4790_v60 = vperm.slane %v4679_v57, %v9104_v40  ;;  %v4824_v36 = vsel %vm3568_vm10, %v4783_v24, %v4823_v14 }
 0x7ed   : > { %v4787_v29 = vperm.slane %v4673_v31, %v9104_v40  ;;  %v4825_v16 = vsel %vm3570_vm11, %v4786_v39, %v4824_v36  ;;  %v4793_v57 = vperm.slane %v4685_v18, %v9104_v40 }
 0x7ee   : > { %v4792_v43 = vsel %vm3519_vm8, %v4791_v53, %v4790_v60 }
 0x7ef   : > { %v4789_v11 = vsel %vm3519_vm8, %v4788_v1, %v4787_v29  ;;  %v11393_v29 = vld [vmem:[#allocation13_spill] sm:$0xff] }
 0x7f0   : > { %v4826_v31 = vsel %vm3572_vm12, %v4789_v11, %v4825_v16  ;;  %v4700_v39 = vpop.xlane.xlu0 %4699  ;;  %v6318_v41 = vperm.slane %v6314_v49, %v11393_v29  ;;  %v6176_v49 = vpack.c.bf16 %v5830_v44, %v5830_v44 }
 0x7f1   : > { %v4827_v46 = vsel %vm3574_vm13, %v4792_v43, %v4826_v31 }
 0x7f2   : > { %v4694_v32 = vpop.xlane.xlu2 %4693  ;;  %v6327_v11 = vrot.slane %v6318_v41, 4 }
 0x7f3   : > { %v4797_v30 = vperm.slane %v4694_v32, %v9523_v54  ;;  %v4688_v52 = vpop.xlane.xlu1 %4687  ;;  %v6174_v32 = vpack.c.bf16 %v5802_v63, %v5802_v63 }
 0x7f4   : > { %v4794_v9 = vperm.slane %v4688_v52, %v9523_v54 }
 0x7f5   : > { %v10444_v50 = vpop.f32.mrf.mxu2  ;;  %v4798_v48 = vsel %vm3519_vm8, %v4797_v30, %v4796_v2 }
 0x7f6   : > { %v4795_v60 = vsel %vm3519_vm8, %v4794_v9, %v4793_v57 }
 0x7f7   : > { %v4828_v24 = vsel %vm3576_vm14, %v4795_v60, %v4827_v46 }
 0x7f8   : > { %v4829_v1 = vsel %vm3578_vm15, %v4798_v48, %v4828_v24  ;;  %v4709_v46 = vpop.xlane.xlu0 %4708  ;;  %v6346_v48 = vperm.slane %v6342_v10, %v11393_v29 }
 0x7f9   : > { %4839 = vxpose.xlu0.b32.start [1/2] (short) (narrow) %v4829_v1, 16 }
 0x7fa   : > { %v4703_v16 = vpop.xlane.xlu2 %4702 }
 0x7fb   : > { %v4697_v18 = vpop.xlane.xlu1 %4696  ;;  %v4802_v44 = vperm.slane %v4703_v16, %v9104_v40 }
 0x7fd   : > { %v5914_v14 = vpop.f32.mrf.mxu2  ;;  %v10451_v53 = vpop.f32.mrf.mxu3 }
 0x7fe   : > { %v6182_v36 = vpack.c.bf16 %v5914_v14, %v5914_v14 }
 0x800   : > { %v6319_v43 = vrot.slane %v6182_v36, 4  ;;  %v6355_v36 = vrot.slane %v6346_v48, 4 }
 0x802   : > { %v6320_v52 = vsel %vm800_vm2, %v6319_v43, %v6174_v32  ;;  %v4712_v63 = vpop.xlane.xlu2 %4711 }
 0x803   : > { %v6324_v30 = vperm.slane %v6320_v52, %v11393_v29  ;;  %v4706_v57 = vpop.xlane.xlu1 %4705 }
 0x804   : > { %v4803_v10 = vperm.slane %v4706_v57, %v9523_v54  ;;  %v4805_v57 = vperm.slane %v4709_v46, %v9104_v40 }
 0x805   : > { %v6325_v9 = vrot.slane %v6324_v30, 4  ;;  %v6328_v2 = vsel %vm800_vm2, %v6324_v30, %v6327_v11  ;;  %v5942_v31 = vpop.f32.mrf.mxu3 }
 0x806   : > { %v6184_v60 = vpack.c.bf16 %v5942_v31, %v5942_v31 }
 0x807   : > { %v6326_v24 = vsel %vm800_vm2, %v6325_v9, %v6318_v41  ;;  %v4799_v9 = vperm.slane %v4697_v18, %v9104_v40 }
 0x808   : > { %v6347_v1 = vrot.slane %v6184_v60, 4  ;;  %v4718_v11 = vpop.xlane.xlu0 %4717 }
 0x809   : > { %v4809_v18 = vperm.slane %v4718_v11, %v9523_v54 }
 0x80a   : > { %v6348_v14 = vsel %vm800_vm2, %v6347_v1, %v6176_v49  ;;  %v4721_v31 = vpop.xlane.xlu2 %4720  ;;  %v4800_v49 = vperm.slane %v4700_v39, %v9523_v54  ;;  %v4804_v1 = vsel %vm3519_vm8, %v4803_v10, %v4802_v44 }
 0x80b   : > { %v6352_v32 = vperm.slane %v6348_v14, %v11393_v29  ;;  %v4715_v43 = vpop.xlane.xlu1 %4714  ;;  %v4806_v14 = vperm.slane %v4712_v63, %v9523_v54  ;;  %v4811_v44 = vperm.slane %v4721_v31, %v9104_v40 }
 0x80d   : > { %v6353_v52 = vrot.slane %v6352_v32, 4  ;;  %v6356_v5 = vsel %vm800_vm2, %v6352_v32, %v6355_v36  ;;  %v4808_v36 = vperm.slane %v4715_v43, %v9104_v40  ;;  %v11394_v32 = vld [vmem:[#allocation18_spill] sm:$0xff]  ;;  %v4807_v10 = vsel %vm3519_vm8, %v4806_v14, %v4805_v57 }
 0x80e   : > { %v10505_v57 = vperm.slane %v6356_v5, %v11394_v32 }
 0x80f   : > { %v6354_v30 = vsel %vm800_vm2, %v6353_v52, %v6346_v48  ;;  %v4801_v48 = vsel %vm3519_vm8, %v4800_v49, %v4799_v9  ;;  %v10472_v52 = vperm.slane %v6326_v24, %v11394_v32  ;;  %v4810_v63 = vsel %vm3519_vm8, %v4809_v18, %v4808_v36 }
 0x810   : > { %v4727_v41 = vpop.xlane.xlu0 %4726  ;;  %v4830_v16 = vsel %vm3566_vm9, %v4804_v1, %v4801_v48  ;;  %v10490_v49 = vperm.slane %v6328_v2, %v11394_v32 }
 0x811   : > { %v4831_v24 = vsel %vm3568_vm10, %v4807_v10, %v4830_v16  ;;  %v6337_v46 = vrot.slane %v10472_v52, 4  ;;  %v4814_v9 = vperm.slane %v4727_v41, %v9104_v40  ;;  %v6461_v2 = vshrl.u32 %v10472_v52, 16 }
 0x812   : > { %v4832_v1 = vsel %vm3570_vm11, %v4810_v63, %v4831_v24 }
 0x813   : > { %v4724_v3 = vpop.xlane.xlu1 %4723 }
 0x814   : > { %v4812_v61 = vperm.slane %v4724_v3, %v9523_v54  ;;  %v10487_v3 = vperm.slane %v6354_v30, %v11394_v32  ;;  %v10500_v30 = vsel %vm800_vm2, 0, %v6337_v46  ;;  %v6478_v46 = vshrl.u32 %v10505_v57, 16 }
 0x816   : > { %v6365_v48 = vrot.slane %v10487_v3, 4  ;;  %v6462_v41 = vshrl.u32 %v10487_v3, 16 }
 0x818   : > { %v4730_v60 = vpop.xlane.xlu2 %4729  ;;  %v10510_v18 = vsel %vm800_vm2, 0, %v6365_v48  ;;  %v10517_v24 = vpack.i.b16 %v6462_v41, %v6461_v2  ;;  %v6367_v2 = vrot.slane %v10505_v57, 4 }
 0x819   : > { %v4815_v43 = vperm.slane %v4730_v60, %v9523_v54  ;;  %v4813_v60 = vsel %vm3519_vm8, %v4812_v61, %v4811_v44  ;;  %v6467_v44 = vpack.i.b16 %v10510_v18, %v10500_v30 }
 0x81a   : > { %v4833_v61 = vsel %vm3572_vm12, %v4813_v60, %v4832_v1  ;;  %v6339_v60 = vrot.slane %v10490_v49, 4  ;;  %v10538_v41 = vsel %vm800_vm2, 0, %v6367_v2 }
 0x81b   : > { %v4733_v39 = vpop.xlane.xlu1 %4732  ;;  %v4816_v31 = vsel %vm3519_vm8, %v4815_v43, %v4814_v9  ;;  %v6469_v9 = vshrl.u32 %v10500_v30, 16  ;;  %v11421_v30 = vld [vmem:[#allocation14_spill] sm:$0xff] }
 0x81c   : > { %v4817_v14 = vperm.slane %v4733_v39, %v9104_v40  ;;  %v6477_v39 = vshrl.u32 %v10490_v49, 16  ;;  %v4834_v10 = vsel %vm3574_vm13, %v4816_v31, %v4833_v61  ;;  %v10534_v48 = vsel %vm800_vm2, 0, %v6339_v60 }
 0x81d   : > { %v6483_v61 = vpack.i.b16 %v10538_v41, %v10534_v48 }
 0x81e   : > { %v10526_v31 = vpack.i.b16 %v6478_v46, %v6477_v39  ;;  %v6486_v39 = vshrl.u32 %v10538_v41, 16 }
 0x820   : > { %v4736_v34 = vpop.xlane.xlu0 %4735  ;;  %v4739_v36 = vpop.xlane.xlu2 %4738 }
 0x821   : > { %v4818_v11 = vperm.slane %v4736_v34, %v9523_v54  ;;  %v6459_v34 = vpack.i.b16 %v10487_v3, %v10472_v52  ;;  %v4820_v63 = vperm.slane %v4739_v36, %v9104_v40  ;;  %v6475_v36 = vpack.i.b16 %v10505_v57, %v10490_v49  ;;  %v11423_v52 = vld [vmem:[#allocation38_spill] sm:$0xff] }
 0x823   : > { %v4819_v16 = vsel %vm3519_vm8, %v4818_v11, %v4817_v14  ;;  %v6470_v11 = vshrl.u32 %v10510_v18, 16 }
 0x824   : > { %v4835_v1 = vsel %vm3576_vm14, %v4819_v16, %v4834_v10  ;;  %v6485_v16 = vshrl.u32 %v10534_v48, 16 }
 0x825   : > { %v10528_v14 = vpack.i.b16 %v6470_v11, %v6469_v9 }
 0x826   : > { %v10544_v10 = vpack.i.b16 %v6486_v39, %v6485_v16 }
 0x828   : > { %v4742_v43 = vpop.xlane.xlu1 %4741  ;;  %v6584_v48 = vunpack.c.l.bf16 %v10544_v10 }
 0x829   : > { %v4821_v5 = vperm.slane %v4742_v43, %v9523_v54 }
 0x82b   : > { %v4822_v40 = vsel %vm3519_vm8, %v4821_v5, %v4820_v63 }
 0x82c   : > { %v4836_v54 = vsel %vm3578_vm15, %v4822_v40, %v4835_v1 }
 0x82d   : > { %4840 = vxpose.xlu0.b32.end [2/2] (short) (narrow) %v4836_v54, 16 }
 0x894   : > { %7731 = vset.pattern.permute.xlu0 %v9093_v25 }
 0x8c9   : > { %v4855_v63 = vpop.trf.xlu0 }
 0x8ca   : > { %v4925_v43 = vperm.slane %v4855_v63, 4  ;;  %v4873_v5 = vperm.slane %v4855_v63, 0  ;;  %v4886_v46 = vperm.slane %v4855_v63, 1  ;;  %v4899_v9 = vperm.slane %v4855_v63, 2 }
 0x8cb   : > { %v4912_v11 = vperm.slane %v4855_v63, 3  ;;  %v4938_v1 = vperm.slane %v4855_v63, 5  ;;  %v4951_v60 = vperm.slane %v4855_v63, 6  ;;  %v4964_v40 = vperm.slane %v4855_v63, 7 }
 0x8cc   : > { %4936 = vperm.xlu0 %7731, %v4925_v43   ;;  %4884 = vperm.xlu1 %7729, %v4873_v5  }
 0x8cd   : > { %4878 = vperm.xlu2 %7730, %v4873_v5  }
 0x8d1   : > { %v4856_v54 = vpop.trf.xlu0 }
 0x8d2   : > { %v4977_v2 = vperm.slane %v4856_v54, 0  ;;  %v4990_v16 = vperm.slane %v4856_v54, 1  ;;  %v5003_v39 = vperm.slane %v4856_v54, 2  ;;  %v5042_v5 = vperm.slane %v4856_v54, 5 }
 0x8d4   : > { %4897 = vperm.xlu1 %7729, %v4886_v46   ;;  %7736 = vset.pattern.permute.xlu0 %v11296_v20 }
 0x8d5   : > { %4891 = vperm.xlu2 %7730, %v4886_v46   ;;  %v5055_v46 = vperm.slane %v4856_v54, 6 }
 0x8dc   : > { %4910 = vperm.xlu1 %7729, %v4899_v9  }
 0x8dd   : > { %4904 = vperm.xlu2 %7730, %v4899_v9  }
 0x8e4   : > { %4923 = vperm.xlu1 %7729, %v4912_v11  }
 0x8e5   : > { %4917 = vperm.xlu2 %7730, %v4912_v11  }
 0x8ec   : > { %7732 = vset.pattern.permute.xlu1 %v9085_v56  ;;  %v5016_v56 = vperm.slane %v4856_v54, 3 }
 0x8ed   : > { %4930 = vperm.xlu2 %7730, %v4925_v43   ;;  %v5029_v43 = vperm.slane %v4856_v54, 4 }
 0x8f4   : > { %4943 = vperm.xlu1 %7732, %v4938_v1  }
 0x8f5   : > { %7733 = vset.pattern.permute.xlu2 %v9093_v25 }
 0x8fc   : > { %4956 = vperm.xlu1 %7732, %v4951_v60  }
 0x8fd   : > { %4949 = vperm.xlu2 %7733, %v4938_v1  }
 0x904   : > { %4969 = vperm.xlu1 %7732, %v4964_v40  }
 0x905   : > { %4962 = vperm.xlu2 %7733, %v4951_v60   ;;  %v5068_v60 = vperm.slane %v4856_v54, 7 }
 0x90c   : > { %4982 = vperm.xlu1 %7732, %v4977_v2  }
 0x90d   : > { %4975 = vperm.xlu2 %7733, %v4964_v40  }
 0x914   : > { %4995 = vperm.xlu1 %7732, %v4990_v16  }
 0x915   : > { %4988 = vperm.xlu2 %7733, %v4977_v2  }
 0x91c   : > { %5008 = vperm.xlu1 %7732, %v5003_v39  }
 0x91d   : > { %5001 = vperm.xlu2 %7733, %v4990_v16  }
 0x924   : > { %5021 = vperm.xlu1 %7732, %v5016_v56  }
 0x925   : > { %5014 = vperm.xlu2 %7733, %v5003_v39  }
 0x927   : > { %v4879_v25 = vpop.permute.xlu2 %4878 }
 0x928   : > { %v5113_v1 = vadd.f32 %v4879_v25, %v10138_v19 }
 0x92a   : > { %7867 = vrcp.f32 %v5113_v1 }
 0x92c   : > { %5034 = vperm.xlu1 %7732, %v5029_v43  }
 0x92d   : > { %5027 = vperm.xlu2 %7733, %v5016_v56  }
 0x92f   : > { %v4892_v63 = vpop.permute.xlu2 %4891 }
 0x930   : > { %v5115_v16 = vadd.f32 %v4892_v63, %v10134_v17  ;;  %v7868_v56 = vpop.eup %7867 }
 0x932   : > { %7869 = vrcp.f32 %v5115_v16 }
 0x934   : > { %5047 = vperm.xlu1 %7732, %v5042_v5  }
 0x935   : > { %5040 = vperm.xlu2 %7733, %v5029_v43  }
 0x937   : > { %v4905_v9 = vpop.permute.xlu2 %4904 }
 0x938   : > { %v5117_v54 = vadd.f32 %v4905_v9, %v10150_v51 }
 0x93c   : > { %5060 = vperm.xlu1 %7732, %v5055_v46  }
 0x93d   : > { %5053 = vperm.xlu2 %7733, %v5042_v5  }
 0x93e   : > { %v4885_v11 = vpop.permute.xlu1 %4884 }
 0x93f   : > { %v4918_v40 = vpop.permute.xlu2 %4917  ;;  %v5114_v39 = vadd.f32 %v4885_v11, %v10155_v38 }
 0x941   : > { %7871 = vrcp.f32 %v5114_v39 }
 0x944   : > { %5073 = vperm.xlu1 %7732, %v5068_v60  }
 0x945   : > { %5066 = vperm.xlu2 %7733, %v5055_v46   ;;  %v7870_v46 = vpop.eup %7869 }
 0x946   : > { %v4898_v2 = vpop.permute.xlu1 %4897 }
 0x947   : > { %v4931_v5 = vpop.permute.xlu2 %4930  ;;  %v5116_v25 = vadd.f32 %v4898_v2, %v10144_v33  ;;  %v7872_v17 = vpop.eup %7871 }
 0x948   : > { %v4937_v33 = vpop.permute.xlu0 %4936  ;;  %v5121_v2 = vadd.f32 %v4931_v5, %v10157_v28 }
 0x949   : > { %v5122_v9 = vadd.f32 %v4937_v33, %v10167_v0 }
 0x94c   : > { %7734 = vset.pattern.permute.xlu1 %v11296_v20 }
 0x94d   : > { %5079 = vperm.xlu2 %7733, %v5068_v60   ;;  %6620 = vperm.xlu1 %7734, %v7868_v56  }
 0x94e   : > { %v4911_v43 = vpop.permute.xlu1 %4910 }
 0x94f   : > { %v5118_v19 = vadd.f32 %v4911_v43, %v10159_v58  ;;  %v5119_v58 = vadd.f32 %v4918_v40, %v10153_v42 }
 0x951   : > { %7873 = vrcp.f32 %v5118_v19 }
 0x952   : > { %7875 = vrcp.f32 %v5117_v54 }
 0x953   : > { %7877 = vrcp.f32 %v5116_v25 }
 0x955   : > { %7735 = vset.pattern.permute.xlu2 %v11296_v20  ;;  %6630 = vperm.xlu1 %7734, %v7870_v46  }
 0x956   : > { %6625 = vperm.xlu2 %7735, %v7872_v17   ;;  %v4924_v63 = vpop.permute.xlu1 %4923 }
 0x957   : > { %v7874_v38 = vpop.eup %7873  ;;  %v4950_v11 = vpop.permute.xlu2 %4949  ;;  %v5120_v1 = vadd.f32 %v4924_v63, %v10163_v45 }
 0x958   : > { %6645 = vperm.xlu0 %7736, %v7874_v38   ;;  %v7876_v60 = vpop.eup %7875  ;;  %v5124_v56 = vadd.f32 %v4950_v11, %v10161_v13  ;;  %v6052_v11 = vpop.f32.mrf.mxu3 }
 0x959   : > { %v7878_v51 = vpop.eup %7877  ;;  %7879 = vrcp.f32 %v5120_v1 }
 0x95a   : > { %7881 = vrcp.f32 %v5119_v58 }
 0x95b   : > { %7883 = vrcp.f32 %v5122_v9  ;;  %v10572_v9 = vpop.f32.mrf.mxu0 }
 0x95c   : > { %7885 = vrcp.f32 %v5121_v2 }
 0x95d   : > { %6640 = vperm.xlu1 %7734, %v7876_v60   ;;  %v10569_v60 = vpop.f32.mrf.mxu1 }
 0x95e   : > { %6635 = vperm.xlu2 %7735, %v7878_v51  }
 0x95f   : > { %v4963_v20 = vpop.permute.xlu2 %4962  ;;  %v7880_v16 = vpop.eup %7879 }
 0x960   : > { %v7882_v39 = vpop.eup %7881  ;;  %v5126_v19 = vadd.f32 %v4963_v20, %v10148_v47 }
 0x961   : > { %v7884_v43 = vpop.eup %7883 }
 0x962   : > { %v7886_v54 = vpop.eup %7885 }
 0x965   : > { %6655 = vperm.xlu1 %7734, %v7880_v16  }
 0x966   : > { %6650 = vperm.xlu2 %7735, %v7882_v39   ;;  %v4944_v45 = vpop.permute.xlu1 %4943 }
 0x967   : > { %v5123_v42 = vadd.f32 %v4944_v45, %v10142_v12  ;;  %v4976_v40 = vpop.permute.xlu2 %4975 }
 0x968   : > { %v5128_v12 = vadd.f32 %v4976_v40, %v10179_v59 }
 0x969   : > { %7887 = vrcp.f32 %v5123_v42 }
 0x96a   : > { %7889 = vrcp.f32 %v5124_v56  ;;  %v10580_v56 = vpop.f32.mrf.mxu1 }
 0x96b   : > { %7891 = vrcp.f32 %v5126_v19 }
 0x96d   : > { %6665 = vperm.xlu1 %7734, %v7884_v43  }
 0x96e   : > { %6660 = vperm.xlu2 %7735, %v7886_v54   ;;  %v4957_v28 = vpop.permute.xlu1 %4956 }
 0x96f   : > { %v7888_v0 = vpop.eup %7887  ;;  %v5125_v5 = vadd.f32 %v4957_v28, %v10171_v15  ;;  %v4989_v25 = vpop.permute.xlu2 %4988 }
 0x970   : > { %6670 = vperm.xlu0 %7736, %v7888_v0   ;;  %v7890_v46 = vpop.eup %7889  ;;  %v6024_v15 = vpop.f32.mrf.mxu2  ;;  %v5130_v1 = vadd.f32 %v4989_v25, %v10169_v6 }
 0x971   : > { %7893 = vrcp.f32 %v5125_v5  ;;  %v7892_v17 = vpop.eup %7891 }
 0x972   : > { %7895 = vrcp.f32 %v5128_v12 }
 0x976   : > { %6675 = vperm.xlu2 %7735, %v7890_v46   ;;  %v4970_v13 = vpop.permute.xlu1 %4969  ;;  %v6108_v46 = vpop.f32.mrf.mxu1 }
 0x977   : > { %v7894_v38 = vpop.eup %7893  ;;  %v5127_v47 = vadd.f32 %v4970_v13, %v10165_v8  ;;  %v5002_v63 = vpop.permute.xlu2 %5001  ;;  %v6183_v13 = vpack.c.bf16 %v10451_v53, %v10451_v53  ;;  %v6175_v53 = vpack.c.bf16 %v10420_v37, %v10420_v37 }
 0x978   : > { %6685 = vperm.xlu0 %7736, %v7892_v17   ;;  %6680 = vperm.xlu1 %7734, %v7894_v38   ;;  %v7896_v58 = vpop.eup %7895  ;;  %v10574_v8 = vpop.f32.mrf.mxu3  ;;  %v5132_v6 = vadd.f32 %v5002_v63, %v10207_v62 }
 0x979   : > { %7897 = vrcp.f32 %v5127_v47  ;;  %v10576_v2 = vpop.f32.mrf.mxu2  ;;  %v6191_v47 = vpack.c.bf16 %v6052_v11, %v6052_v11 }
 0x97a   : > { %7899 = vrcp.f32 %v5130_v1  ;;  %v6181_v1 = vpack.c.bf16 %v10444_v50, %v10444_v50 }
 0x97c   : > { %v6207_v50 = vrot.slane %v6181_v1, 4 }
 0x97e   : > { %v4983_v59 = vpop.permute.xlu1 %4982 }
 0x97f   : > { %v7898_v51 = vpop.eup %7897  ;;  %v5015_v33 = vpop.permute.xlu2 %5014  ;;  %v5129_v20 = vadd.f32 %v4983_v59, %v10200_v4  ;;  %v6189_v59 = vpack.c.bf16 %v6024_v15, %v6024_v15 }
 0x980   : > { %6690 = vperm.xlu2 %7735, %v7898_v51   ;;  %6695 = vperm.xlu1 %7734, %v7896_v58   ;;  %v7900_v16 = vpop.eup %7899  ;;  %v10582_v4 = vpop.f32.mrf.mxu0  ;;  %v5134_v54 = vadd.f32 %v5015_v33, %v10189_v22  ;;  %v6195_v22 = vpack.c.bf16 %v6108_v46, %v6108_v46  ;;  %v11396_v46 = vld [vmem:[#allocation37_spill] sm:$0xff] }
 0x981   : > { %7901 = vrcp.f32 %v5129_v20  ;;  %v6164_v43 = vpop.f32.mrf.mxu3  ;;  %v6136_v19 = vpop.f32.mrf.mxu2  ;;  %v6235_v20 = vrot.slane %v6183_v13, 4 }
 0x982   : > { %7903 = vrcp.f32 %v5132_v6  ;;  %v6199_v28 = vpack.c.bf16 %v6164_v43, %v6164_v43  ;;  %v6197_v25 = vpack.c.bf16 %v6136_v19, %v6136_v19  ;;  %v6173_v43 = vpack.c.bf16 %v10412_v21, %v10412_v21 }
 0x984   : > { %v6291_v17 = vrot.slane %v6199_v28, 4  ;;  %v6263_v63 = vrot.slane %v6197_v25, 4 }
 0x986   : > { %v4996_v39 = vpop.permute.xlu1 %4995  ;;  %v6292_v51 = vsel %vm800_vm2, %v6291_v17, %v6191_v47  ;;  %v6264_v11 = vsel %vm800_vm2, %v6263_v63, %v6189_v59  ;;  %v6171_v17 = vpack.c.bf16 %v11396_v46, %v11396_v46  ;;  %v11397_v63 = vld [vmem:[#allocation12_spill] sm:$0xff]  ;;  %v11401_v46 = vld [vmem:[#allocation50_spill] sm:$0xff] }
 0x987   : > { %v7902_v45 = vpop.eup %7901  ;;  %v5028_v42 = vpop.permute.xlu2 %5027  ;;  %v5131_v40 = vadd.f32 %v4996_v39, %v10184_v35  ;;  %v6285_v39 = vrot.slane %v6195_v22, 4  ;;  %v10599_v15 = vperm.slane %v6292_v51, %v11393_v29  ;;  %v10609_v19 = vperm.slane %v6264_v11, %v11393_v29  ;;  %v11398_v59 = vld [vmem:[#allocation48_spill] sm:$0xff] }
 0x988   : > { %6705 = vperm.xlu2 %7735, %v7900_v16   ;;  %6700 = vperm.xlu0 %7736, %v7902_v45   ;;  %v7904_v62 = vpop.eup %7903  ;;  %v6080_v38 = vpop.f32.mrf.mxu0  ;;  %v5136_v58 = vadd.f32 %v5028_v42, %v10182_v23  ;;  %v6179_v23 = vpack.c.bf16 %v10408_v26, %v10408_v26  ;;  %v6187_v42 = vpack.c.bf16 %v10569_v60, %v10569_v60 }
 0x989   : > { %7905 = vrcp.f32 %v5131_v40  ;;  %v6236_v26 = vsel %vm800_vm2, %v6235_v20, %v6175_v53  ;;  %v6208_v60 = vsel %vm800_vm2, %v6207_v50, %v6173_v43 }
 0x98a   : > { %7907 = vrcp.f32 %v5134_v54  ;;  %v6185_v54 = vpack.c.bf16 %v10572_v9, %v10572_v9  ;;  %v6286_v28 = vsel %vm800_vm2, %v6285_v39, %v6187_v42  ;;  %v10618_v25 = vperm.slane %v6236_v26, %v11393_v29 }
 0x98b   : > { %v10624_v9 = vperm.slane %v6286_v28, %v11393_v29  ;;  %v10630_v1 = vperm.slane %v6208_v60, %v11393_v29  ;;  %v11400_v60 = vld [vmem:[#allocation44_spill] sm:$0xff] }
 0x98d   : > { %v6213_v11 = vrot.slane %v10630_v1, 4 }
 0x98e   : > { %v5009_v0 = vpop.permute.xlu1 %5008 }
 0x98f   : > { %v7906_v5 = vpop.eup %7905  ;;  %v5041_v12 = vpop.permute.xlu2 %5040  ;;  %v5133_v35 = vadd.f32 %v5009_v0, %v10175_v55  ;;  %v6193_v55 = vpack.c.bf16 %v6080_v38, %v6080_v38  ;;  %v6297_v0 = vrot.slane %v10599_v15, 4  ;;  %v6269_v38 = vrot.slane %v10609_v19, 4 }
 0x990   : > { %6715 = vperm.xlu0 %7736, %v7904_v62   ;;  %6710 = vperm.xlu1 %7734, %v7906_v5   ;;  %v7908_v33 = vpop.eup %7907  ;;  %v6229_v62 = vrot.slane %v6179_v23, 4  ;;  %v11395_v5 = vld [vmem:[#allocation51_spill] sm:$0xff]  ;;  %v11399_v23 = vld [vmem:[#allocation46_spill] sm:$0xff] }
 0x991   : > { %7909 = vrcp.f32 %v5133_v35  ;;  %v6257_v37 = vrot.slane %v6193_v55, 4  ;;  %v5138_v21 = vadd.f32 %v5041_v12, %v11395_v5  ;;  %v6169_v12 = vpack.c.bf16 %v11397_v63, %v11397_v63  ;;  %v10675_v63 = vld [vmem:[%s8129_s29 + $0x4] sm:$0xff]  }
 0x992   : > { %7911 = vrcp.f32 %v5136_v58  ;;  %v6230_v51 = vsel %vm800_vm2, %v6229_v62, %v6171_v17  ;;  %v6298_v20 = vsel %vm800_vm2, %v6297_v0, %v10624_v9 }
 0x993   : > { %v10644_v39 = vperm.slane %v6230_v51, %v11393_v29 }
 0x996   : > { %v5022_v6 = vpop.permute.xlu1 %5021 }
 0x997   : > { %v7910_v16 = vpop.eup %7909  ;;  %v5054_v45 = vpop.permute.xlu2 %5053  ;;  %v5135_v40 = vadd.f32 %v5022_v6, %v10214_v27  ;;  %v6177_v27 = vpack.c.bf16 %v10402_v7, %v10402_v7  ;;  %v6258_v7 = vsel %vm800_vm2, %v6257_v37, %v6185_v54  ;;  %v6241_v6 = vrot.slane %v10618_v25, 4 }
 0x998   : > { %6720 = vperm.xlu2 %7735, %v7910_v16   ;;  %6725 = vperm.xlu1 %7734, %v7908_v33   ;;  %v7912_v35 = vpop.eup %7911  ;;  %v10635_v33 = vperm.slane %v6258_v7, %v11393_v29  ;;  %v5140_v50 = vadd.f32 %v5054_v45, %v11399_v23  ;;  %v6844_v23 = vunpack.c.l.bf16 %v10675_v63 }
 0x999   : > { %7913 = vrcp.f32 %v5135_v40  ;;  %v6201_v13 = vrot.slane %v6177_v27, 4  ;;  %v10648_v40 = vperm.slane %v6298_v20, %v11394_v32  ;;  %v6242_v37 = vsel %vm800_vm2, %v6241_v6, %v10644_v39  ;;  %v11403_v20 = vld [vmem:[#allocation54_spill] sm:$0xff] }
 0x99a   : > { %7915 = vrcp.f32 %v5138_v21  ;;  %v6270_v53 = vsel %vm800_vm2, %v6269_v38, %v10635_v33  ;;  %v10665_v5 = vperm.slane %v6242_v37, %v11394_v32 }
 0x99b   : > { %v6202_v16 = vsel %vm800_vm2, %v6201_v13, %v6169_v12  ;;  %v10657_v43 = vperm.slane %v6270_v53, %v11394_v32 }
 0x99c   : > { %v10652_v42 = vperm.slane %v6202_v16, %v11393_v29  ;;  %v6253_v13 = vrot.slane %v10665_v5, 4 }
 0x99d   : > { %v6491_v45 = vpack.i.b16 %v10648_v40, %v10657_v43  ;;  %v6493_v38 = vshrl.u32 %v10657_v43, 16 }
 0x99e   : > { %v5035_v47 = vpop.permute.xlu1 %5034  ;;  %v6214_v28 = vsel %vm800_vm2, %v6213_v11, %v10652_v42  ;;  %v10684_v11 = vsel %vm800_vm2, 0, %v6253_v13 }
 0x99f   : > { %v7914_v22 = vpop.eup %7913  ;;  %v5067_v58 = vpop.permute.xlu2 %5066  ;;  %v5137_v55 = vadd.f32 %v5035_v47, %v11398_v59  ;;  %v10668_v21 = vperm.slane %v6214_v28, %v11394_v32  ;;  %v6555_v7 = vunpack.c.l.bf16 %v6491_v45  ;;  %v11404_v28 = vld [vmem:[#allocation52_spill] sm:$0xff] }
 0x9a0   : > { %6735 = vperm.xlu2 %7735, %v7912_v35   ;;  %6730 = vperm.xlu0 %7736, %v7914_v22   ;;  %v7916_v27 = vpop.eup %7915  ;;  %v6494_v35 = vshrl.u32 %v10648_v40, 16  ;;  %v5142_v17 = vadd.f32 %v5067_v58, %v11401_v46  ;;  %v10681_v58 = vstv %s6553_s19 }
 0x9a1   : > { %7917 = vrcp.f32 %v5137_v55  ;;  %v6225_v12 = vrot.slane %v10668_v21, 4  ;;  %v11402_v55 = vld [vmem:[#allocation47_spill] sm:$0xff]  ;;  %v6587_v6 = vadd.f32 %v6555_v7, %v11403_v20  ;;  %v6427_v13 = vpack.i.b16 %v10665_v5, %v10668_v21 }
 0x9a2   : > { %7919 = vrcp.f32 %v5140_v50  ;;  %v6495_v16 = vpack.i.b16 %v6494_v35, %v6493_v38  ;;  %v6243_v35 = vrot.slane %v10644_v39, 4 }
 0x9a3   : > { %v10690_v37 = vsel %vm800_vm2, 0, %v6225_v12  ;;  %v11406_v12 = vld [vmem:[#allocation53_spill] sm:$0xff] }
 0x9a4   : > { %v6437_v45 = vshrl.u32 %v10690_v37, 16 }
 0x9a6   : > { %v5048_v26 = vpop.permute.xlu1 %5047 }
 0x9a7   : > { %v7918_v54 = vpop.eup %7917  ;;  %v5080_v62 = vpop.permute.xlu2 %5079  ;;  %v5139_v0 = vadd.f32 %v5048_v26, %v11400_v60  ;;  %v6557_v26 = vunpack.c.l.bf16 %v6495_v16  ;;  %v6299_v16 = vrot.slane %v10624_v9, 4  ;;  %v6429_v9 = vshrl.u32 %v10668_v21, 16 }
 0x9a8   : > { %6745 = vperm.xlu0 %7736, %v7916_v27   ;;  %6740 = vperm.xlu1 %7734, %v7918_v54   ;;  %v7920_v47 = vpop.eup %7919  ;;  %v6438_v54 = vshrl.u32 %v10684_v11, 16  ;;  %v5144_v60 = vadd.f32 %v5080_v62, %v11404_v28  ;;  %v11405_v62 = vld [vmem:[#allocation45_spill] sm:$0xff]  ;;  %v6166_v28 = vpop.f32.mrf.mxu3 }
 0x9a9   : > { %7921 = vrcp.f32 %v5139_v0 }
 0x9aa   : > { %7923 = vrcp.f32 %v5142_v17  ;;  %v10698_v17 = vld [vmem:[%s8129_s29 + $0xc] sm:$0xff]  }
 0x9ae   : > { %v5061_v22 = vpop.permute.xlu1 %5060 }
 0x9af   : > { %v7922_v59 = vpop.eup %7921  ;;  %v5141_v51 = vadd.f32 %v5061_v22, %v11402_v55  ;;  %v6439_v55 = vpack.i.b16 %v6438_v54, %v6437_v45  ;;  %v6271_v54 = vrot.slane %v10635_v33, 4  ;;  %v1600_v45 = vld [vmem:[%s8129_s29] sm:$0xf] }
 0x9b0   : > { %v6626_v53 = vpop.permute.xlu2 %6625  ;;  %6750 = vperm.xlu2 %7735, %v7922_v59   ;;  %6755 = vperm.xlu1 %7734, %v7920_v47   ;;  %v7924_v7 = vpop.eup %7923  ;;  %v6215_v47 = vrot.slane %v10652_v42, 4  ;;  %v6589_v59 = vadd.f32 %v6557_v26, %v11406_v12  ;;  %v6846_v42 = vunpack.c.l.bf16 %v10698_v17 }
 0x9b1   : > { %7925 = vrcp.f32 %v5141_v51  ;;  %v6779_v50 = vmul.f32 %v6626_v53, %v6587_v6  ;;  %v6244_v51 = vsel %vm800_vm2, %v10618_v25, %v6243_v35  ;;  %v6554_v53 = vunpack.c.l.bf16 %v6427_v13 }
 0x9b2   : > { %7927 = vrcp.f32 %v5144_v60  ;;  %v6216_v6 = vsel %vm800_vm2, %v10630_v1, %v6215_v47  ;;  %v6560_v26 = vunpack.c.l.bf16 %v6439_v55  ;;  %v10719_v25 = vperm.slane %v6244_v51, %v11394_v32  ;;  %v6138_v60 = vpop.f32.mrf.mxu2 }
 0x9b3   : > { %v6812_v27 = vmul.f32 %v10681_v58, %v6779_v50  ;;  %v6309_v50 = vrot.slane %v10648_v40, 4  ;;  %v6300_v1 = vsel %vm800_vm2, %v10599_v15, %v6299_v16  ;;  %v6186_v40 = vpack.c.bf16 %v10582_v4, %v10582_v4  ;;  %v10735_v15 = vld [vmem:[%s8129_s29 + $0x18] sm:$0xff]  }
 0x9b4   : > { %v6272_v33 = vsel %vm800_vm2, %v10609_v19, %v6271_v54  ;;  %v6200_v47 = vpack.c.bf16 %v6166_v28, %v6166_v28  ;;  %v10747_v19 = vperm.slane %v6300_v1, %v11394_v32  ;;  %v6198_v55 = vpack.c.bf16 %v6138_v60, %v6138_v60  ;;  %v6082_v28 = vpop.f32.mrf.mxu0 }
 0x9b5   : > { %v6876_v0 = vadd.f32 %v6844_v23, %v6812_v27  ;;  %v6430_v23 = vshrl.u32 %v10665_v5, 16  ;;  %v6281_v5 = vrot.slane %v10657_v43, 4  ;;  %v10739_v43 = vsel %vm800_vm2, 0, %v6309_v50 }
 0x9b6   : > { %v5074_v46 = vpop.permute.xlu1 %5073  ;;  %v6843_v51 = vunpack.c.l.bf16 %v1600_v45  ;;  %v6849_v16 = vunpack.c.l.bf16 %v10735_v15  ;;  %v10756_v50 = vperm.slane %v6272_v33, %v11394_v32  ;;  %v6255_v1 = vrot.slane %v10719_v25, 4 }
 0x9b7   : > { %v7926_v38 = vpop.eup %7925  ;;  %6908 = vst.msk [vmem:[%s10703_s22 + $0x8] sm:$0xff] %vm403_vm0, %v6876_v0  ;;  %v5143_v22 = vadd.f32 %v5074_v46, %v11405_v62  ;;  %v11407_v46 = vld [vmem:[#allocation49_spill] sm:$0xff]  ;;  %v6431_v21 = vpack.i.b16 %v6430_v23, %v6429_v9  ;;  %v11408_v62 = vld [vmem:[#allocation63_spill] sm:$0xff]  ;;  %v6403_v9 = vrot.slane %v6200_v47, 4  ;;  %v6192_v45 = vpack.c.bf16 %v10574_v8, %v10574_v8 }
 0x9b8   : > { %v6636_v39 = vpop.permute.xlu2 %6635  ;;  %6765 = vperm.xlu2 %7735, %v7924_v7   ;;  %6760 = vperm.xlu0 %7736, %v7926_v38   ;;  %v10730_v7 = vperm.slane %v6216_v6, %v11394_v32  ;;  %v7928_v35 = vpop.eup %7927  ;;  %v6586_v13 = vadd.f32 %v6554_v53, %v11407_v46  ;;  %v6435_v33 = vpack.i.b16 %v10684_v11, %v10690_v37  ;;  %v6375_v46 = vrot.slane %v6198_v55, 4  ;;  %v11410_v55 = vld [vmem:[#allocation56_spill] sm:$0xff] }
 0x9b9   : > { %7929 = vrcp.f32 %v5143_v22  ;;  %v6781_v20 = vmul.f32 %v6636_v39, %v6589_v59  ;;  %v6592_v22 = vadd.f32 %v6560_v26, %v11408_v62  ;;  %v6110_v6 = vpop.f32.mrf.mxu1  ;;  %v6556_v54 = vunpack.c.l.bf16 %v6431_v21  ;;  %v10772_v62 = vld [vmem:[%s8129_s29 + $0x20] sm:$0xff]  }
 0x9ba   : > { %v6443_v59 = vpack.i.b16 %v10719_v25, %v10730_v7  ;;  %v6194_v47 = vpack.c.bf16 %v6082_v28, %v6082_v28  ;;  %v6227_v8 = vrot.slane %v10730_v7, 4  ;;  %v6190_v11 = vpack.c.bf16 %v10576_v2, %v10576_v2 }
 0x9bb   : > { %v6814_v27 = vmul.f32 %v10681_v58, %v6781_v20  ;;  %v10750_v20 = vsel %vm800_vm2, 0, %v6281_v5  ;;  %v6404_v37 = vsel %vm800_vm2, %v6403_v9, %v6192_v45  ;;  %v6851_v28 = vunpack.c.l.bf16 %v10772_v62 }
 0x9bc   : > { %v6499_v23 = vpack.i.b16 %v10739_v43, %v10750_v20  ;;  %v6562_v60 = vunpack.c.l.bf16 %v6443_v59  ;;  %v10777_v59 = vsel %vm800_vm2, 0, %v6255_v1  ;;  %v6376_v1 = vsel %vm800_vm2, %v6375_v46, %v6190_v11 }
 0x9bd   : > { %v6878_v0 = vadd.f32 %v6846_v42, %v6814_v27  ;;  %v6188_v27 = vpack.c.bf16 %v10580_v56, %v10580_v56  ;;  %v6369_v45 = vrot.slane %v6194_v47, 4  ;;  %v6501_v47 = vshrl.u32 %v10750_v20, 16 }
 0x9be   : > { %v6559_v21 = vunpack.c.l.bf16 %v6499_v23 }
 0x9bf   : > { %v7930_v38 = vpop.eup %7929  ;;  %6910 = vst.msk [vmem:[%s10703_s22 + $0x18] sm:$0xff] %vm403_vm0, %v6878_v0  ;;  %v6621_v12 = vpop.permute.xlu1 %6620  ;;  %v6510_v0 = vshrl.u32 %v10747_v19, 16 }
 0x9c0   : > { %v6651_v39 = vpop.permute.xlu2 %6650  ;;  %v6778_v42 = vmul.f32 %v6621_v12, %v6586_v13  ;;  %6775 = vperm.xlu0 %7736, %v7928_v35   ;;  %6770 = vperm.xlu1 %7734, %v7930_v38   ;;  %v6196_v35 = vpack.c.bf16 %v6110_v6, %v6110_v6  ;;  %v6509_v38 = vshrl.u32 %v10756_v50, 16 }
 0x9c1   : > { %v6784_v53 = vmul.f32 %v6651_v39, %v6592_v22  ;;  %v11409_v22 = vld [vmem:[#allocation58_spill] sm:$0xff]  ;;  %v6594_v39 = vadd.f32 %v6562_v60, %v11410_v55 }
 0x9c2   : > { %v6811_v26 = vmul.f32 %v10681_v58, %v6778_v42  ;;  %v6588_v12 = vadd.f32 %v6556_v54, %v11409_v22  ;;  %v6511_v42 = vpack.i.b16 %v6510_v0, %v6509_v38  ;;  %v6397_v6 = vrot.slane %v6196_v35, 4 }
 0x9c3   : > { %v6817_v5 = vmul.f32 %v10681_v58, %v6784_v53  ;;  %v6845_v53 = vunpack.c.h.bf16 %v10675_v63  ;;  %v6558_v54 = vunpack.c.l.bf16 %v6435_v33  ;;  %v6502_v63 = vshrl.u32 %v10739_v43, 16 }
 0x9c4   : > { %v6875_v56 = vadd.f32 %v6843_v51, %v6811_v26  ;;  %v1605_v26 = vld [vmem:[%s8129_s29 + $0x14] sm:$0xf]  ;;  %v10797_v38 = vperm.slane %v6376_v1, %v11393_v29  ;;  %v10801_v22 = vsel %vm800_vm2, 0, %v6227_v8 }
 0x9c5   : > { %v6881_v13 = vadd.f32 %v6849_v16, %v6817_v5  ;;  %v11411_v5 = vld [vmem:[#allocation61_spill] sm:$0xff]  ;;  %v6848_v33 = vunpack.c.l.bf16 %v1605_v26  ;;  %v6503_v20 = vpack.i.b16 %v6502_v63, %v6501_v47 }
 0x9c6   : > { %6907 = vst.msk [vmem:[%s10703_s22] sm:$0xff] %vm403_vm0, %v6875_v56  ;;  %v6591_v9 = vadd.f32 %v6559_v21, %v11411_v5  ;;  %v10791_v56 = vperm.slane %v6404_v37, %v11393_v29  ;;  %v6454_v37 = vshrl.u32 %v10777_v59, 16  ;;  %v6381_v1 = vrot.slane %v10797_v38, 4 }
 0x9c7   : > { %6913 = vst.msk [vmem:[%s10703_s22 + $0x30] sm:$0xff] %vm403_vm0, %v6881_v13  ;;  %v6631_v51 = vpop.permute.xlu1 %6630  ;;  %v6565_v13 = vunpack.c.l.bf16 %v6511_v42 }
 0x9c8   : > { %v6661_v16 = vpop.permute.xlu2 %6660  ;;  %v6780_v23 = vmul.f32 %v6631_v51, %v6588_v12  ;;  %v6398_v12 = vsel %vm800_vm2, %v6397_v6, %v6188_v27  ;;  %v6409_v55 = vrot.slane %v10791_v56, 4  ;;  %v11412_v51 = vld [vmem:[#allocation60_spill] sm:$0xff]  ;;  %v6370_v27 = vsel %vm800_vm2, %v6369_v45, %v6186_v40  ;;  %v11413_v6 = vld [vmem:[#allocation57_spill] sm:$0xff] }
 0x9c9   : > { %v6786_v2 = vmul.f32 %v6661_v16, %v6594_v39  ;;  %v10810_v39 = vld [vmem:[%s8129_s29 + $0x2c] sm:$0xff]   ;;  %v6590_v42 = vadd.f32 %v6558_v54, %v11412_v51  ;;  %v6597_v16 = vadd.f32 %v6565_v13, %v11413_v6  ;;  %v10822_v26 = vperm.slane %v6398_v12, %v11393_v29 }
 0x9ca   : > { %v6813_v60 = vmul.f32 %v10681_v58, %v6780_v23  ;;  %v6646_v0 = vpop.permute.xlu0 %6645  ;;  %v6453_v23 = vshrl.u32 %v10801_v22, 16  ;;  %v6854_v4 = vunpack.c.l.bf16 %v10810_v39  ;;  %v6507_v12 = vpack.i.b16 %v10747_v19, %v10756_v50 }
 0x9cb   : > { %v6819_v35 = vmul.f32 %v10681_v58, %v6786_v2  ;;  %v6783_v46 = vmul.f32 %v6646_v0, %v6591_v9  ;;  %v10830_v9 = vperm.slane %v6370_v27, %v11393_v29  ;;  %v6410_v0 = vsel %vm800_vm2, %v6409_v55, %v10822_v26 }
 0x9cc   : > { %v6877_v21 = vadd.f32 %v6845_v53, %v6813_v60  ;;  %v6455_v5 = vpack.i.b16 %v6454_v37, %v6453_v23  ;;  %v6561_v60 = vunpack.c.l.bf16 %v6503_v20  ;;  %v10839_v13 = vperm.slane %v6410_v0, %v11394_v32 }
 0x9cd   : > { %v6883_v11 = vadd.f32 %v6851_v28, %v6819_v35  ;;  %v6816_v43 = vmul.f32 %v10681_v58, %v6783_v46  ;;  %v6847_v28 = vunpack.c.h.bf16 %v10698_v17  ;;  %v6382_v35 = vsel %vm800_vm2, %v6381_v1, %v10830_v9 }
 0x9ce   : > { %6909 = vst.msk [vmem:[%s10703_s22 + $0x10] sm:$0xff] %vm403_vm0, %v6877_v21  ;;  %v6568_v46 = vunpack.c.l.bf16 %v6455_v5  ;;  %v6446_v29 = vshrl.u32 %v10719_v25, 16  ;;  %v11414_v21 = vld [vmem:[#allocation30_spill] sm:$0xff]  ;;  %v6445_v37 = vshrl.u32 %v10730_v7, 16  ;;  %v6850_v55 = vunpack.c.h.bf16 %v10735_v15  ;;  %v10855_v25 = vld [vmem:[%s8129_s29 + $0x38] sm:$0xff]  }
 0x9cf   : > { %6915 = vst.msk [vmem:[%s10703_s22 + $0x40] sm:$0xff] %vm403_vm0, %v6883_v11  ;;  %v6880_v8 = vadd.f32 %v6848_v33, %v6816_v43  ;;  %v6641_v53 = vpop.permute.xlu1 %6640  ;;  %v6593_v47 = vadd.f32 %v6561_v60, %v11414_v21  ;;  %v10850_v43 = vperm.slane %v6382_v35, %v11394_v32  ;;  %v6311_v23 = vrot.slane %v10747_v19, 4  ;;  %v1610_v35 = vld [vmem:[%s8129_s29 + $0x28] sm:$0xf] }
 0x9d0   : > { %v6676_v54 = vpop.permute.xlu2 %6675  ;;  %v6782_v2 = vmul.f32 %v6641_v53, %v6590_v42  ;;  %v11415_v42 = vld [vmem:[#allocation33_spill] sm:$0xff]  ;;  %v6563_v53 = vunpack.c.l.bf16 %v6507_v12  ;;  %v6857_v7 = vunpack.c.l.bf16 %v10855_v25  ;;  %v6852_v0 = vunpack.c.h.bf16 %v10772_v62  ;;  %v11418_v21 = vld [vmem:[#allocation55_spill] sm:$0xff] }
 0x9d1   : > { %6912 = vst.msk [vmem:[%s10703_s22 + $0x28] sm:$0xff] %vm403_vm0, %v6880_v8  ;;  %v6789_v40 = vmul.f32 %v6676_v54, %v6597_v16  ;;  %v6600_v20 = vadd.f32 %v6568_v46, %v11415_v42  ;;  %v6523_v27 = vpack.i.b16 %v10839_v13, %v10850_v43  ;;  %v6447_v8 = vpack.i.b16 %v6446_v29, %v6445_v37  ;;  %v11417_v46 = vld [vmem:[#allocation31_spill] sm:$0xff] }
 0x9d2   : > { %v6815_v45 = vmul.f32 %v10681_v58, %v6782_v2  ;;  %v6283_v54 = vrot.slane %v10756_v50, 4  ;;  %v6451_v50 = vpack.i.b16 %v10777_v59, %v10801_v22  ;;  %v6853_v59 = vunpack.c.l.bf16 %v1610_v35 }
 0x9d3   : > { %v6822_v17 = vmul.f32 %v10681_v58, %v6789_v40  ;;  %v6571_v2 = vunpack.c.l.bf16 %v6523_v27  ;;  %v11416_v40 = vld [vmem:[#allocation59_spill] sm:$0xff] }
 0x9d4   : > { %v6879_v63 = vadd.f32 %v6847_v28, %v6815_v45  ;;  %v6595_v5 = vadd.f32 %v6563_v53, %v11416_v40  ;;  %v6312_v45 = vsel %vm800_vm2, 0, %v6311_v23  ;;  %v6421_v53 = vrot.slane %v10839_v13, 4 }
 0x9d5   : > { %v6886_v33 = vadd.f32 %v6854_v4, %v6822_v17  ;;  %v6564_v4 = vunpack.c.l.bf16 %v6447_v8  ;;  %v6603_v29 = vadd.f32 %v6571_v2, %v11417_v46 }
 0x9d6   : > { %6911 = vst.msk [vmem:[%s10703_s22 + $0x20] sm:$0xff] %vm403_vm0, %v6879_v63  ;;  %v10871_v63 = vld [vmem:[%s8129_s29 + $0x44] sm:$0xff]  }
 0x9d7   : > { %6918 = vst.msk [vmem:[%s10703_s22 + $0x58] sm:$0xff] %vm403_vm0, %v6886_v33  ;;  %v6656_v11 = vpop.permute.xlu1 %6655  ;;  %v6284_v33 = vsel %vm800_vm2, 0, %v6283_v54  ;;  %v6393_v54 = vrot.slane %v10850_v43, 4 }
 0x9d8   : > { %v6785_v51 = vmul.f32 %v6656_v11, %v6593_v47  ;;  %v6596_v47 = vadd.f32 %v6564_v4, %v11418_v21  ;;  %v6515_v12 = vpack.i.b16 %v6312_v45, %v6284_v33  ;;  %v11420_v4 = vld [vmem:[#allocation17_spill] sm:$0xff] }
 0x9d9   : > { %v10904_v46 = vsel %vm800_vm2, 0, %v6393_v54  ;;  %v6525_v54 = vshrl.u32 %v10850_v43, 16 }
 0x9da   : > { %v6818_v6 = vmul.f32 %v10681_v58, %v6785_v51  ;;  %v6691_v16 = vpop.permute.xlu2 %6690 }
 0x9db   : > { %v6792_v15 = vmul.f32 %v6691_v16, %v6600_v20  ;;  %v6566_v20 = vunpack.c.l.bf16 %v6451_v50  ;;  %v6518_v16 = vshrl.u32 %v6312_v45, 16 }
 0x9dc   : > { %v6882_v1 = vadd.f32 %v6850_v55, %v6818_v6  ;;  %v6860_v55 = vunpack.c.l.bf16 %v10871_v63  ;;  %v6567_v6 = vunpack.c.l.bf16 %v6515_v12 }
 0x9dd   : > { %v6825_v28 = vmul.f32 %v10681_v58, %v6792_v15  ;;  %v6517_v15 = vshrl.u32 %v6284_v33, 16  ;;  %v6574_v33 = vunpack.c.l.bf16 %v6467_v44  ;;  %v11422_v44 = vld [vmem:[#allocation15_spill] sm:$0xff] }
 0x9de   : > { %6914 = vst.msk [vmem:[%s10703_s22 + $0x38] sm:$0xff] %vm403_vm0, %v6882_v1  ;;  %v1613_v1 = vld [vmem:[%s8129_s29 + $0x34] sm:$0xf]  ;;  %v6599_v40 = vadd.f32 %v6567_v6, %v11420_v4  ;;  %v6570_v6 = vunpack.c.l.bf16 %v6459_v34  ;;  %v11424_v34 = vld [vmem:[#allocation62_spill] sm:$0xff] }
 0x9df   : > { %v6889_v60 = vadd.f32 %v6857_v7, %v6825_v28  ;;  %v6666_v19 = vpop.permute.xlu1 %6665  ;;  %v11419_v28 = vld [vmem:[#allocation34_spill] sm:$0xff]  ;;  %v6856_v35 = vunpack.c.l.bf16 %v1613_v1  ;;  %v6606_v18 = vadd.f32 %v6574_v33, %v11421_v30 }
 0x9e0   : > { %v6787_v17 = vmul.f32 %v6666_v19, %v6595_v5  ;;  %v6598_v2 = vadd.f32 %v6566_v20, %v11419_v28  ;;  %v6519_v5 = vpack.i.b16 %v6518_v16, %v6517_v15  ;;  %v10897_v19 = vsel %vm800_vm2, 0, %v6421_v53 }
 0x9e1   : > { %6921 = vst.msk [vmem:[%s10703_s22 + $0x70] sm:$0xff] %vm403_vm0, %v6889_v60  ;;  %v6534_v12 = vshrl.u32 %v10897_v19, 16  ;;  %v6411_v28 = vrot.slane %v10822_v26, 4  ;;  %v6602_v4 = vadd.f32 %v6570_v6, %v11424_v34  ;;  %v6531_v30 = vpack.i.b16 %v10897_v19, %v10904_v46 }
 0x9e2   : > { %v6820_v11 = vmul.f32 %v10681_v58, %v6787_v17  ;;  %v6706_v62 = vpop.permute.xlu2 %6705  ;;  %v6671_v37 = vpop.permute.xlu0 %6670 }
 0x9e3   : > { %v6795_v51 = vmul.f32 %v6706_v62, %v6603_v29  ;;  %v6788_v22 = vmul.f32 %v6671_v37, %v6596_v47  ;;  %v6569_v47 = vunpack.c.l.bf16 %v6519_v5  ;;  %v6533_v62 = vshrl.u32 %v10904_v46, 16  ;;  %v10911_v37 = vld [vmem:[%s8129_s29 + $0x50] sm:$0xff]  }
 0x9e4   : > { %v6884_v42 = vadd.f32 %v6852_v0, %v6820_v11  ;;  %v6855_v0 = vunpack.c.h.bf16 %v10810_v39  ;;  %v6383_v5 = vrot.slane %v10830_v9, 4  ;;  %v6580_v46 = vunpack.c.l.bf16 %v10526_v31 }
 0x9e5   : > { %v6828_v27 = vmul.f32 %v10681_v58, %v6795_v51  ;;  %v6821_v8 = vmul.f32 %v10681_v58, %v6788_v22  ;;  %v6535_v51 = vpack.i.b16 %v6534_v12, %v6533_v62  ;;  %v11426_v62 = vld [vmem:[#allocation29_spill] sm:$0xff] }
 0x9e6   : > { %6916 = vst.msk [vmem:[%s10703_s22 + $0x48] sm:$0xff] %vm403_vm0, %v6884_v42  ;;  %v6863_v42 = vunpack.c.l.bf16 %v10911_v37  ;;  %v6384_v9 = vsel %vm800_vm2, %v10797_v38, %v6383_v5 }
 0x9e7   : > { %v6892_v23 = vadd.f32 %v6860_v55, %v6828_v27  ;;  %v6885_v7 = vadd.f32 %v6853_v59, %v6821_v8  ;;  %v6601_v55 = vadd.f32 %v6569_v47, %v11422_v44  ;;  %v6858_v27 = vunpack.c.h.bf16 %v10855_v25  ;;  %v10930_v25 = vld [vmem:[%s8129_s29 + $0x5c] sm:$0xff]  }
 0x9e8   : > { %v10952_v12 = vperm.slane %v6384_v9, %v11394_v32 }
 0x9e9   : > { %6924 = vst.msk [vmem:[%s10703_s22 + $0x88] sm:$0xff] %vm403_vm0, %v6892_v23  ;;  %v6577_v23 = vunpack.c.l.bf16 %v6535_v51 }
 0x9ea   : > { %6917 = vst.msk [vmem:[%s10703_s22 + $0x50] sm:$0xff] %vm403_vm0, %v6885_v7  ;;  %v6681_v45 = vpop.permute.xlu1 %6680  ;;  %v6686_v60 = vpop.permute.xlu0 %6685  ;;  %v6526_v7 = vshrl.u32 %v10839_v13, 16  ;;  %v6412_v13 = vsel %vm800_vm2, %v10791_v56, %v6411_v28 }
 0x9eb   : > { %v6790_v17 = vmul.f32 %v6681_v45, %v6598_v2  ;;  %v6791_v50 = vmul.f32 %v6686_v60, %v6599_v40  ;;  %v1616_v2 = vld [vmem:[%s8129_s29 + $0x40] sm:$0xf]  ;;  %v6609_v3 = vadd.f32 %v6577_v23, %v11423_v52  ;;  %v6866_v45 = vunpack.c.l.bf16 %v10930_v25  ;;  %v11427_v23 = vld [vmem:[#allocation32_spill] sm:$0xff] }
 0x9ec   : > { %v6527_v40 = vpack.i.b16 %v6526_v7, %v6525_v54  ;;  %v6612_v7 = vadd.f32 %v6580_v46, %v11427_v23  ;;  %v11433_v23 = vld [vmem:[#allocation16_spill] sm:$0xff] }
 0x9ed   : > { %v6823_v29 = vmul.f32 %v10681_v58, %v6790_v17  ;;  %v6824_v21 = vmul.f32 %v10681_v58, %v6791_v50 }
 0x9ee   : > { %v6573_v33 = vunpack.c.l.bf16 %v6527_v40 }
 0x9ef   : > { %v6887_v11 = vadd.f32 %v6855_v0, %v6823_v29  ;;  %v6888_v39 = vadd.f32 %v6856_v35, %v6824_v21  ;;  %v6859_v0 = vunpack.c.l.bf16 %v1616_v2  ;;  %v6572_v35 = vunpack.c.l.bf16 %v10517_v24  ;;  %v11425_v24 = vld [vmem:[#allocation28_spill] sm:$0xff] }
 0x9f0   : > { %v10949_v29 = vperm.slane %v6412_v13, %v11394_v32  ;;  %v6605_v38 = vadd.f32 %v6573_v33, %v11426_v62  ;;  %v6861_v32 = vunpack.c.h.bf16 %v10871_v63  ;;  %v6576_v13 = vunpack.c.l.bf16 %v10528_v14 }
 0x9f1   : > { %6919 = vst.msk [vmem:[%s10703_s22 + $0x60] sm:$0xff] %vm403_vm0, %v6887_v11  ;;  %v1619_v11 = vld [vmem:[%s8129_s29 + $0x4c] sm:$0xf] }
 0x9f2   : > { %6920 = vst.msk [vmem:[%s10703_s22 + $0x68] sm:$0xff] %vm403_vm0, %v6888_v39  ;;  %v6721_v59 = vpop.permute.xlu2 %6720  ;;  %v6696_v22 = vpop.permute.xlu1 %6695  ;;  %v6604_v39 = vadd.f32 %v6572_v35, %v11425_v24  ;;  %v11430_v35 = vld [vmem:[#allocation19_spill] sm:$0xff] }
 0x9f3   : > { %v6798_v20 = vmul.f32 %v6721_v59, %v6606_v18  ;;  %v6793_v8 = vmul.f32 %v6696_v22, %v6601_v55  ;;  %v6423_v55 = vrot.slane %v10949_v29, 4  ;;  %v6862_v59 = vunpack.c.l.bf16 %v1619_v11 }
 0x9f4   : > { %v6608_v9 = vadd.f32 %v6576_v13, %v11430_v35  ;;  %v6578_v11 = vunpack.c.l.bf16 %v6475_v36 }
 0x9f5   : > { %v6831_v16 = vmul.f32 %v10681_v58, %v6798_v20  ;;  %v6826_v53 = vmul.f32 %v10681_v58, %v6793_v8  ;;  %v10970_v8 = vsel %vm800_vm2, 0, %v6423_v55  ;;  %v1625_v55 = vld [vmem:[%s8129_s29 + $0x64] sm:$0xf] }
 0x9f7   : > { %v6895_v15 = vadd.f32 %v6863_v42, %v6831_v16  ;;  %v6890_v1 = vadd.f32 %v6858_v27, %v6826_v53  ;;  %v6395_v42 = vrot.slane %v10952_v12, 4  ;;  %v6575_v27 = vunpack.c.l.bf16 %v6531_v30  ;;  %v10973_v53 = vld [vmem:[%s8129_s29 + $0x68] sm:$0xff]  }
 0x9f8   : > { %v6869_v2 = vunpack.c.l.bf16 %v10973_v53 }
 0x9f9   : > { %6927 = vst.msk [vmem:[%s10703_s22 + $0xa0] sm:$0xff] %vm403_vm0, %v6895_v15  ;;  %v10976_v63 = vsel %vm800_vm2, 0, %v6395_v42  ;;  %v11428_v15 = vld [vmem:[#allocation21_spill] sm:$0xff] }
 0x9fa   : > { %6922 = vst.msk [vmem:[%s10703_s22 + $0x78] sm:$0xff] %vm403_vm0, %v6890_v1  ;;  %v6736_v43 = vpop.permute.xlu2 %6735  ;;  %v6701_v26 = vpop.permute.xlu0 %6700  ;;  %v6607_v1 = vadd.f32 %v6575_v27, %v11428_v15  ;;  %v6547_v31 = vpack.i.b16 %v10970_v8, %v10976_v63 }
 0x9fb   : > { %v6801_v60 = vmul.f32 %v6736_v43, %v6609_v3  ;;  %v6794_v17 = vmul.f32 %v6701_v26, %v6602_v4  ;;  %v6864_v3 = vunpack.c.h.bf16 %v10911_v37  ;;  %v6539_v37 = vpack.i.b16 %v10949_v29, %v10952_v12 }
 0x9fc   : > { %v6583_v5 = vunpack.c.l.bf16 %v6547_v31 }
 0x9fd   : > { %v6834_v50 = vmul.f32 %v10681_v58, %v6801_v60  ;;  %v6827_v56 = vmul.f32 %v10681_v58, %v6794_v17  ;;  %v1622_v60 = vld [vmem:[%s8129_s29 + $0x58] sm:$0xf]  ;;  %v6579_v62 = vunpack.c.l.bf16 %v6539_v37 }
 0x9ff   : > { %v6898_v21 = vadd.f32 %v6866_v45, %v6834_v50  ;;  %v6891_v47 = vadd.f32 %v6859_v0, %v6827_v56  ;;  %v10992_v45 = vld [vmem:[%s8129_s29 + $0x74] sm:$0xff]   ;;  %v11429_v0 = vld [vmem:[#allocation35_spill] sm:$0xff] }
 0xa00   : > { %v6615_v17 = vadd.f32 %v6583_v5, %v11429_v0  ;;  %v6872_v56 = vunpack.c.l.bf16 %v10992_v45  ;;  %v6873_v10 = vunpack.c.h.bf16 %v10992_v45 }
 0xa01   : > { %6930 = vst.msk [vmem:[%s10703_s22 + $0xb8] sm:$0xff] %vm403_vm0, %v6898_v21  ;;  %v6865_v21 = vunpack.c.l.bf16 %v1622_v60  ;;  %v11436_v60 = vld [vmem:[#allocation36_spill] sm:$0xff] }
 0xa02   : > { %6923 = vst.msk [vmem:[%s10703_s22 + $0x80] sm:$0xff] %vm403_vm0, %v6891_v47  ;;  %v6711_v18 = vpop.permute.xlu1 %6710  ;;  %v6716_v44 = vpop.permute.xlu0 %6715 }
 0xa03   : > { %v6796_v51 = vmul.f32 %v6711_v18, %v6604_v39  ;;  %v6797_v22 = vmul.f32 %v6716_v44, %v6605_v38  ;;  %v6542_v38 = vshrl.u32 %v10949_v29, 16  ;;  %v6541_v44 = vshrl.u32 %v10952_v12, 16 }
 0xa04   : > { %v6867_v29 = vunpack.c.h.bf16 %v10930_v25  ;;  %v6870_v25 = vunpack.c.h.bf16 %v10973_v53 }
 0xa05   : > { %v6829_v20 = vmul.f32 %v10681_v58, %v6796_v51  ;;  %v6830_v19 = vmul.f32 %v10681_v58, %v6797_v22  ;;  %v6543_v57 = vpack.i.b16 %v6542_v38, %v6541_v44 }
 0xa07   : > { %v6893_v6 = vadd.f32 %v6861_v32, %v6829_v20  ;;  %v6894_v16 = vadd.f32 %v6862_v59, %v6830_v19  ;;  %v11431_v32 = vld [vmem:[#allocation11_spill] sm:$0xff]  ;;  %v11432_v59 = vld [vmem:[#allocation10_spill] sm:$0xff]  ;;  %v6868_v20 = vunpack.c.l.bf16 %v1625_v55  ;;  %v6581_v27 = vunpack.c.l.bf16 %v6543_v57 }
 0xa08   : > { %v6610_v51 = vadd.f32 %v6578_v11, %v11431_v32  ;;  %v6611_v49 = vadd.f32 %v6579_v62, %v11432_v59 }
 0xa09   : > { %6925 = vst.msk [vmem:[%s10703_s22 + $0x90] sm:$0xff] %vm403_vm0, %v6893_v6 }
 0xa0a   : > { %6926 = vst.msk [vmem:[%s10703_s22 + $0x98] sm:$0xff] %vm403_vm0, %v6894_v16  ;;  %v6751_v54 = vpop.permute.xlu2 %6750  ;;  %v6726_v28 = vpop.permute.xlu1 %6725 }
 0xa0b   : > { %v6804_v52 = vmul.f32 %v6751_v54, %v6612_v7  ;;  %v6799_v34 = vmul.f32 %v6726_v28, %v6607_v1  ;;  %v6613_v7 = vadd.f32 %v6581_v27, %v11433_v23  ;;  %v6582_v54 = vunpack.c.l.bf16 %v6483_v61 }
 0xa0c   : > { %v6550_v28 = vshrl.u32 %v10970_v8, 16  ;;  %v1631_v8 = vld [vmem:[%s8129_s29 + $0x7c] sm:$0xf] }
 0xa0d   : > { %v6837_v4 = vmul.f32 %v10681_v58, %v6804_v52  ;;  %v6832_v40 = vmul.f32 %v10681_v58, %v6799_v34  ;;  %v6549_v52 = vshrl.u32 %v10976_v63, 16  ;;  %v11434_v34 = vld [vmem:[#allocation25_spill] sm:$0xff]  ;;  %v11435_v63 = vld [vmem:[#allocation23_spill] sm:$0xff]  ;;  %v6874_v37 = vunpack.c.l.bf16 %v1631_v8 }
 0xa0e   : > { %v6614_v53 = vadd.f32 %v6582_v54, %v11434_v34 }
 0xa0f   : > { %v6901_v43 = vadd.f32 %v6869_v2, %v6837_v4  ;;  %v6896_v26 = vadd.f32 %v6864_v3, %v6832_v40  ;;  %v1628_v3 = vld [vmem:[%s8129_s29 + $0x70] sm:$0xf]  ;;  %v6551_v4 = vpack.i.b16 %v6550_v28, %v6549_v52  ;;  %s6957_s29 = sshll.u32 %s6954_s12, 4  ;;  %s6958_s29 = int_to_ptr.hbm [resolvable:$true] %s6957_s29 }
 0xa10   : > { %v6871_v5 = vunpack.c.l.bf16 %v1628_v3  ;;  %s7947_s14 = sshra.s32 %s6958_s29, 4  ;;  %s7948_s14 = int_to_ptr.hbm [resolvable:$true] %s7947_s14 }
 0xa11   : > { %6933 = vst.msk [vmem:[%s10703_s22 + $0xd0] sm:$0xff] %vm403_vm0, %v6901_v43  ;;  %v6585_v41 = vunpack.c.l.bf16 %v6551_v4  ;;  %s7949_s15 = scalar_lea.hbm %s7948_s14, 256  ;;  %p7954_p1 = scmp.lt.s32.totalorder %s7948_s14, %s11096_s6 }
 0xa12   : > { %6928 = vst.msk [vmem:[%s10703_s22 + $0xa8] sm:$0xff] %vm403_vm0, %v6896_v26  ;;  %v6766_v50 = vpop.permute.xlu2 %6765  ;;  %v6731_v14 = vpop.permute.xlu0 %6730  ;;  %v6616_v26 = vadd.f32 %v6584_v48, %v11435_v63  ;;  %p7950_p12 = scmp.ne.s32.totalorder %s7948_s14, %s7949_s15  ;;  %p7955_p2 = scmp.lt.s32.totalorder %s7953_s18, %s7949_s15 }
 0xa13   : > { %v6807_v33 = vmul.f32 %v6766_v50, %v6615_v17  ;;  %v6800_v47 = vmul.f32 %v6731_v14, %v6608_v9  ;;  %v6617_v0 = vadd.f32 %v6585_v41, %v11436_v60 }
 0xa14   : > { %p7951_p13 = pnand %p7950_p12, %p8097_p4  ;;  %p7956_p3 = por %p7955_p2, %p7954_p1 }
 0xa15   : > { %v6840_v24 = vmul.f32 %v10681_v58, %v6807_v33  ;;  %v6833_v39 = vmul.f32 %v10681_v58, %v6800_v47 }
 0xa16   : > { %p7952_p0 = pneg %p7951_p13 }
 0xa17   : > { %v6904_v30 = vadd.f32 %v6872_v56, %v6840_v24  ;;  %v6897_v18 = vadd.f32 %v6865_v21, %v6833_v39 }
 0xa18   : > { %p7957_p5 = pnand %p7956_p3, %p7952_p0 }
 0xa19   : > { %6936 = vst.msk [vmem:[%s10703_s22 + $0xe8] sm:$0xff] %vm403_vm0, %v6904_v30 }
 0xa1a   : > { %6929 = vst.msk [vmem:[%s10703_s22 + $0xb0] sm:$0xff] %vm403_vm0, %v6897_v18  ;;  %v6741_v36 = vpop.permute.xlu1 %6740  ;;  %v6746_v22 = vpop.permute.xlu0 %6745 }
 0xa1b   : > { %v6802_v42 = vmul.f32 %v6741_v36, %v6610_v51  ;;  %v6803_v19 = vmul.f32 %v6746_v22, %v6611_v49 }
 0xa1d   : > { %v6835_v12 = vmul.f32 %v10681_v58, %v6802_v42  ;;  %v6836_v46 = vmul.f32 %v10681_v58, %v6803_v19 }
 0xa1f   : > { %v6899_v6 = vadd.f32 %v6867_v29, %v6835_v12  ;;  %v6900_v16 = vadd.f32 %v6868_v20, %v6836_v46 }
 0xa21   : > { %6931 = vst.msk [vmem:[%s10703_s22 + $0xc0] sm:$0xff] %vm403_vm0, %v6899_v6 }
 0xa22   : > { %6932 = vst.msk [vmem:[%s10703_s22 + $0xc8] sm:$0xff] %vm403_vm0, %v6900_v16  ;;  %v6756_v15 = vpop.permute.xlu1 %6755 }
 0xa23   : > { %v6805_v1 = vmul.f32 %v6756_v15, %v6613_v7 }
 0xa25   : > { %v6838_v31 = vmul.f32 %v10681_v58, %v6805_v1 }
 0xa27   : > { %v6902_v2 = vadd.f32 %v6870_v25, %v6838_v31 }
 0xa29   : > { %6934 = vst.msk [vmem:[%s10703_s22 + $0xd8] sm:$0xff] %vm403_vm0, %v6902_v2 }
 0xa2a   : > { %v6761_v40 = vpop.permute.xlu0 %6760 }
 0xa2b   : > { %v6806_v13 = vmul.f32 %v6761_v40, %v6614_v53 }
 0xa2d   : > { %v6839_v43 = vmul.f32 %v10681_v58, %v6806_v13 }
 0xa2f   : > { %v6903_v61 = vadd.f32 %v6871_v5, %v6839_v43 }
 0xa31   : > { %6935 = vst.msk [vmem:[%s10703_s22 + $0xe0] sm:$0xff] %vm403_vm0, %v6903_v61 }
 0xa32   : > { %v6771_v17 = vpop.permute.xlu1 %6770  ;;  %v6776_v35 = vpop.permute.xlu0 %6775 }
 0xa33   : > { %v6808_v9 = vmul.f32 %v6771_v17, %v6616_v26  ;;  %v6809_v50 = vmul.f32 %v6776_v35, %v6617_v0 }
 0xa35   : > { %v6841_v14 = vmul.f32 %v10681_v58, %v6808_v9  ;;  %v6842_v56 = vmul.f32 %v10681_v58, %v6809_v50 }
 0xa37   : > { %v6905_v33 = vadd.f32 %v6873_v10, %v6841_v14  ;;  %v6906_v21 = vadd.f32 %v6874_v37, %v6842_v56 }
 0xa39   : > { %6937 = vst.msk [vmem:[%s10703_s22 + $0xf0] sm:$0xff] %vm403_vm0, %v6905_v33 }
 0xa3a   : > { %6938 = vst.msk [vmem:[%s10703_s22 + $0xf8] sm:$0xff] %vm403_vm0, %v6906_v21 }
 0xa3b   : > { %7960 = shalt.err (!%p7957_p5)
}
 0xa3c   : > { %s8017_s20 = smov 128   ;;  %s8018_s22 = smov 8  }
 0xa3d   : > { %7642 = dma.vmem_to_hbm [thread:$0]  (%p8097_p4), %s6956_s26, 4096, %s6958_s29, %s6940_s13, %s8017_s20, %s8017_s20, %s8018_s22  }
 0xa3e PF: > { %p7648_p6 = scmp.ge.s32.totalorder %s8011_s28, 2  ;;  %s6972_s5 = sand.u32 1, %s7991_s23  }
 0xa3f   : > { %s6973_s7 = scalar_lea.sflag [#allocation8], %s6972_s5 }
 0xa40   : > { %p7645_p7 = pnand %p7648_p6, %p8104_p8 }
 0xa42   : > { %p7646_p9 = pneg %p7645_p7 }
 0xa44   : > { %7986 = dma.done.wait (%p7646_p9), %s6973_s7, 4096  }
 0xa45   : > { %7988 = vsyncadd (%p7646_p9), %s6973_s7, 4294963200  ;;  %s20_s28 = sadd.s32 1, %s8011_s28   ;;  %s11437_s23 = smov %s7995_s24 }
 0xa46   : > { %p17_p10 = scmp.ge.s32.totalorder %s20_s28, 4   ;;  %s11438_s24 = smov %s7999_s25 }
 0xa47   : > { %s11439_s25 = smov %s8110_s11  ;;  %s11440_s26 = smov %s8007_s27 }
 0xa48   : > { %s11441_s27 = smov %s11443_s30  ;;  %19 = sbr.rel (!%p17_p10) target bundleno = 6 (0x6), region = 83 }
 0xa4d   :  { %6979 = vsyncpa [#allocation8], 1 }
 0xa4e   :  { %6981 = vsyncpa [#allocation8 + $0x1], 1 }

</bundles_post_ra>
